<compile_context>
chip_gen: v7x
topology: tpu7x:2x2x1
jax: 0.10.0
libtpu: 0.0.40
codegen_flags: <defaults>
</compile_context>

<pallas_src>
import jax
import jax.numpy as jnp
from jax import lax
from jax.experimental import pallas as pl
from jax.experimental.pallas import tpu as pltpu

F32 = jnp.float32
N = 2           # batch
H0 = W0 = 16    # input spatial size
C_IN = 4
N_CLASSES = 3


# ---------------------------------------------------------------------------
# In-kernel helpers (everything below runs inside the single Pallas kernel)
# ---------------------------------------------------------------------------
def _row_select(h_out, h_in, stride, dy, pad):
    """(h_out, h_in) 0/1 matrix: output row h reads input row stride*h + dy - pad
    (rows out of range select nothing -> vertical zero padding)."""
    r = lax.broadcasted_iota(jnp.int32, (h_out, h_in), 1)
    h = lax.broadcasted_iota(jnp.int32, (h_out, h_in), 0)
    return (r == stride * h + (dy - pad)).astype(F32)


def _row_interleave(h_in, ky):
    """(2*h_in, h_in) 0/1 matrix: output row 2*h + ky reads input row h."""
    r = lax.broadcasted_iota(jnp.int32, (2 * h_in, h_in), 0)
    h = lax.broadcasted_iota(jnp.int32, (2 * h_in, h_in), 1)
    return (r == 2 * h + ky).astype(F32)


def _activate(x, act):
    if act == "relu":
        return jnp.maximum(x, 0.0)
    if act == "sigmoid":
        return jax.nn.sigmoid(x)
    return x


def _conv(xs, w_ref, b_ref, *, h_in, h_out, stride, pad=1, act="none"):
    """Conv2d on per-image slabs in the interleaved (rows, W*C) layout.

    xs:     list of per-image (h_in, Win*Cin) values.
    w_ref:  (ntaps, Win*Cin, Wout*Cout) banded weights (dx taps folded into K).
    b_ref:  (1, Wout*Cout) pre-tiled bias.
    """
    ntaps = w_ref.shape[0]
    ncols = b_ref.shape[-1]
    sels = [_row_select(h_out, h_in, stride, dy, pad) for dy in range(ntaps)]
    outs = []
    for x in xs:
        acc = jnp.zeros((h_out, ncols), F32) + b_ref[...]
        for dy in range(ntaps):
            rows = jnp.dot(sels[dy], x, preferred_element_type=F32)
            acc = acc + jnp.dot(rows, w_ref[dy], preferred_element_type=F32)
        outs.append(_activate(acc, act))
    return outs


def _conv_cat(ups, skips, wu_ref, ws_ref, b_ref, *, h, act="relu"):
    """conv1 of a UnetBlock: torch.cat([up, skip], dim=1) folded into split-K
    GEMM accumulation (no concatenated tensor is ever materialized)."""
    ncols = b_ref.shape[-1]
    sels = [_row_select(h, h, 1, dy, 1) for dy in range(3)]
    outs = []
    for u, s in zip(ups, skips):
        acc = jnp.zeros((h, ncols), F32) + b_ref[...]
        for dy in range(3):
            acc = acc + jnp.dot(jnp.dot(sels[dy], u, preferred_element_type=F32),
                                wu_ref[dy], preferred_element_type=F32)
            acc = acc + jnp.dot(jnp.dot(sels[dy], s, preferred_element_type=F32),
                                ws_ref[dy], preferred_element_type=F32)
        outs.append(_activate(acc, act))
    return outs


def _conv_transpose(xs, w_ref, b_ref, *, h_in):
    """ConvTranspose2d(k=2, s=2): two GEMMs (ky=0/1) + in-VMEM row interleave."""
    ncols = b_ref.shape[-1]
    ils = [_row_interleave(h_in, ky) for ky in range(2)]
    outs = []
    for x in xs:
        out = jnp.zeros((2 * h_in, ncols), F32) + b_ref[...]
        for ky in range(2):
            a = jnp.dot(x, w_ref[ky], preferred_element_type=F32)
            out = out + jnp.dot(ils[ky], a, preferred_element_type=F32)
        outs.append(out)
    return outs


def _batchnorm(xs, g_ref, b_ref, *, w, c, eps=1e-5):
    """BatchNorm2d (training mode, biased batch stats, two-pass variance).

    xs: per-image (h, w*c) slabs; channel ch lives at lane x*c + ch.
    """
    # TODO(synk): running-mean/var buffer updates (a training-mode side effect
    # of nn.BatchNorm2d) are not tracked; only the normalized output is produced.
    m = len(xs) * xs[0].shape[0] * w
    s = jnp.zeros((1, c), F32)
    for x in xs:
        for xi in range(w):
            s = s + jnp.sum(x[:, xi * c:(xi + 1) * c], axis=0, keepdims=True)
    mean = s * (1.0 / m)
    mean_wc = jnp.concatenate([mean] * w, axis=1)
    v = jnp.zeros((1, c), F32)
    for x in xs:
        d = x - mean_wc
        d = d * d
        for xi in range(w):
            v = v + jnp.sum(d[:, xi * c:(xi + 1) * c], axis=0, keepdims=True)
    var = v * (1.0 / m)
    scale = g_ref[...] * lax.rsqrt(var + eps)
    shift = b_ref[...] - mean * scale
    scale_wc = jnp.concatenate([scale] * w, axis=1)
    shift_wc = jnp.concatenate([shift] * w, axis=1)
    return [x * scale_wc + shift_wc for x in xs]


# ---------------------------------------------------------------------------
# The single fused kernel
# ---------------------------------------------------------------------------
def _dynamic_unet_kernel(
    x_ref,
    e0_w, e0_b, e1_w, e1_b, e2_w, e2_b, e3_w, e3_b,
    m1_w, m1_b, m1_g, m1_bb, m2_w, m2_b, m2_g, m2_bb,
    u2u_w, u2u_b, u2c1u_w, u2c1s_w, u2c1_b, u2c2_w, u2c2_b, u2_g, u2_bb,
    u1u_w, u1u_b, u1c1u_w, u1c1s_w, u1c1_b, u1c2_w, u1c2_b, u1_g, u1_bb,
    fin_w, fin_b,
    o_ref,
):
    # per-image slabs (values stay resident in VMEM/vregs for the whole pass)
    xs = [x_ref[n * H0:(n + 1) * H0, :] for n in range(N)]

    # --- encoder (SaveFeatures hooks == raw conv outputs) --------------------
    f0 = _conv(xs, e0_w, e0_b, h_in=16, h_out=16, stride=1)
    f1 = _conv(f0, e1_w, e1_b, h_in=16, h_out=16, stride=1)      # skip for u1
    f2 = _conv(f1, e2_w, e2_b, h_in=16, h_out=8, stride=2)       # skip for u2
    # F.relu(encoder(x)) fused into the last encoder conv
    # (the pre-relu saved feature of the last child is never consumed).
    h = _conv(f2, e3_w, e3_b, h_in=8, h_out=4, stride=2, act="relu")

    # --- middle_conv: (conv -> relu -> bn) x 2 --------------------------------
    h = _conv(h, m1_w, m1_b, h_in=4, h_out=4, stride=1, act="relu")
    h = _batchnorm(h, m1_g, m1_bb, w=4, c=64)
    h = _conv(h, m2_w, m2_b, h_in=4, h_out=4, stride=1, act="relu")
    h = _batchnorm(h, m2_g, m2_bb, w=4, c=32)

    # --- UnetBlock(32, 16): skip = enc2 output --------------------------------
    up = _conv_transpose(h, u2u_w, u2u_b, h_in=4)                # (8, 8*16)
    h = _conv_cat(up, f2, u2c1u_w, u2c1s_w, u2c1_b, h=8)
    h = _conv(h, u2c2_w, u2c2_b, h_in=8, h_out=8, stride=1, act="relu")
    h = _batchnorm(h, u2_g, u2_bb, w=8, c=16)

    # --- UnetBlock(16, 8): skip = enc1 output ---------------------------------
    up = _conv_transpose(h, u1u_w, u1u_b, h_in=8)                # (16, 16*8)
    h = _conv_cat(up, f1, u1c1u_w, u1c1s_w, u1c1_b, h=16)
    h = _conv(h, u1c2_w, u1c2_b, h_in=16, h_out=16, stride=1, act="relu")
    h = _batchnorm(h, u1_g, u1_bb, w=16, c=8)

    # --- final 1x1 conv + sigmoid (fused) --------------------------------------
    out = _conv(h, fin_w, fin_b, h_in=16, h_out=16, stride=1, pad=0,
                act="sigmoid")
    for n in range(N):
        o_ref[n * H0:(n + 1) * H0, :] = out[n]


# ---------------------------------------------------------------------------
# Host-side weight preprocessing (pure-JAX glue on parameters, not activations)
# ---------------------------------------------------------------------------
def _band_conv_weight(w, w_in, w_out, stride, pad):
    """Fold the horizontal (dx) taps and x zero-padding of a conv into K.

    w: (kh, kw, cin, cout)  ->  (kh, w_in*cin, w_out*cout) with
    entry [dy, x_in*cin+ci, x_out*cout+co] = w[dy, dx, ci, co]
    where x_in = stride*x_out + dx - pad (zero if out of range).
    """
    kh, kw, cin, cout = w.shape
    dx = jnp.arange(kw)[:, None, None]
    xi = jnp.arange(w_in)[None, :, None]
    xo = jnp.arange(w_out)[None, None, :]
    sel = (xi == stride * xo + dx - pad).astype(w.dtype)      # (kw, w_in, w_out)
    m = jnp.einsum("kio,dkab->diaob", sel, w,
                   precision=lax.Precision.HIGHEST)           # exact 0/1 scatter
    return m.reshape(kh, w_in * cin, w_out * cout)


def _band_convT_weight(w, w_in):
    """ConvTranspose2d(k=2, s=2) weights as two GEMM matrices (one per ky).

    w: (cin, 2, 2, cout)  ->  (2, w_in*cin, 2*w_in*cout) with
    entry [ky, x*cin+ci, (2x+kx)*cout+co] = w[ci, ky, kx, co].
    """
    cin, kh, kw, cout = w.shape
    kx = jnp.arange(kw)[:, None, None]
    xi = jnp.arange(w_in)[None, :, None]
    xo = jnp.arange(2 * w_in)[None, None, :]
    sel = (xo == 2 * xi + kx).astype(w.dtype)                 # (kw, w_in, 2*w_in)
    m = jnp.einsum("kiz,aykb->yiazb", sel, w,
                   precision=lax.Precision.HIGHEST)
    return m.reshape(kh, w_in * cin, 2 * w_in * cout)


def _tiled_bias(b, w_out):
    return jnp.tile(b, w_out).reshape(1, w_out * b.shape[0])


# ---------------------------------------------------------------------------
# Parameter init (deterministic, synthetic)
# ---------------------------------------------------------------------------
def _conv_init(key, cin, cout, k):
    kw_, kb_ = jax.random.split(key)
    fan_in = cin * k * k
    w = jax.random.normal(kw_, (k, k, cin, cout), F32) / jnp.sqrt(fan_in)
    b = jax.random.normal(kb_, (cout,), F32) * 0.01
    return w, b


def _convT_init(key, cin, cout):
    kw_, kb_ = jax.random.split(key)
    w = jax.random.normal(kw_, (cin, 2, 2, cout), F32) / jnp.sqrt(cin * 4)
    b = jax.random.normal(kb_, (cout,), F32) * 0.01
    return w, b


def _bn_init(c):
    # PyTorch default: gamma=1, beta=0
    return jnp.ones((c,), F32), jnp.zeros((c,), F32)


def init_params(key):
    keys = jax.random.split(key, 16)
    p = {}
    p["e0"] = _conv_init(keys[0], 4, 8, 3)
    p["e1"] = _conv_init(keys[1], 8, 8, 3)
    p["e2"] = _conv_init(keys[2], 8, 16, 3)
    p["e3"] = _conv_init(keys[3], 16, 32, 3)
    p["m1"], p["m1_bn"] = _conv_init(keys[4], 32, 64, 3), _bn_init(64)
    p["m2"], p["m2_bn"] = _conv_init(keys[5], 64, 32, 3), _bn_init(32)
    p["u2"] = {"up": _convT_init(keys[6], 32, 16),
               "c1": _conv_init(keys[7], 32, 16, 3),
               "c2": _conv_init(keys[8], 16, 16, 3),
               "bn": _bn_init(16)}
    p["u1"] = {"up": _convT_init(keys[9], 16, 8),
               "c1": _conv_init(keys[10], 16, 8, 3),
               "c2": _conv_init(keys[11], 8, 8, 3),
               "bn": _bn_init(8)}
    p["final"] = _conv_init(keys[12], 8, 3, 1)
    return p


# ---------------------------------------------------------------------------
# Forward: build GEMM-ready weights, run the single fused kernel
# ---------------------------------------------------------------------------
def dynamic_unet_forward(params, x_nchw):
    n, cin, h0, w0 = x_nchw.shape
    # NCHW -> NHWC -> interleaved 2D: row = img*H + y, lane = x*C + c.
    x2d = jnp.transpose(x_nchw, (0, 2, 3, 1)).reshape(n * h0, w0 * cin)

    ops = []

    def add_conv(w, b, w_in, w_out, stride, pad=1):
        ops.append(_band_conv_weight(w, w_in, w_out, stride, pad))
        ops.append(_tiled_bias(b, w_out))

    def add_convT(w, b, w_in):
        ops.append(_band_convT_weight(w, w_in))
        ops.append(_tiled_bias(b, 2 * w_in))

    def add_bn(gb):
        g, be = gb
        ops.append(g.reshape(1, -1))
        ops.append(be.reshape(1, -1))

    # encoder
    add_conv(*params["e0"], 16, 16, 1)
    add_conv(*params["e1"], 16, 16, 1)
    add_conv(*params["e2"], 16, 8, 2)
    add_conv(*params["e3"], 8, 4, 2)
    # middle_conv
    add_conv(*params["m1"], 4, 4, 1)
    add_bn(params["m1_bn"])
    add_conv(*params["m2"], 4, 4, 1)
    add_bn(params["m2_bn"])
    # UnetBlock(32, 16)
    add_convT(*params["u2"]["up"], 4)
    w1, b1 = params["u2"]["c1"]
    ops.append(_band_conv_weight(w1[:, :, :16, :], 8, 8, 1, 1))   # up half of cat
    ops.append(_band_conv_weight(w1[:, :, 16:, :], 8, 8, 1, 1))   # skip half of cat
    ops.append(_tiled_bias(b1, 8))
    add_conv(*params["u2"]["c2"], 8, 8, 1)
    add_bn(params["u2"]["bn"])
    # UnetBlock(16, 8)
    add_convT(*params["u1"]["up"], 8)
    w1, b1 = params["u1"]["c1"]
    ops.append(_band_conv_weight(w1[:, :, :8, :], 16, 16, 1, 1))
    ops.append(_band_conv_weight(w1[:, :, 8:, :], 16, 16, 1, 1))
    ops.append(_tiled_bias(b1, 16))
    add_conv(*params["u1"]["c2"], 16, 16, 1)
    add_bn(params["u1"]["bn"])
    # final 1x1 conv
    add_conv(*params["final"], 16, 16, 1, pad=0)

    out2d = pl.pallas_call(
        _dynamic_unet_kernel,
        out_shape=jax.ShapeDtypeStruct((n * h0, w0 * N_CLASSES), F32),
        compiler_params=pltpu.CompilerParams(
            vmem_limit_bytes=32 * 1024 * 1024),
    )(x2d, *ops)

    out = out2d.reshape(n, h0, w0, N_CLASSES)
    return jnp.transpose(out, (0, 3, 1, 2))                   # NHWC -> NCHW


if __name__ == "__main__":
    key = jax.random.PRNGKey(0)
    pkey, xkey = jax.random.split(key)
    params = init_params(pkey)
    x = jax.random.normal(xkey, (N, C_IN, H0, W0), F32)       # NCHW like PyTorch

    out = jax.jit(dynamic_unet_forward)(params, x)
    out = jax.block_until_ready(out)

    assert out.shape == (N, N_CLASSES, H0, W0), out.shape
    assert bool(jnp.all(jnp.isfinite(out)))
    assert bool(jnp.all((out >= 0.0) & (out <= 1.0)))         # sigmoid range
    print("KERNEL_OK")
</pallas_src>

<mosaic_0001>
module attributes {stable_mosaic.version = 11 : i64} {
  func.func @_dynamic_unet_kernel(%arg0: memref<32x64xf32, #tpu.memory_space<vmem>>, %arg1: memref<3x64x128xf32, #tpu.memory_space<vmem>>, %arg2: memref<1x128xf32, #tpu.memory_space<vmem>>, %arg3: memref<3x128x128xf32, #tpu.memory_space<vmem>>, %arg4: memref<1x128xf32, #tpu.memory_space<vmem>>, %arg5: memref<3x128x128xf32, #tpu.memory_space<vmem>>, %arg6: memref<1x128xf32, #tpu.memory_space<vmem>>, %arg7: memref<3x128x128xf32, #tpu.memory_space<vmem>>, %arg8: memref<1x128xf32, #tpu.memory_space<vmem>>, %arg9: memref<3x128x256xf32, #tpu.memory_space<vmem>>, %arg10: memref<1x256xf32, #tpu.memory_space<vmem>>, %arg11: memref<1x64xf32, #tpu.memory_space<vmem>>, %arg12: memref<1x64xf32, #tpu.memory_space<vmem>>, %arg13: memref<3x256x128xf32, #tpu.memory_space<vmem>>, %arg14: memref<1x128xf32, #tpu.memory_space<vmem>>, %arg15: memref<1x32xf32, #tpu.memory_space<vmem>>, %arg16: memref<1x32xf32, #tpu.memory_space<vmem>>, %arg17: memref<2x128x128xf32, #tpu.memory_space<vmem>>, %arg18: memref<1x128xf32, #tpu.memory_space<vmem>>, %arg19: memref<3x128x128xf32, #tpu.memory_space<vmem>>, %arg20: memref<3x128x128xf32, #tpu.memory_space<vmem>>, %arg21: memref<1x128xf32, #tpu.memory_space<vmem>>, %arg22: memref<3x128x128xf32, #tpu.memory_space<vmem>>, %arg23: memref<1x128xf32, #tpu.memory_space<vmem>>, %arg24: memref<1x16xf32, #tpu.memory_space<vmem>>, %arg25: memref<1x16xf32, #tpu.memory_space<vmem>>, %arg26: memref<2x128x128xf32, #tpu.memory_space<vmem>>, %arg27: memref<1x128xf32, #tpu.memory_space<vmem>>, %arg28: memref<3x128x128xf32, #tpu.memory_space<vmem>>, %arg29: memref<3x128x128xf32, #tpu.memory_space<vmem>>, %arg30: memref<1x128xf32, #tpu.memory_space<vmem>>, %arg31: memref<3x128x128xf32, #tpu.memory_space<vmem>>, %arg32: memref<1x128xf32, #tpu.memory_space<vmem>>, %arg33: memref<1x8xf32, #tpu.memory_space<vmem>>, %arg34: memref<1x8xf32, #tpu.memory_space<vmem>>, %arg35: memref<1x128x48xf32, #tpu.memory_space<vmem>>, %arg36: memref<1x48xf32, #tpu.memory_space<vmem>>, %arg37: memref<32x48xf32, #tpu.memory_space<vmem>>) attributes {dimension_semantics = [], scalar_prefetch = 0 : i64, scratch_operands = 0 : i64, tpu.core_type = #tpu.core_type<tc>} {
    %c0 = arith.constant 0 : index
    %c0_0 = arith.constant 0 : index
    %0 = vector.load %arg0[%c0, %c0_0] : memref<32x64xf32, #tpu.memory_space<vmem>>, vector<16x64xf32>
    %c16 = arith.constant 16 : index
    %c0_1 = arith.constant 0 : index
    %1 = vector.load %arg0[%c16, %c0_1] : memref<32x64xf32, #tpu.memory_space<vmem>>, vector<16x64xf32>
    %2 = tpu.iota {dimensions = array<i32: 1>} : vector<16x16xi32>
    %3 = tpu.iota {dimensions = array<i32: 0>} : vector<16x16xi32>
    %c1_i32 = arith.constant 1 : i32
    %4 = vector.broadcast %c1_i32 : i32 to vector<16x16xi32>
    %5 = arith.muli %4, %3 : vector<16x16xi32>
    %c-1_i32 = arith.constant -1 : i32
    %6 = vector.broadcast %c-1_i32 : i32 to vector<16x16xi32>
    %7 = arith.addi %5, %6 : vector<16x16xi32>
    %8 = arith.cmpi eq, %2, %7 : vector<16x16xi32>
    %9 = arith.extui %8 : vector<16x16xi1> to vector<16x16xi32>
    %10 = arith.sitofp %9 : vector<16x16xi32> to vector<16x16xf32>
    %11 = tpu.iota {dimensions = array<i32: 1>} : vector<16x16xi32>
    %12 = tpu.iota {dimensions = array<i32: 0>} : vector<16x16xi32>
    %c1_i32_2 = arith.constant 1 : i32
    %13 = vector.broadcast %c1_i32_2 : i32 to vector<16x16xi32>
    %14 = arith.muli %13, %12 : vector<16x16xi32>
    %c0_i32 = arith.constant 0 : i32
    %15 = vector.broadcast %c0_i32 : i32 to vector<16x16xi32>
    %16 = arith.addi %14, %15 : vector<16x16xi32>
    %17 = arith.cmpi eq, %11, %16 : vector<16x16xi32>
    %18 = arith.extui %17 : vector<16x16xi1> to vector<16x16xi32>
    %19 = arith.sitofp %18 : vector<16x16xi32> to vector<16x16xf32>
    %20 = tpu.iota {dimensions = array<i32: 1>} : vector<16x16xi32>
    %21 = tpu.iota {dimensions = array<i32: 0>} : vector<16x16xi32>
    %c1_i32_3 = arith.constant 1 : i32
    %22 = vector.broadcast %c1_i32_3 : i32 to vector<16x16xi32>
    %23 = arith.muli %22, %21 : vector<16x16xi32>
    %c1_i32_4 = arith.constant 1 : i32
    %24 = vector.broadcast %c1_i32_4 : i32 to vector<16x16xi32>
    %25 = arith.addi %23, %24 : vector<16x16xi32>
    %26 = arith.cmpi eq, %20, %25 : vector<16x16xi32>
    %27 = arith.extui %26 : vector<16x16xi1> to vector<16x16xi32>
    %28 = arith.sitofp %27 : vector<16x16xi32> to vector<16x16xf32>
    %cst = arith.constant 0.000000e+00 : f32
    %29 = vector.broadcast %cst : f32 to vector<16x128xf32>
    %c0_5 = arith.constant 0 : index
    %c0_6 = arith.constant 0 : index
    %30 = vector.load %arg2[%c0_5, %c0_6] : memref<1x128xf32, #tpu.memory_space<vmem>>, vector<1x128xf32>
    %31 = vector.broadcast %30 : vector<1x128xf32> to vector<16x128xf32>
    %32 = arith.addf %29, %31 : vector<16x128xf32>
    %cst_7 = arith.constant dense<0.000000e+00> : vector<16x64xf32>
    %33 = tpu.matmul %10, %0, %cst_7 {dimension_numbers = #tpu.dot_dimension_numbers<[1], [0], [0], [1], [0, 0, 1, 1], [], []>} : vector<16x16xf32>, vector<16x64xf32>, vector<16x64xf32> -> vector<16x64xf32>
    %c0_8 = arith.constant 0 : index
    %c0_9 = arith.constant 0 : index
    %c0_10 = arith.constant 0 : index
    %34 = vector.load %arg1[%c0_8, %c0_9, %c0_10] : memref<3x64x128xf32, #tpu.memory_space<vmem>>, vector<1x64x128xf32>
    %35 = vector.shape_cast %34 : vector<1x64x128xf32> to vector<64x128xf32>
    %cst_11 = arith.constant dense<0.000000e+00> : vector<16x128xf32>
    %36 = tpu.matmul %33, %35, %cst_11 {dimension_numbers = #tpu.dot_dimension_numbers<[1], [0], [0], [1], [0, 0, 1, 1], [], []>} : vector<16x64xf32>, vector<64x128xf32>, vector<16x128xf32> -> vector<16x128xf32>
    %37 = arith.addf %32, %36 : vector<16x128xf32>
    %cst_12 = arith.constant dense<0.000000e+00> : vector<16x64xf32>
    %38 = tpu.matmul %19, %0, %cst_12 {dimension_numbers = #tpu.dot_dimension_numbers<[1], [0], [0], [1], [0, 0, 1, 1], [], []>} : vector<16x16xf32>, vector<16x64xf32>, vector<16x64xf32> -> vector<16x64xf32>
    %c1 = arith.constant 1 : index
    %c0_13 = arith.constant 0 : index
    %c0_14 = arith.constant 0 : index
    %39 = vector.load %arg1[%c1, %c0_13, %c0_14] : memref<3x64x128xf32, #tpu.memory_space<vmem>>, vector<1x64x128xf32>
    %40 = vector.shape_cast %39 : vector<1x64x128xf32> to vector<64x128xf32>
    %cst_15 = arith.constant dense<0.000000e+00> : vector<16x128xf32>
    %41 = tpu.matmul %38, %40, %cst_15 {dimension_numbers = #tpu.dot_dimension_numbers<[1], [0], [0], [1], [0, 0, 1, 1], [], []>} : vector<16x64xf32>, vector<64x128xf32>, vector<16x128xf32> -> vector<16x128xf32>
    %42 = arith.addf %37, %41 : vector<16x128xf32>
    %cst_16 = arith.constant dense<0.000000e+00> : vector<16x64xf32>
    %43 = tpu.matmul %28, %0, %cst_16 {dimension_numbers = #tpu.dot_dimension_numbers<[1], [0], [0], [1], [0, 0, 1, 1], [], []>} : vector<16x16xf32>, vector<16x64xf32>, vector<16x64xf32> -> vector<16x64xf32>
    %c2 = arith.constant 2 : index
    %c0_17 = arith.constant 0 : index
    %c0_18 = arith.constant 0 : index
    %44 = vector.load %arg1[%c2, %c0_17, %c0_18] : memref<3x64x128xf32, #tpu.memory_space<vmem>>, vector<1x64x128xf32>
    %45 = vector.shape_cast %44 : vector<1x64x128xf32> to vector<64x128xf32>
    %cst_19 = arith.constant dense<0.000000e+00> : vector<16x128xf32>
    %46 = tpu.matmul %43, %45, %cst_19 {dimension_numbers = #tpu.dot_dimension_numbers<[1], [0], [0], [1], [0, 0, 1, 1], [], []>} : vector<16x64xf32>, vector<64x128xf32>, vector<16x128xf32> -> vector<16x128xf32>
    %47 = arith.addf %42, %46 : vector<16x128xf32>
    %cst_20 = arith.constant 0.000000e+00 : f32
    %48 = vector.broadcast %cst_20 : f32 to vector<16x128xf32>
    %c0_21 = arith.constant 0 : index
    %c0_22 = arith.constant 0 : index
    %49 = vector.load %arg2[%c0_21, %c0_22] : memref<1x128xf32, #tpu.memory_space<vmem>>, vector<1x128xf32>
    %50 = vector.broadcast %49 : vector<1x128xf32> to vector<16x128xf32>
    %51 = arith.addf %48, %50 : vector<16x128xf32>
    %cst_23 = arith.constant dense<0.000000e+00> : vector<16x64xf32>
    %52 = tpu.matmul %10, %1, %cst_23 {dimension_numbers = #tpu.dot_dimension_numbers<[1], [0], [0], [1], [0, 0, 1, 1], [], []>} : vector<16x16xf32>, vector<16x64xf32>, vector<16x64xf32> -> vector<16x64xf32>
    %c0_24 = arith.constant 0 : index
    %c0_25 = arith.constant 0 : index
    %c0_26 = arith.constant 0 : index
    %53 = vector.load %arg1[%c0_24, %c0_25, %c0_26] : memref<3x64x128xf32, #tpu.memory_space<vmem>>, vector<1x64x128xf32>
    %54 = vector.shape_cast %53 : vector<1x64x128xf32> to vector<64x128xf32>
    %cst_27 = arith.constant dense<0.000000e+00> : vector<16x128xf32>
    %55 = tpu.matmul %52, %54, %cst_27 {dimension_numbers = #tpu.dot_dimension_numbers<[1], [0], [0], [1], [0, 0, 1, 1], [], []>} : vector<16x64xf32>, vector<64x128xf32>, vector<16x128xf32> -> vector<16x128xf32>
    %56 = arith.addf %51, %55 : vector<16x128xf32>
    %cst_28 = arith.constant dense<0.000000e+00> : vector<16x64xf32>
    %57 = tpu.matmul %19, %1, %cst_28 {dimension_numbers = #tpu.dot_dimension_numbers<[1], [0], [0], [1], [0, 0, 1, 1], [], []>} : vector<16x16xf32>, vector<16x64xf32>, vector<16x64xf32> -> vector<16x64xf32>
    %c1_29 = arith.constant 1 : index
    %c0_30 = arith.constant 0 : index
    %c0_31 = arith.constant 0 : index
    %58 = vector.load %arg1[%c1_29, %c0_30, %c0_31] : memref<3x64x128xf32, #tpu.memory_space<vmem>>, vector<1x64x128xf32>
    %59 = vector.shape_cast %58 : vector<1x64x128xf32> to vector<64x128xf32>
    %cst_32 = arith.constant dense<0.000000e+00> : vector<16x128xf32>
    %60 = tpu.matmul %57, %59, %cst_32 {dimension_numbers = #tpu.dot_dimension_numbers<[1], [0], [0], [1], [0, 0, 1, 1], [], []>} : vector<16x64xf32>, vector<64x128xf32>, vector<16x128xf32> -> vector<16x128xf32>
    %61 = arith.addf %56, %60 : vector<16x128xf32>
    %cst_33 = arith.constant dense<0.000000e+00> : vector<16x64xf32>
    %62 = tpu.matmul %28, %1, %cst_33 {dimension_numbers = #tpu.dot_dimension_numbers<[1], [0], [0], [1], [0, 0, 1, 1], [], []>} : vector<16x16xf32>, vector<16x64xf32>, vector<16x64xf32> -> vector<16x64xf32>
    %c2_34 = arith.constant 2 : index
    %c0_35 = arith.constant 0 : index
    %c0_36 = arith.constant 0 : index
    %63 = vector.load %arg1[%c2_34, %c0_35, %c0_36] : memref<3x64x128xf32, #tpu.memory_space<vmem>>, vector<1x64x128xf32>
    %64 = vector.shape_cast %63 : vector<1x64x128xf32> to vector<64x128xf32>
    %cst_37 = arith.constant dense<0.000000e+00> : vector<16x128xf32>
    %65 = tpu.matmul %62, %64, %cst_37 {dimension_numbers = #tpu.dot_dimension_numbers<[1], [0], [0], [1], [0, 0, 1, 1], [], []>} : vector<16x64xf32>, vector<64x128xf32>, vector<16x128xf32> -> vector<16x128xf32>
    %66 = arith.addf %61, %65 : vector<16x128xf32>
    %67 = tpu.iota {dimensions = array<i32: 1>} : vector<16x16xi32>
    %68 = tpu.iota {dimensions = array<i32: 0>} : vector<16x16xi32>
    %c1_i32_38 = arith.constant 1 : i32
    %69 = vector.broadcast %c1_i32_38 : i32 to vector<16x16xi32>
    %70 = arith.muli %69, %68 : vector<16x16xi32>
    %c-1_i32_39 = arith.constant -1 : i32
    %71 = vector.broadcast %c-1_i32_39 : i32 to vector<16x16xi32>
    %72 = arith.addi %70, %71 : vector<16x16xi32>
    %73 = arith.cmpi eq, %67, %72 : vector<16x16xi32>
    %74 = arith.extui %73 : vector<16x16xi1> to vector<16x16xi32>
    %75 = arith.sitofp %74 : vector<16x16xi32> to vector<16x16xf32>
    %76 = tpu.iota {dimensions = array<i32: 1>} : vector<16x16xi32>
    %77 = tpu.iota {dimensions = array<i32: 0>} : vector<16x16xi32>
    %c1_i32_40 = arith.constant 1 : i32
    %78 = vector.broadcast %c1_i32_40 : i32 to vector<16x16xi32>
    %79 = arith.muli %78, %77 : vector<16x16xi32>
    %c0_i32_41 = arith.constant 0 : i32
    %80 = vector.broadcast %c0_i32_41 : i32 to vector<16x16xi32>
    %81 = arith.addi %79, %80 : vector<16x16xi32>
    %82 = arith.cmpi eq, %76, %81 : vector<16x16xi32>
    %83 = arith.extui %82 : vector<16x16xi1> to vector<16x16xi32>
    %84 = arith.sitofp %83 : vector<16x16xi32> to vector<16x16xf32>
    %85 = tpu.iota {dimensions = array<i32: 1>} : vector<16x16xi32>
    %86 = tpu.iota {dimensions = array<i32: 0>} : vector<16x16xi32>
    %c1_i32_42 = arith.constant 1 : i32
    %87 = vector.broadcast %c1_i32_42 : i32 to vector<16x16xi32>
    %88 = arith.muli %87, %86 : vector<16x16xi32>
    %c1_i32_43 = arith.constant 1 : i32
    %89 = vector.broadcast %c1_i32_43 : i32 to vector<16x16xi32>
    %90 = arith.addi %88, %89 : vector<16x16xi32>
    %91 = arith.cmpi eq, %85, %90 : vector<16x16xi32>
    %92 = arith.extui %91 : vector<16x16xi1> to vector<16x16xi32>
    %93 = arith.sitofp %92 : vector<16x16xi32> to vector<16x16xf32>
    %cst_44 = arith.constant 0.000000e+00 : f32
    %94 = vector.broadcast %cst_44 : f32 to vector<16x128xf32>
    %c0_45 = arith.constant 0 : index
    %c0_46 = arith.constant 0 : index
    %95 = vector.load %arg4[%c0_45, %c0_46] : memref<1x128xf32, #tpu.memory_space<vmem>>, vector<1x128xf32>
    %96 = vector.broadcast %95 : vector<1x128xf32> to vector<16x128xf32>
    %97 = arith.addf %94, %96 : vector<16x128xf32>
    %cst_47 = arith.constant dense<0.000000e+00> : vector<16x128xf32>
    %98 = tpu.matmul %75, %47, %cst_47 {dimension_numbers = #tpu.dot_dimension_numbers<[1], [0], [0], [1], [0, 0, 1, 1], [], []>} : vector<16x16xf32>, vector<16x128xf32>, vector<16x128xf32> -> vector<16x128xf32>
    %c0_48 = arith.constant 0 : index
    %c0_49 = arith.constant 0 : index
    %c0_50 = arith.constant 0 : index
    %99 = vector.load %arg3[%c0_48, %c0_49, %c0_50] : memref<3x128x128xf32, #tpu.memory_space<vmem>>, vector<1x128x128xf32>
    %100 = vector.shape_cast %99 : vector<1x128x128xf32> to vector<128x128xf32>
    %cst_51 = arith.constant dense<0.000000e+00> : vector<16x128xf32>
    %101 = tpu.matmul %98, %100, %cst_51 {dimension_numbers = #tpu.dot_dimension_numbers<[1], [0], [0], [1], [0, 0, 1, 1], [], []>} : vector<16x128xf32>, vector<128x128xf32>, vector<16x128xf32> -> vector<16x128xf32>
    %102 = arith.addf %97, %101 : vector<16x128xf32>
    %cst_52 = arith.constant dense<0.000000e+00> : vector<16x128xf32>
    %103 = tpu.matmul %84, %47, %cst_52 {dimension_numbers = #tpu.dot_dimension_numbers<[1], [0], [0], [1], [0, 0, 1, 1], [], []>} : vector<16x16xf32>, vector<16x128xf32>, vector<16x128xf32> -> vector<16x128xf32>
    %c1_53 = arith.constant 1 : index
    %c0_54 = arith.constant 0 : index
    %c0_55 = arith.constant 0 : index
    %104 = vector.load %arg3[%c1_53, %c0_54, %c0_55] : memref<3x128x128xf32, #tpu.memory_space<vmem>>, vector<1x128x128xf32>
    %105 = vector.shape_cast %104 : vector<1x128x128xf32> to vector<128x128xf32>
    %cst_56 = arith.constant dense<0.000000e+00> : vector<16x128xf32>
    %106 = tpu.matmul %103, %105, %cst_56 {dimension_numbers = #tpu.dot_dimension_numbers<[1], [0], [0], [1], [0, 0, 1, 1], [], []>} : vector<16x128xf32>, vector<128x128xf32>, vector<16x128xf32> -> vector<16x128xf32>
    %107 = arith.addf %102, %106 : vector<16x128xf32>
    %cst_57 = arith.constant dense<0.000000e+00> : vector<16x128xf32>
    %108 = tpu.matmul %93, %47, %cst_57 {dimension_numbers = #tpu.dot_dimension_numbers<[1], [0], [0], [1], [0, 0, 1, 1], [], []>} : vector<16x16xf32>, vector<16x128xf32>, vector<16x128xf32> -> vector<16x128xf32>
    %c2_58 = arith.constant 2 : index
    %c0_59 = arith.constant 0 : index
    %c0_60 = arith.constant 0 : index
    %109 = vector.load %arg3[%c2_58, %c0_59, %c0_60] : memref<3x128x128xf32, #tpu.memory_space<vmem>>, vector<1x128x128xf32>
    %110 = vector.shape_cast %109 : vector<1x128x128xf32> to vector<128x128xf32>
    %cst_61 = arith.constant dense<0.000000e+00> : vector<16x128xf32>
    %111 = tpu.matmul %108, %110, %cst_61 {dimension_numbers = #tpu.dot_dimension_numbers<[1], [0], [0], [1], [0, 0, 1, 1], [], []>} : vector<16x128xf32>, vector<128x128xf32>, vector<16x128xf32> -> vector<16x128xf32>
    %112 = arith.addf %107, %111 : vector<16x128xf32>
    %cst_62 = arith.constant 0.000000e+00 : f32
    %113 = vector.broadcast %cst_62 : f32 to vector<16x128xf32>
    %c0_63 = arith.constant 0 : index
    %c0_64 = arith.constant 0 : index
    %114 = vector.load %arg4[%c0_63, %c0_64] : memref<1x128xf32, #tpu.memory_space<vmem>>, vector<1x128xf32>
    %115 = vector.broadcast %114 : vector<1x128xf32> to vector<16x128xf32>
    %116 = arith.addf %113, %115 : vector<16x128xf32>
    %cst_65 = arith.constant dense<0.000000e+00> : vector<16x128xf32>
    %117 = tpu.matmul %75, %66, %cst_65 {dimension_numbers = #tpu.dot_dimension_numbers<[1], [0], [0], [1], [0, 0, 1, 1], [], []>} : vector<16x16xf32>, vector<16x128xf32>, vector<16x128xf32> -> vector<16x128xf32>
    %c0_66 = arith.constant 0 : index
    %c0_67 = arith.constant 0 : index
    %c0_68 = arith.constant 0 : index
    %118 = vector.load %arg3[%c0_66, %c0_67, %c0_68] : memref<3x128x128xf32, #tpu.memory_space<vmem>>, vector<1x128x128xf32>
    %119 = vector.shape_cast %118 : vector<1x128x128xf32> to vector<128x128xf32>
    %cst_69 = arith.constant dense<0.000000e+00> : vector<16x128xf32>
    %120 = tpu.matmul %117, %119, %cst_69 {dimension_numbers = #tpu.dot_dimension_numbers<[1], [0], [0], [1], [0, 0, 1, 1], [], []>} : vector<16x128xf32>, vector<128x128xf32>, vector<16x128xf32> -> vector<16x128xf32>
    %121 = arith.addf %116, %120 : vector<16x128xf32>
    %cst_70 = arith.constant dense<0.000000e+00> : vector<16x128xf32>
    %122 = tpu.matmul %84, %66, %cst_70 {dimension_numbers = #tpu.dot_dimension_numbers<[1], [0], [0], [1], [0, 0, 1, 1], [], []>} : vector<16x16xf32>, vector<16x128xf32>, vector<16x128xf32> -> vector<16x128xf32>
    %c1_71 = arith.constant 1 : index
    %c0_72 = arith.constant 0 : index
    %c0_73 = arith.constant 0 : index
    %123 = vector.load %arg3[%c1_71, %c0_72, %c0_73] : memref<3x128x128xf32, #tpu.memory_space<vmem>>, vector<1x128x128xf32>
    %124 = vector.shape_cast %123 : vector<1x128x128xf32> to vector<128x128xf32>
    %cst_74 = arith.constant dense<0.000000e+00> : vector<16x128xf32>
    %125 = tpu.matmul %122, %124, %cst_74 {dimension_numbers = #tpu.dot_dimension_numbers<[1], [0], [0], [1], [0, 0, 1, 1], [], []>} : vector<16x128xf32>, vector<128x128xf32>, vector<16x128xf32> -> vector<16x128xf32>
    %126 = arith.addf %121, %125 : vector<16x128xf32>
    %cst_75 = arith.constant dense<0.000000e+00> : vector<16x128xf32>
    %127 = tpu.matmul %93, %66, %cst_75 {dimension_numbers = #tpu.dot_dimension_numbers<[1], [0], [0], [1], [0, 0, 1, 1], [], []>} : vector<16x16xf32>, vector<16x128xf32>, vector<16x128xf32> -> vector<16x128xf32>
    %c2_76 = arith.constant 2 : index
    %c0_77 = arith.constant 0 : index
    %c0_78 = arith.constant 0 : index
    %128 = vector.load %arg3[%c2_76, %c0_77, %c0_78] : memref<3x128x128xf32, #tpu.memory_space<vmem>>, vector<1x128x128xf32>
    %129 = vector.shape_cast %128 : vector<1x128x128xf32> to vector<128x128xf32>
    %cst_79 = arith.constant dense<0.000000e+00> : vector<16x128xf32>
    %130 = tpu.matmul %127, %129, %cst_79 {dimension_numbers = #tpu.dot_dimension_numbers<[1], [0], [0], [1], [0, 0, 1, 1], [], []>} : vector<16x128xf32>, vector<128x128xf32>, vector<16x128xf32> -> vector<16x128xf32>
    %131 = arith.addf %126, %130 : vector<16x128xf32>
    %132 = tpu.iota {dimensions = array<i32: 1>} : vector<8x16xi32>
    %133 = tpu.iota {dimensions = array<i32: 0>} : vector<8x16xi32>
    %c2_i32 = arith.constant 2 : i32
    %134 = vector.broadcast %c2_i32 : i32 to vector<8x16xi32>
    %135 = arith.muli %134, %133 : vector<8x16xi32>
    %c-1_i32_80 = arith.constant -1 : i32
    %136 = vector.broadcast %c-1_i32_80 : i32 to vector<8x16xi32>
    %137 = arith.addi %135, %136 : vector<8x16xi32>
    %138 = arith.cmpi eq, %132, %137 : vector<8x16xi32>
    %139 = arith.extui %138 : vector<8x16xi1> to vector<8x16xi32>
    %140 = arith.sitofp %139 : vector<8x16xi32> to vector<8x16xf32>
    %141 = tpu.iota {dimensions = array<i32: 1>} : vector<8x16xi32>
    %142 = tpu.iota {dimensions = array<i32: 0>} : vector<8x16xi32>
    %c2_i32_81 = arith.constant 2 : i32
    %143 = vector.broadcast %c2_i32_81 : i32 to vector<8x16xi32>
    %144 = arith.muli %143, %142 : vector<8x16xi32>
    %c0_i32_82 = arith.constant 0 : i32
    %145 = vector.broadcast %c0_i32_82 : i32 to vector<8x16xi32>
    %146 = arith.addi %144, %145 : vector<8x16xi32>
    %147 = arith.cmpi eq, %141, %146 : vector<8x16xi32>
    %148 = arith.extui %147 : vector<8x16xi1> to vector<8x16xi32>
    %149 = arith.sitofp %148 : vector<8x16xi32> to vector<8x16xf32>
    %150 = tpu.iota {dimensions = array<i32: 1>} : vector<8x16xi32>
    %151 = tpu.iota {dimensions = array<i32: 0>} : vector<8x16xi32>
    %c2_i32_83 = arith.constant 2 : i32
    %152 = vector.broadcast %c2_i32_83 : i32 to vector<8x16xi32>
    %153 = arith.muli %152, %151 : vector<8x16xi32>
    %c1_i32_84 = arith.constant 1 : i32
    %154 = vector.broadcast %c1_i32_84 : i32 to vector<8x16xi32>
    %155 = arith.addi %153, %154 : vector<8x16xi32>
    %156 = arith.cmpi eq, %150, %155 : vector<8x16xi32>
    %157 = arith.extui %156 : vector<8x16xi1> to vector<8x16xi32>
    %158 = arith.sitofp %157 : vector<8x16xi32> to vector<8x16xf32>
    %cst_85 = arith.constant 0.000000e+00 : f32
    %159 = vector.broadcast %cst_85 : f32 to vector<8x128xf32>
    %c0_86 = arith.constant 0 : index
    %c0_87 = arith.constant 0 : index
    %160 = vector.load %arg6[%c0_86, %c0_87] : memref<1x128xf32, #tpu.memory_space<vmem>>, vector<1x128xf32>
    %161 = vector.broadcast %160 : vector<1x128xf32> to vector<8x128xf32>
    %162 = arith.addf %159, %161 : vector<8x128xf32>
    %cst_88 = arith.constant dense<0.000000e+00> : vector<8x128xf32>
    %163 = tpu.matmul %140, %112, %cst_88 {dimension_numbers = #tpu.dot_dimension_numbers<[1], [0], [0], [1], [0, 0, 1, 1], [], []>} : vector<8x16xf32>, vector<16x128xf32>, vector<8x128xf32> -> vector<8x128xf32>
    %c0_89 = arith.constant 0 : index
    %c0_90 = arith.constant 0 : index
    %c0_91 = arith.constant 0 : index
    %164 = vector.load %arg5[%c0_89, %c0_90, %c0_91] : memref<3x128x128xf32, #tpu.memory_space<vmem>>, vector<1x128x128xf32>
    %165 = vector.shape_cast %164 : vector<1x128x128xf32> to vector<128x128xf32>
    %cst_92 = arith.constant dense<0.000000e+00> : vector<8x128xf32>
    %166 = tpu.matmul %163, %165, %cst_92 {dimension_numbers = #tpu.dot_dimension_numbers<[1], [0], [0], [1], [0, 0, 1, 1], [], []>} : vector<8x128xf32>, vector<128x128xf32>, vector<8x128xf32> -> vector<8x128xf32>
    %167 = arith.addf %162, %166 : vector<8x128xf32>
    %cst_93 = arith.constant dense<0.000000e+00> : vector<8x128xf32>
    %168 = tpu.matmul %149, %112, %cst_93 {dimension_numbers = #tpu.dot_dimension_numbers<[1], [0], [0], [1], [0, 0, 1, 1], [], []>} : vector<8x16xf32>, vector<16x128xf32>, vector<8x128xf32> -> vector<8x128xf32>
    %c1_94 = arith.constant 1 : index
    %c0_95 = arith.constant 0 : index
    %c0_96 = arith.constant 0 : index
    %169 = vector.load %arg5[%c1_94, %c0_95, %c0_96] : memref<3x128x128xf32, #tpu.memory_space<vmem>>, vector<1x128x128xf32>
    %170 = vector.shape_cast %169 : vector<1x128x128xf32> to vector<128x128xf32>
    %cst_97 = arith.constant dense<0.000000e+00> : vector<8x128xf32>
    %171 = tpu.matmul %168, %170, %cst_97 {dimension_numbers = #tpu.dot_dimension_numbers<[1], [0], [0], [1], [0, 0, 1, 1], [], []>} : vector<8x128xf32>, vector<128x128xf32>, vector<8x128xf32> -> vector<8x128xf32>
    %172 = arith.addf %167, %171 : vector<8x128xf32>
    %cst_98 = arith.constant dense<0.000000e+00> : vector<8x128xf32>
    %173 = tpu.matmul %158, %112, %cst_98 {dimension_numbers = #tpu.dot_dimension_numbers<[1], [0], [0], [1], [0, 0, 1, 1], [], []>} : vector<8x16xf32>, vector<16x128xf32>, vector<8x128xf32> -> vector<8x128xf32>
    %c2_99 = arith.constant 2 : index
    %c0_100 = arith.constant 0 : index
    %c0_101 = arith.constant 0 : index
    %174 = vector.load %arg5[%c2_99, %c0_100, %c0_101] : memref<3x128x128xf32, #tpu.memory_space<vmem>>, vector<1x128x128xf32>
    %175 = vector.shape_cast %174 : vector<1x128x128xf32> to vector<128x128xf32>
    %cst_102 = arith.constant dense<0.000000e+00> : vector<8x128xf32>
    %176 = tpu.matmul %173, %175, %cst_102 {dimension_numbers = #tpu.dot_dimension_numbers<[1], [0], [0], [1], [0, 0, 1, 1], [], []>} : vector<8x128xf32>, vector<128x128xf32>, vector<8x128xf32> -> vector<8x128xf32>
    %177 = arith.addf %172, %176 : vector<8x128xf32>
    %cst_103 = arith.constant 0.000000e+00 : f32
    %178 = vector.broadcast %cst_103 : f32 to vector<8x128xf32>
    %c0_104 = arith.constant 0 : index
    %c0_105 = arith.constant 0 : index
    %179 = vector.load %arg6[%c0_104, %c0_105] : memref<1x128xf32, #tpu.memory_space<vmem>>, vector<1x128xf32>
    %180 = vector.broadcast %179 : vector<1x128xf32> to vector<8x128xf32>
    %181 = arith.addf %178, %180 : vector<8x128xf32>
    %cst_106 = arith.constant dense<0.000000e+00> : vector<8x128xf32>
    %182 = tpu.matmul %140, %131, %cst_106 {dimension_numbers = #tpu.dot_dimension_numbers<[1], [0], [0], [1], [0, 0, 1, 1], [], []>} : vector<8x16xf32>, vector<16x128xf32>, vector<8x128xf32> -> vector<8x128xf32>
    %c0_107 = arith.constant 0 : index
    %c0_108 = arith.constant 0 : index
    %c0_109 = arith.constant 0 : index
    %183 = vector.load %arg5[%c0_107, %c0_108, %c0_109] : memref<3x128x128xf32, #tpu.memory_space<vmem>>, vector<1x128x128xf32>
    %184 = vector.shape_cast %183 : vector<1x128x128xf32> to vector<128x128xf32>
    %cst_110 = arith.constant dense<0.000000e+00> : vector<8x128xf32>
    %185 = tpu.matmul %182, %184, %cst_110 {dimension_numbers = #tpu.dot_dimension_numbers<[1], [0], [0], [1], [0, 0, 1, 1], [], []>} : vector<8x128xf32>, vector<128x128xf32>, vector<8x128xf32> -> vector<8x128xf32>
    %186 = arith.addf %181, %185 : vector<8x128xf32>
    %cst_111 = arith.constant dense<0.000000e+00> : vector<8x128xf32>
    %187 = tpu.matmul %149, %131, %cst_111 {dimension_numbers = #tpu.dot_dimension_numbers<[1], [0], [0], [1], [0, 0, 1, 1], [], []>} : vector<8x16xf32>, vector<16x128xf32>, vector<8x128xf32> -> vector<8x128xf32>
    %c1_112 = arith.constant 1 : index
    %c0_113 = arith.constant 0 : index
    %c0_114 = arith.constant 0 : index
    %188 = vector.load %arg5[%c1_112, %c0_113, %c0_114] : memref<3x128x128xf32, #tpu.memory_space<vmem>>, vector<1x128x128xf32>
    %189 = vector.shape_cast %188 : vector<1x128x128xf32> to vector<128x128xf32>
    %cst_115 = arith.constant dense<0.000000e+00> : vector<8x128xf32>
    %190 = tpu.matmul %187, %189, %cst_115 {dimension_numbers = #tpu.dot_dimension_numbers<[1], [0], [0], [1], [0, 0, 1, 1], [], []>} : vector<8x128xf32>, vector<128x128xf32>, vector<8x128xf32> -> vector<8x128xf32>
    %191 = arith.addf %186, %190 : vector<8x128xf32>
    %cst_116 = arith.constant dense<0.000000e+00> : vector<8x128xf32>
    %192 = tpu.matmul %158, %131, %cst_116 {dimension_numbers = #tpu.dot_dimension_numbers<[1], [0], [0], [1], [0, 0, 1, 1], [], []>} : vector<8x16xf32>, vector<16x128xf32>, vector<8x128xf32> -> vector<8x128xf32>
    %c2_117 = arith.constant 2 : index
    %c0_118 = arith.constant 0 : index
    %c0_119 = arith.constant 0 : index
    %193 = vector.load %arg5[%c2_117, %c0_118, %c0_119] : memref<3x128x128xf32, #tpu.memory_space<vmem>>, vector<1x128x128xf32>
    %194 = vector.shape_cast %193 : vector<1x128x128xf32> to vector<128x128xf32>
    %cst_120 = arith.constant dense<0.000000e+00> : vector<8x128xf32>
    %195 = tpu.matmul %192, %194, %cst_120 {dimension_numbers = #tpu.dot_dimension_numbers<[1], [0], [0], [1], [0, 0, 1, 1], [], []>} : vector<8x128xf32>, vector<128x128xf32>, vector<8x128xf32> -> vector<8x128xf32>
    %196 = arith.addf %191, %195 : vector<8x128xf32>
    %197 = tpu.iota {dimensions = array<i32: 1>} : vector<4x8xi32>
    %198 = tpu.iota {dimensions = array<i32: 0>} : vector<4x8xi32>
    %c2_i32_121 = arith.constant 2 : i32
    %199 = vector.broadcast %c2_i32_121 : i32 to vector<4x8xi32>
    %200 = arith.muli %199, %198 : vector<4x8xi32>
    %c-1_i32_122 = arith.constant -1 : i32
    %201 = vector.broadcast %c-1_i32_122 : i32 to vector<4x8xi32>
    %202 = arith.addi %200, %201 : vector<4x8xi32>
    %203 = arith.cmpi eq, %197, %202 : vector<4x8xi32>
    %204 = arith.extui %203 : vector<4x8xi1> to vector<4x8xi32>
    %205 = arith.sitofp %204 : vector<4x8xi32> to vector<4x8xf32>
    %206 = tpu.iota {dimensions = array<i32: 1>} : vector<4x8xi32>
    %207 = tpu.iota {dimensions = array<i32: 0>} : vector<4x8xi32>
    %c2_i32_123 = arith.constant 2 : i32
    %208 = vector.broadcast %c2_i32_123 : i32 to vector<4x8xi32>
    %209 = arith.muli %208, %207 : vector<4x8xi32>
    %c0_i32_124 = arith.constant 0 : i32
    %210 = vector.broadcast %c0_i32_124 : i32 to vector<4x8xi32>
    %211 = arith.addi %209, %210 : vector<4x8xi32>
    %212 = arith.cmpi eq, %206, %211 : vector<4x8xi32>
    %213 = arith.extui %212 : vector<4x8xi1> to vector<4x8xi32>
    %214 = arith.sitofp %213 : vector<4x8xi32> to vector<4x8xf32>
    %215 = tpu.iota {dimensions = array<i32: 1>} : vector<4x8xi32>
    %216 = tpu.iota {dimensions = array<i32: 0>} : vector<4x8xi32>
    %c2_i32_125 = arith.constant 2 : i32
    %217 = vector.broadcast %c2_i32_125 : i32 to vector<4x8xi32>
    %218 = arith.muli %217, %216 : vector<4x8xi32>
    %c1_i32_126 = arith.constant 1 : i32
    %219 = vector.broadcast %c1_i32_126 : i32 to vector<4x8xi32>
    %220 = arith.addi %218, %219 : vector<4x8xi32>
    %221 = arith.cmpi eq, %215, %220 : vector<4x8xi32>
    %222 = arith.extui %221 : vector<4x8xi1> to vector<4x8xi32>
    %223 = arith.sitofp %222 : vector<4x8xi32> to vector<4x8xf32>
    %cst_127 = arith.constant 0.000000e+00 : f32
    %224 = vector.broadcast %cst_127 : f32 to vector<4x128xf32>
    %c0_128 = arith.constant 0 : index
    %c0_129 = arith.constant 0 : index
    %225 = vector.load %arg8[%c0_128, %c0_129] : memref<1x128xf32, #tpu.memory_space<vmem>>, vector<1x128xf32>
    %226 = vector.broadcast %225 : vector<1x128xf32> to vector<4x128xf32>
    %227 = arith.addf %224, %226 : vector<4x128xf32>
    %cst_130 = arith.constant dense<0.000000e+00> : vector<4x128xf32>
    %228 = tpu.matmul %205, %177, %cst_130 {dimension_numbers = #tpu.dot_dimension_numbers<[1], [0], [0], [1], [0, 0, 1, 1], [], []>} : vector<4x8xf32>, vector<8x128xf32>, vector<4x128xf32> -> vector<4x128xf32>
    %c0_131 = arith.constant 0 : index
    %c0_132 = arith.constant 0 : index
    %c0_133 = arith.constant 0 : index
    %229 = vector.load %arg7[%c0_131, %c0_132, %c0_133] : memref<3x128x128xf32, #tpu.memory_space<vmem>>, vector<1x128x128xf32>
    %230 = vector.shape_cast %229 : vector<1x128x128xf32> to vector<128x128xf32>
    %cst_134 = arith.constant dense<0.000000e+00> : vector<4x128xf32>
    %231 = tpu.matmul %228, %230, %cst_134 {dimension_numbers = #tpu.dot_dimension_numbers<[1], [0], [0], [1], [0, 0, 1, 1], [], []>} : vector<4x128xf32>, vector<128x128xf32>, vector<4x128xf32> -> vector<4x128xf32>
    %232 = arith.addf %227, %231 : vector<4x128xf32>
    %cst_135 = arith.constant dense<0.000000e+00> : vector<4x128xf32>
    %233 = tpu.matmul %214, %177, %cst_135 {dimension_numbers = #tpu.dot_dimension_numbers<[1], [0], [0], [1], [0, 0, 1, 1], [], []>} : vector<4x8xf32>, vector<8x128xf32>, vector<4x128xf32> -> vector<4x128xf32>
    %c1_136 = arith.constant 1 : index
    %c0_137 = arith.constant 0 : index
    %c0_138 = arith.constant 0 : index
    %234 = vector.load %arg7[%c1_136, %c0_137, %c0_138] : memref<3x128x128xf32, #tpu.memory_space<vmem>>, vector<1x128x128xf32>
    %235 = vector.shape_cast %234 : vector<1x128x128xf32> to vector<128x128xf32>
    %cst_139 = arith.constant dense<0.000000e+00> : vector<4x128xf32>
    %236 = tpu.matmul %233, %235, %cst_139 {dimension_numbers = #tpu.dot_dimension_numbers<[1], [0], [0], [1], [0, 0, 1, 1], [], []>} : vector<4x128xf32>, vector<128x128xf32>, vector<4x128xf32> -> vector<4x128xf32>
    %237 = arith.addf %232, %236 : vector<4x128xf32>
    %cst_140 = arith.constant dense<0.000000e+00> : vector<4x128xf32>
    %238 = tpu.matmul %223, %177, %cst_140 {dimension_numbers = #tpu.dot_dimension_numbers<[1], [0], [0], [1], [0, 0, 1, 1], [], []>} : vector<4x8xf32>, vector<8x128xf32>, vector<4x128xf32> -> vector<4x128xf32>
    %c2_141 = arith.constant 2 : index
    %c0_142 = arith.constant 0 : index
    %c0_143 = arith.constant 0 : index
    %239 = vector.load %arg7[%c2_141, %c0_142, %c0_143] : memref<3x128x128xf32, #tpu.memory_space<vmem>>, vector<1x128x128xf32>
    %240 = vector.shape_cast %239 : vector<1x128x128xf32> to vector<128x128xf32>
    %cst_144 = arith.constant dense<0.000000e+00> : vector<4x128xf32>
    %241 = tpu.matmul %238, %240, %cst_144 {dimension_numbers = #tpu.dot_dimension_numbers<[1], [0], [0], [1], [0, 0, 1, 1], [], []>} : vector<4x128xf32>, vector<128x128xf32>, vector<4x128xf32> -> vector<4x128xf32>
    %242 = arith.addf %237, %241 : vector<4x128xf32>
    %cst_145 = arith.constant 0.000000e+00 : f32
    %243 = vector.broadcast %cst_145 : f32 to vector<4x128xf32>
    %244 = arith.maximumf %242, %243 : vector<4x128xf32>
    %cst_146 = arith.constant 0.000000e+00 : f32
    %245 = vector.broadcast %cst_146 : f32 to vector<4x128xf32>
    %c0_147 = arith.constant 0 : index
    %c0_148 = arith.constant 0 : index
    %246 = vector.load %arg8[%c0_147, %c0_148] : memref<1x128xf32, #tpu.memory_space<vmem>>, vector<1x128xf32>
    %247 = vector.broadcast %246 : vector<1x128xf32> to vector<4x128xf32>
    %248 = arith.addf %245, %247 : vector<4x128xf32>
    %cst_149 = arith.constant dense<0.000000e+00> : vector<4x128xf32>
    %249 = tpu.matmul %205, %196, %cst_149 {dimension_numbers = #tpu.dot_dimension_numbers<[1], [0], [0], [1], [0, 0, 1, 1], [], []>} : vector<4x8xf32>, vector<8x128xf32>, vector<4x128xf32> -> vector<4x128xf32>
    %c0_150 = arith.constant 0 : index
    %c0_151 = arith.constant 0 : index
    %c0_152 = arith.constant 0 : index
    %250 = vector.load %arg7[%c0_150, %c0_151, %c0_152] : memref<3x128x128xf32, #tpu.memory_space<vmem>>, vector<1x128x128xf32>
    %251 = vector.shape_cast %250 : vector<1x128x128xf32> to vector<128x128xf32>
    %cst_153 = arith.constant dense<0.000000e+00> : vector<4x128xf32>
    %252 = tpu.matmul %249, %251, %cst_153 {dimension_numbers = #tpu.dot_dimension_numbers<[1], [0], [0], [1], [0, 0, 1, 1], [], []>} : vector<4x128xf32>, vector<128x128xf32>, vector<4x128xf32> -> vector<4x128xf32>
    %253 = arith.addf %248, %252 : vector<4x128xf32>
    %cst_154 = arith.constant dense<0.000000e+00> : vector<4x128xf32>
    %254 = tpu.matmul %214, %196, %cst_154 {dimension_numbers = #tpu.dot_dimension_numbers<[1], [0], [0], [1], [0, 0, 1, 1], [], []>} : vector<4x8xf32>, vector<8x128xf32>, vector<4x128xf32> -> vector<4x128xf32>
    %c1_155 = arith.constant 1 : index
    %c0_156 = arith.constant 0 : index
    %c0_157 = arith.constant 0 : index
    %255 = vector.load %arg7[%c1_155, %c0_156, %c0_157] : memref<3x128x128xf32, #tpu.memory_space<vmem>>, vector<1x128x128xf32>
    %256 = vector.shape_cast %255 : vector<1x128x128xf32> to vector<128x128xf32>
    %cst_158 = arith.constant dense<0.000000e+00> : vector<4x128xf32>
    %257 = tpu.matmul %254, %256, %cst_158 {dimension_numbers = #tpu.dot_dimension_numbers<[1], [0], [0], [1], [0, 0, 1, 1], [], []>} : vector<4x128xf32>, vector<128x128xf32>, vector<4x128xf32> -> vector<4x128xf32>
    %258 = arith.addf %253, %257 : vector<4x128xf32>
    %cst_159 = arith.constant dense<0.000000e+00> : vector<4x128xf32>
    %259 = tpu.matmul %223, %196, %cst_159 {dimension_numbers = #tpu.dot_dimension_numbers<[1], [0], [0], [1], [0, 0, 1, 1], [], []>} : vector<4x8xf32>, vector<8x128xf32>, vector<4x128xf32> -> vector<4x128xf32>
    %c2_160 = arith.constant 2 : index
    %c0_161 = arith.constant 0 : index
    %c0_162 = arith.constant 0 : index
    %260 = vector.load %arg7[%c2_160, %c0_161, %c0_162] : memref<3x128x128xf32, #tpu.memory_space<vmem>>, vector<1x128x128xf32>
    %261 = vector.shape_cast %260 : vector<1x128x128xf32> to vector<128x128xf32>
    %cst_163 = arith.constant dense<0.000000e+00> : vector<4x128xf32>
    %262 = tpu.matmul %259, %261, %cst_163 {dimension_numbers = #tpu.dot_dimension_numbers<[1], [0], [0], [1], [0, 0, 1, 1], [], []>} : vector<4x128xf32>, vector<128x128xf32>, vector<4x128xf32> -> vector<4x128xf32>
    %263 = arith.addf %258, %262 : vector<4x128xf32>
    %cst_164 = arith.constant 0.000000e+00 : f32
    %264 = vector.broadcast %cst_164 : f32 to vector<4x128xf32>
    %265 = arith.maximumf %263, %264 : vector<4x128xf32>
    %266 = tpu.iota {dimensions = array<i32: 1>} : vector<4x4xi32>
    %267 = tpu.iota {dimensions = array<i32: 0>} : vector<4x4xi32>
    %c1_i32_165 = arith.constant 1 : i32
    %268 = vector.broadcast %c1_i32_165 : i32 to vector<4x4xi32>
    %269 = arith.muli %268, %267 : vector<4x4xi32>
    %c-1_i32_166 = arith.constant -1 : i32
    %270 = vector.broadcast %c-1_i32_166 : i32 to vector<4x4xi32>
    %271 = arith.addi %269, %270 : vector<4x4xi32>
    %272 = arith.cmpi eq, %266, %271 : vector<4x4xi32>
    %273 = arith.extui %272 : vector<4x4xi1> to vector<4x4xi32>
    %274 = arith.sitofp %273 : vector<4x4xi32> to vector<4x4xf32>
    %275 = tpu.iota {dimensions = array<i32: 1>} : vector<4x4xi32>
    %276 = tpu.iota {dimensions = array<i32: 0>} : vector<4x4xi32>
    %c1_i32_167 = arith.constant 1 : i32
    %277 = vector.broadcast %c1_i32_167 : i32 to vector<4x4xi32>
    %278 = arith.muli %277, %276 : vector<4x4xi32>
    %c0_i32_168 = arith.constant 0 : i32
    %279 = vector.broadcast %c0_i32_168 : i32 to vector<4x4xi32>
    %280 = arith.addi %278, %279 : vector<4x4xi32>
    %281 = arith.cmpi eq, %275, %280 : vector<4x4xi32>
    %282 = arith.extui %281 : vector<4x4xi1> to vector<4x4xi32>
    %283 = arith.sitofp %282 : vector<4x4xi32> to vector<4x4xf32>
    %284 = tpu.iota {dimensions = array<i32: 1>} : vector<4x4xi32>
    %285 = tpu.iota {dimensions = array<i32: 0>} : vector<4x4xi32>
    %c1_i32_169 = arith.constant 1 : i32
    %286 = vector.broadcast %c1_i32_169 : i32 to vector<4x4xi32>
    %287 = arith.muli %286, %285 : vector<4x4xi32>
    %c1_i32_170 = arith.constant 1 : i32
    %288 = vector.broadcast %c1_i32_170 : i32 to vector<4x4xi32>
    %289 = arith.addi %287, %288 : vector<4x4xi32>
    %290 = arith.cmpi eq, %284, %289 : vector<4x4xi32>
    %291 = arith.extui %290 : vector<4x4xi1> to vector<4x4xi32>
    %292 = arith.sitofp %291 : vector<4x4xi32> to vector<4x4xf32>
    %cst_171 = arith.constant 0.000000e+00 : f32
    %293 = vector.broadcast %cst_171 : f32 to vector<4x256xf32>
    %c0_172 = arith.constant 0 : index
    %c0_173 = arith.constant 0 : index
    %294 = vector.load %arg10[%c0_172, %c0_173] : memref<1x256xf32, #tpu.memory_space<vmem>>, vector<1x256xf32>
    %295 = vector.broadcast %294 : vector<1x256xf32> to vector<4x256xf32>
    %296 = arith.addf %293, %295 : vector<4x256xf32>
    %cst_174 = arith.constant dense<0.000000e+00> : vector<4x128xf32>
    %297 = tpu.matmul %274, %244, %cst_174 {dimension_numbers = #tpu.dot_dimension_numbers<[1], [0], [0], [1], [0, 0, 1, 1], [], []>} : vector<4x4xf32>, vector<4x128xf32>, vector<4x128xf32> -> vector<4x128xf32>
    %c0_175 = arith.constant 0 : index
    %c0_176 = arith.constant 0 : index
    %c0_177 = arith.constant 0 : index
    %298 = vector.load %arg9[%c0_175, %c0_176, %c0_177] : memref<3x128x256xf32, #tpu.memory_space<vmem>>, vector<1x128x256xf32>
    %299 = vector.shape_cast %298 : vector<1x128x256xf32> to vector<128x256xf32>
    %cst_178 = arith.constant dense<0.000000e+00> : vector<4x256xf32>
    %300 = tpu.matmul %297, %299, %cst_178 {dimension_numbers = #tpu.dot_dimension_numbers<[1], [0], [0], [1], [0, 0, 1, 1], [], []>} : vector<4x128xf32>, vector<128x256xf32>, vector<4x256xf32> -> vector<4x256xf32>
    %301 = arith.addf %296, %300 : vector<4x256xf32>
    %cst_179 = arith.constant dense<0.000000e+00> : vector<4x128xf32>
    %302 = tpu.matmul %283, %244, %cst_179 {dimension_numbers = #tpu.dot_dimension_numbers<[1], [0], [0], [1], [0, 0, 1, 1], [], []>} : vector<4x4xf32>, vector<4x128xf32>, vector<4x128xf32> -> vector<4x128xf32>
    %c1_180 = arith.constant 1 : index
    %c0_181 = arith.constant 0 : index
    %c0_182 = arith.constant 0 : index
    %303 = vector.load %arg9[%c1_180, %c0_181, %c0_182] : memref<3x128x256xf32, #tpu.memory_space<vmem>>, vector<1x128x256xf32>
    %304 = vector.shape_cast %303 : vector<1x128x256xf32> to vector<128x256xf32>
    %cst_183 = arith.constant dense<0.000000e+00> : vector<4x256xf32>
    %305 = tpu.matmul %302, %304, %cst_183 {dimension_numbers = #tpu.dot_dimension_numbers<[1], [0], [0], [1], [0, 0, 1, 1], [], []>} : vector<4x128xf32>, vector<128x256xf32>, vector<4x256xf32> -> vector<4x256xf32>
    %306 = arith.addf %301, %305 : vector<4x256xf32>
    %cst_184 = arith.constant dense<0.000000e+00> : vector<4x128xf32>
    %307 = tpu.matmul %292, %244, %cst_184 {dimension_numbers = #tpu.dot_dimension_numbers<[1], [0], [0], [1], [0, 0, 1, 1], [], []>} : vector<4x4xf32>, vector<4x128xf32>, vector<4x128xf32> -> vector<4x128xf32>
    %c2_185 = arith.constant 2 : index
    %c0_186 = arith.constant 0 : index
    %c0_187 = arith.constant 0 : index
    %308 = vector.load %arg9[%c2_185, %c0_186, %c0_187] : memref<3x128x256xf32, #tpu.memory_space<vmem>>, vector<1x128x256xf32>
    %309 = vector.shape_cast %308 : vector<1x128x256xf32> to vector<128x256xf32>
    %cst_188 = arith.constant dense<0.000000e+00> : vector<4x256xf32>
    %310 = tpu.matmul %307, %309, %cst_188 {dimension_numbers = #tpu.dot_dimension_numbers<[1], [0], [0], [1], [0, 0, 1, 1], [], []>} : vector<4x128xf32>, vector<128x256xf32>, vector<4x256xf32> -> vector<4x256xf32>
    %311 = arith.addf %306, %310 : vector<4x256xf32>
    %cst_189 = arith.constant 0.000000e+00 : f32
    %312 = vector.broadcast %cst_189 : f32 to vector<4x256xf32>
    %313 = arith.maximumf %311, %312 : vector<4x256xf32>
    %cst_190 = arith.constant 0.000000e+00 : f32
    %314 = vector.broadcast %cst_190 : f32 to vector<4x256xf32>
    %c0_191 = arith.constant 0 : index
    %c0_192 = arith.constant 0 : index
    %315 = vector.load %arg10[%c0_191, %c0_192] : memref<1x256xf32, #tpu.memory_space<vmem>>, vector<1x256xf32>
    %316 = vector.broadcast %315 : vector<1x256xf32> to vector<4x256xf32>
    %317 = arith.addf %314, %316 : vector<4x256xf32>
    %cst_193 = arith.constant dense<0.000000e+00> : vector<4x128xf32>
    %318 = tpu.matmul %274, %265, %cst_193 {dimension_numbers = #tpu.dot_dimension_numbers<[1], [0], [0], [1], [0, 0, 1, 1], [], []>} : vector<4x4xf32>, vector<4x128xf32>, vector<4x128xf32> -> vector<4x128xf32>
    %c0_194 = arith.constant 0 : index
    %c0_195 = arith.constant 0 : index
    %c0_196 = arith.constant 0 : index
    %319 = vector.load %arg9[%c0_194, %c0_195, %c0_196] : memref<3x128x256xf32, #tpu.memory_space<vmem>>, vector<1x128x256xf32>
    %320 = vector.shape_cast %319 : vector<1x128x256xf32> to vector<128x256xf32>
    %cst_197 = arith.constant dense<0.000000e+00> : vector<4x256xf32>
    %321 = tpu.matmul %318, %320, %cst_197 {dimension_numbers = #tpu.dot_dimension_numbers<[1], [0], [0], [1], [0, 0, 1, 1], [], []>} : vector<4x128xf32>, vector<128x256xf32>, vector<4x256xf32> -> vector<4x256xf32>
    %322 = arith.addf %317, %321 : vector<4x256xf32>
    %cst_198 = arith.constant dense<0.000000e+00> : vector<4x128xf32>
    %323 = tpu.matmul %283, %265, %cst_198 {dimension_numbers = #tpu.dot_dimension_numbers<[1], [0], [0], [1], [0, 0, 1, 1], [], []>} : vector<4x4xf32>, vector<4x128xf32>, vector<4x128xf32> -> vector<4x128xf32>
    %c1_199 = arith.constant 1 : index
    %c0_200 = arith.constant 0 : index
    %c0_201 = arith.constant 0 : index
    %324 = vector.load %arg9[%c1_199, %c0_200, %c0_201] : memref<3x128x256xf32, #tpu.memory_space<vmem>>, vector<1x128x256xf32>
    %325 = vector.shape_cast %324 : vector<1x128x256xf32> to vector<128x256xf32>
    %cst_202 = arith.constant dense<0.000000e+00> : vector<4x256xf32>
    %326 = tpu.matmul %323, %325, %cst_202 {dimension_numbers = #tpu.dot_dimension_numbers<[1], [0], [0], [1], [0, 0, 1, 1], [], []>} : vector<4x128xf32>, vector<128x256xf32>, vector<4x256xf32> -> vector<4x256xf32>
    %327 = arith.addf %322, %326 : vector<4x256xf32>
    %cst_203 = arith.constant dense<0.000000e+00> : vector<4x128xf32>
    %328 = tpu.matmul %292, %265, %cst_203 {dimension_numbers = #tpu.dot_dimension_numbers<[1], [0], [0], [1], [0, 0, 1, 1], [], []>} : vector<4x4xf32>, vector<4x128xf32>, vector<4x128xf32> -> vector<4x128xf32>
    %c2_204 = arith.constant 2 : index
    %c0_205 = arith.constant 0 : index
    %c0_206 = arith.constant 0 : index
    %329 = vector.load %arg9[%c2_204, %c0_205, %c0_206] : memref<3x128x256xf32, #tpu.memory_space<vmem>>, vector<1x128x256xf32>
    %330 = vector.shape_cast %329 : vector<1x128x256xf32> to vector<128x256xf32>
    %cst_207 = arith.constant dense<0.000000e+00> : vector<4x256xf32>
    %331 = tpu.matmul %328, %330, %cst_207 {dimension_numbers = #tpu.dot_dimension_numbers<[1], [0], [0], [1], [0, 0, 1, 1], [], []>} : vector<4x128xf32>, vector<128x256xf32>, vector<4x256xf32> -> vector<4x256xf32>
    %332 = arith.addf %327, %331 : vector<4x256xf32>
    %cst_208 = arith.constant 0.000000e+00 : f32
    %333 = vector.broadcast %cst_208 : f32 to vector<4x256xf32>
    %334 = arith.maximumf %332, %333 : vector<4x256xf32>
    %cst_209 = arith.constant 0.000000e+00 : f32
    %335 = vector.broadcast %cst_209 : f32 to vector<1x64xf32>
    %336 = vector.extract_strided_slice %313 {offsets = [0, 0], sizes = [4, 64], strides = [1, 1]} : vector<4x256xf32> to vector<4x64xf32>
    %cst_210 = arith.constant dense<0.000000e+00> : vector<64xf32>
    %337 = vector.multi_reduction <add>, %336, %cst_210 [0] : vector<4x64xf32> to vector<64xf32>
    %338 = vector.shape_cast %337 : vector<64xf32> to vector<1x64xf32>
    %339 = arith.addf %335, %338 : vector<1x64xf32>
    %340 = vector.extract_strided_slice %313 {offsets = [0, 64], sizes = [4, 64], strides = [1, 1]} : vector<4x256xf32> to vector<4x64xf32>
    %cst_211 = arith.constant dense<0.000000e+00> : vector<64xf32>
    %341 = vector.multi_reduction <add>, %340, %cst_211 [0] : vector<4x64xf32> to vector<64xf32>
    %342 = vector.shape_cast %341 : vector<64xf32> to vector<1x64xf32>
    %343 = arith.addf %339, %342 : vector<1x64xf32>
    %344 = vector.extract_strided_slice %313 {offsets = [0, 128], sizes = [4, 64], strides = [1, 1]} : vector<4x256xf32> to vector<4x64xf32>
    %cst_212 = arith.constant dense<0.000000e+00> : vector<64xf32>
    %345 = vector.multi_reduction <add>, %344, %cst_212 [0] : vector<4x64xf32> to vector<64xf32>
    %346 = vector.shape_cast %345 : vector<64xf32> to vector<1x64xf32>
    %347 = arith.addf %343, %346 : vector<1x64xf32>
    %348 = vector.extract_strided_slice %313 {offsets = [0, 192], sizes = [4, 64], strides = [1, 1]} : vector<4x256xf32> to vector<4x64xf32>
    %cst_213 = arith.constant dense<0.000000e+00> : vector<64xf32>
    %349 = vector.multi_reduction <add>, %348, %cst_213 [0] : vector<4x64xf32> to vector<64xf32>
    %350 = vector.shape_cast %349 : vector<64xf32> to vector<1x64xf32>
    %351 = arith.addf %347, %350 : vector<1x64xf32>
    %352 = vector.extract_strided_slice %334 {offsets = [0, 0], sizes = [4, 64], strides = [1, 1]} : vector<4x256xf32> to vector<4x64xf32>
    %cst_214 = arith.constant dense<0.000000e+00> : vector<64xf32>
    %353 = vector.multi_reduction <add>, %352, %cst_214 [0] : vector<4x64xf32> to vector<64xf32>
    %354 = vector.shape_cast %353 : vector<64xf32> to vector<1x64xf32>
    %355 = arith.addf %351, %354 : vector<1x64xf32>
    %356 = vector.extract_strided_slice %334 {offsets = [0, 64], sizes = [4, 64], strides = [1, 1]} : vector<4x256xf32> to vector<4x64xf32>
    %cst_215 = arith.constant dense<0.000000e+00> : vector<64xf32>
    %357 = vector.multi_reduction <add>, %356, %cst_215 [0] : vector<4x64xf32> to vector<64xf32>
    %358 = vector.shape_cast %357 : vector<64xf32> to vector<1x64xf32>
    %359 = arith.addf %355, %358 : vector<1x64xf32>
    %360 = vector.extract_strided_slice %334 {offsets = [0, 128], sizes = [4, 64], strides = [1, 1]} : vector<4x256xf32> to vector<4x64xf32>
    %cst_216 = arith.constant dense<0.000000e+00> : vector<64xf32>
    %361 = vector.multi_reduction <add>, %360, %cst_216 [0] : vector<4x64xf32> to vector<64xf32>
    %362 = vector.shape_cast %361 : vector<64xf32> to vector<1x64xf32>
    %363 = arith.addf %359, %362 : vector<1x64xf32>
    %364 = vector.extract_strided_slice %334 {offsets = [0, 192], sizes = [4, 64], strides = [1, 1]} : vector<4x256xf32> to vector<4x64xf32>
    %cst_217 = arith.constant dense<0.000000e+00> : vector<64xf32>
    %365 = vector.multi_reduction <add>, %364, %cst_217 [0] : vector<4x64xf32> to vector<64xf32>
    %366 = vector.shape_cast %365 : vector<64xf32> to vector<1x64xf32>
    %367 = arith.addf %363, %366 : vector<1x64xf32>
    %cst_218 = arith.constant 3.125000e-02 : f32
    %368 = vector.broadcast %cst_218 : f32 to vector<1x64xf32>
    %369 = arith.mulf %367, %368 : vector<1x64xf32>
    %370 = tpu.concatenate %369, %369, %369, %369 in 1 : vector<1x64xf32>, vector<1x64xf32>, vector<1x64xf32>, vector<1x64xf32> -> vector<1x256xf32>
    %cst_219 = arith.constant 0.000000e+00 : f32
    %371 = vector.broadcast %cst_219 : f32 to vector<1x64xf32>
    %372 = vector.broadcast %370 : vector<1x256xf32> to vector<4x256xf32>
    %373 = arith.subf %313, %372 : vector<4x256xf32>
    %374 = arith.mulf %373, %373 : vector<4x256xf32>
    %375 = vector.extract_strided_slice %374 {offsets = [0, 0], sizes = [4, 64], strides = [1, 1]} : vector<4x256xf32> to vector<4x64xf32>
    %cst_220 = arith.constant dense<0.000000e+00> : vector<64xf32>
    %376 = vector.multi_reduction <add>, %375, %cst_220 [0] : vector<4x64xf32> to vector<64xf32>
    %377 = vector.shape_cast %376 : vector<64xf32> to vector<1x64xf32>
    %378 = arith.addf %371, %377 : vector<1x64xf32>
    %379 = vector.extract_strided_slice %374 {offsets = [0, 64], sizes = [4, 64], strides = [1, 1]} : vector<4x256xf32> to vector<4x64xf32>
    %cst_221 = arith.constant dense<0.000000e+00> : vector<64xf32>
    %380 = vector.multi_reduction <add>, %379, %cst_221 [0] : vector<4x64xf32> to vector<64xf32>
    %381 = vector.shape_cast %380 : vector<64xf32> to vector<1x64xf32>
    %382 = arith.addf %378, %381 : vector<1x64xf32>
    %383 = vector.extract_strided_slice %374 {offsets = [0, 128], sizes = [4, 64], strides = [1, 1]} : vector<4x256xf32> to vector<4x64xf32>
    %cst_222 = arith.constant dense<0.000000e+00> : vector<64xf32>
    %384 = vector.multi_reduction <add>, %383, %cst_222 [0] : vector<4x64xf32> to vector<64xf32>
    %385 = vector.shape_cast %384 : vector<64xf32> to vector<1x64xf32>
    %386 = arith.addf %382, %385 : vector<1x64xf32>
    %387 = vector.extract_strided_slice %374 {offsets = [0, 192], sizes = [4, 64], strides = [1, 1]} : vector<4x256xf32> to vector<4x64xf32>
    %cst_223 = arith.constant dense<0.000000e+00> : vector<64xf32>
    %388 = vector.multi_reduction <add>, %387, %cst_223 [0] : vector<4x64xf32> to vector<64xf32>
    %389 = vector.shape_cast %388 : vector<64xf32> to vector<1x64xf32>
    %390 = arith.addf %386, %389 : vector<1x64xf32>
    %391 = vector.broadcast %370 : vector<1x256xf32> to vector<4x256xf32>
    %392 = arith.subf %334, %391 : vector<4x256xf32>
    %393 = arith.mulf %392, %392 : vector<4x256xf32>
    %394 = vector.extract_strided_slice %393 {offsets = [0, 0], sizes = [4, 64], strides = [1, 1]} : vector<4x256xf32> to vector<4x64xf32>
    %cst_224 = arith.constant dense<0.000000e+00> : vector<64xf32>
    %395 = vector.multi_reduction <add>, %394, %cst_224 [0] : vector<4x64xf32> to vector<64xf32>
    %396 = vector.shape_cast %395 : vector<64xf32> to vector<1x64xf32>
    %397 = arith.addf %390, %396 : vector<1x64xf32>
    %398 = vector.extract_strided_slice %393 {offsets = [0, 64], sizes = [4, 64], strides = [1, 1]} : vector<4x256xf32> to vector<4x64xf32>
    %cst_225 = arith.constant dense<0.000000e+00> : vector<64xf32>
    %399 = vector.multi_reduction <add>, %398, %cst_225 [0] : vector<4x64xf32> to vector<64xf32>
    %400 = vector.shape_cast %399 : vector<64xf32> to vector<1x64xf32>
    %401 = arith.addf %397, %400 : vector<1x64xf32>
    %402 = vector.extract_strided_slice %393 {offsets = [0, 128], sizes = [4, 64], strides = [1, 1]} : vector<4x256xf32> to vector<4x64xf32>
    %cst_226 = arith.constant dense<0.000000e+00> : vector<64xf32>
    %403 = vector.multi_reduction <add>, %402, %cst_226 [0] : vector<4x64xf32> to vector<64xf32>
    %404 = vector.shape_cast %403 : vector<64xf32> to vector<1x64xf32>
    %405 = arith.addf %401, %404 : vector<1x64xf32>
    %406 = vector.extract_strided_slice %393 {offsets = [0, 192], sizes = [4, 64], strides = [1, 1]} : vector<4x256xf32> to vector<4x64xf32>
    %cst_227 = arith.constant dense<0.000000e+00> : vector<64xf32>
    %407 = vector.multi_reduction <add>, %406, %cst_227 [0] : vector<4x64xf32> to vector<64xf32>
    %408 = vector.shape_cast %407 : vector<64xf32> to vector<1x64xf32>
    %409 = arith.addf %405, %408 : vector<1x64xf32>
    %cst_228 = arith.constant 3.125000e-02 : f32
    %410 = vector.broadcast %cst_228 : f32 to vector<1x64xf32>
    %411 = arith.mulf %409, %410 : vector<1x64xf32>
    %c0_229 = arith.constant 0 : index
    %c0_230 = arith.constant 0 : index
    %412 = vector.load %arg11[%c0_229, %c0_230] : memref<1x64xf32, #tpu.memory_space<vmem>>, vector<1x64xf32>
    %cst_231 = arith.constant 9.99999974E-6 : f32
    %413 = vector.broadcast %cst_231 : f32 to vector<1x64xf32>
    %414 = arith.addf %411, %413 : vector<1x64xf32>
    %415 = math.rsqrt %414 : vector<1x64xf32>
    %416 = arith.mulf %412, %415 : vector<1x64xf32>
    %c0_232 = arith.constant 0 : index
    %c0_233 = arith.constant 0 : index
    %417 = vector.load %arg12[%c0_232, %c0_233] : memref<1x64xf32, #tpu.memory_space<vmem>>, vector<1x64xf32>
    %418 = arith.mulf %369, %416 : vector<1x64xf32>
    %419 = arith.subf %417, %418 : vector<1x64xf32>
    %420 = tpu.concatenate %416, %416, %416, %416 in 1 : vector<1x64xf32>, vector<1x64xf32>, vector<1x64xf32>, vector<1x64xf32> -> vector<1x256xf32>
    %421 = tpu.concatenate %419, %419, %419, %419 in 1 : vector<1x64xf32>, vector<1x64xf32>, vector<1x64xf32>, vector<1x64xf32> -> vector<1x256xf32>
    %422 = vector.broadcast %420 : vector<1x256xf32> to vector<4x256xf32>
    %423 = arith.mulf %313, %422 : vector<4x256xf32>
    %424 = vector.broadcast %421 : vector<1x256xf32> to vector<4x256xf32>
    %425 = arith.addf %423, %424 : vector<4x256xf32>
    %426 = vector.broadcast %420 : vector<1x256xf32> to vector<4x256xf32>
    %427 = arith.mulf %334, %426 : vector<4x256xf32>
    %428 = vector.broadcast %421 : vector<1x256xf32> to vector<4x256xf32>
    %429 = arith.addf %427, %428 : vector<4x256xf32>
    %430 = tpu.iota {dimensions = array<i32: 1>} : vector<4x4xi32>
    %431 = tpu.iota {dimensions = array<i32: 0>} : vector<4x4xi32>
    %c1_i32_234 = arith.constant 1 : i32
    %432 = vector.broadcast %c1_i32_234 : i32 to vector<4x4xi32>
    %433 = arith.muli %432, %431 : vector<4x4xi32>
    %c-1_i32_235 = arith.constant -1 : i32
    %434 = vector.broadcast %c-1_i32_235 : i32 to vector<4x4xi32>
    %435 = arith.addi %433, %434 : vector<4x4xi32>
    %436 = arith.cmpi eq, %430, %435 : vector<4x4xi32>
    %437 = arith.extui %436 : vector<4x4xi1> to vector<4x4xi32>
    %438 = arith.sitofp %437 : vector<4x4xi32> to vector<4x4xf32>
    %439 = tpu.iota {dimensions = array<i32: 1>} : vector<4x4xi32>
    %440 = tpu.iota {dimensions = array<i32: 0>} : vector<4x4xi32>
    %c1_i32_236 = arith.constant 1 : i32
    %441 = vector.broadcast %c1_i32_236 : i32 to vector<4x4xi32>
    %442 = arith.muli %441, %440 : vector<4x4xi32>
    %c0_i32_237 = arith.constant 0 : i32
    %443 = vector.broadcast %c0_i32_237 : i32 to vector<4x4xi32>
    %444 = arith.addi %442, %443 : vector<4x4xi32>
    %445 = arith.cmpi eq, %439, %444 : vector<4x4xi32>
    %446 = arith.extui %445 : vector<4x4xi1> to vector<4x4xi32>
    %447 = arith.sitofp %446 : vector<4x4xi32> to vector<4x4xf32>
    %448 = tpu.iota {dimensions = array<i32: 1>} : vector<4x4xi32>
    %449 = tpu.iota {dimensions = array<i32: 0>} : vector<4x4xi32>
    %c1_i32_238 = arith.constant 1 : i32
    %450 = vector.broadcast %c1_i32_238 : i32 to vector<4x4xi32>
    %451 = arith.muli %450, %449 : vector<4x4xi32>
    %c1_i32_239 = arith.constant 1 : i32
    %452 = vector.broadcast %c1_i32_239 : i32 to vector<4x4xi32>
    %453 = arith.addi %451, %452 : vector<4x4xi32>
    %454 = arith.cmpi eq, %448, %453 : vector<4x4xi32>
    %455 = arith.extui %454 : vector<4x4xi1> to vector<4x4xi32>
    %456 = arith.sitofp %455 : vector<4x4xi32> to vector<4x4xf32>
    %cst_240 = arith.constant 0.000000e+00 : f32
    %457 = vector.broadcast %cst_240 : f32 to vector<4x128xf32>
    %c0_241 = arith.constant 0 : index
    %c0_242 = arith.constant 0 : index
    %458 = vector.load %arg14[%c0_241, %c0_242] : memref<1x128xf32, #tpu.memory_space<vmem>>, vector<1x128xf32>
    %459 = vector.broadcast %458 : vector<1x128xf32> to vector<4x128xf32>
    %460 = arith.addf %457, %459 : vector<4x128xf32>
    %cst_243 = arith.constant dense<0.000000e+00> : vector<4x256xf32>
    %461 = tpu.matmul %438, %425, %cst_243 {dimension_numbers = #tpu.dot_dimension_numbers<[1], [0], [0], [1], [0, 0, 1, 1], [], []>} : vector<4x4xf32>, vector<4x256xf32>, vector<4x256xf32> -> vector<4x256xf32>
    %c0_244 = arith.constant 0 : index
    %c0_245 = arith.constant 0 : index
    %c0_246 = arith.constant 0 : index
    %462 = vector.load %arg13[%c0_244, %c0_245, %c0_246] : memref<3x256x128xf32, #tpu.memory_space<vmem>>, vector<1x256x128xf32>
    %463 = vector.shape_cast %462 : vector<1x256x128xf32> to vector<256x128xf32>
    %cst_247 = arith.constant dense<0.000000e+00> : vector<4x128xf32>
    %464 = tpu.matmul %461, %463, %cst_247 {dimension_numbers = #tpu.dot_dimension_numbers<[1], [0], [0], [1], [0, 0, 1, 1], [], []>} : vector<4x256xf32>, vector<256x128xf32>, vector<4x128xf32> -> vector<4x128xf32>
    %465 = arith.addf %460, %464 : vector<4x128xf32>
    %cst_248 = arith.constant dense<0.000000e+00> : vector<4x256xf32>
    %466 = tpu.matmul %447, %425, %cst_248 {dimension_numbers = #tpu.dot_dimension_numbers<[1], [0], [0], [1], [0, 0, 1, 1], [], []>} : vector<4x4xf32>, vector<4x256xf32>, vector<4x256xf32> -> vector<4x256xf32>
    %c1_249 = arith.constant 1 : index
    %c0_250 = arith.constant 0 : index
    %c0_251 = arith.constant 0 : index
    %467 = vector.load %arg13[%c1_249, %c0_250, %c0_251] : memref<3x256x128xf32, #tpu.memory_space<vmem>>, vector<1x256x128xf32>
    %468 = vector.shape_cast %467 : vector<1x256x128xf32> to vector<256x128xf32>
    %cst_252 = arith.constant dense<0.000000e+00> : vector<4x128xf32>
    %469 = tpu.matmul %466, %468, %cst_252 {dimension_numbers = #tpu.dot_dimension_numbers<[1], [0], [0], [1], [0, 0, 1, 1], [], []>} : vector<4x256xf32>, vector<256x128xf32>, vector<4x128xf32> -> vector<4x128xf32>
    %470 = arith.addf %465, %469 : vector<4x128xf32>
    %cst_253 = arith.constant dense<0.000000e+00> : vector<4x256xf32>
    %471 = tpu.matmul %456, %425, %cst_253 {dimension_numbers = #tpu.dot_dimension_numbers<[1], [0], [0], [1], [0, 0, 1, 1], [], []>} : vector<4x4xf32>, vector<4x256xf32>, vector<4x256xf32> -> vector<4x256xf32>
    %c2_254 = arith.constant 2 : index
    %c0_255 = arith.constant 0 : index
    %c0_256 = arith.constant 0 : index
    %472 = vector.load %arg13[%c2_254, %c0_255, %c0_256] : memref<3x256x128xf32, #tpu.memory_space<vmem>>, vector<1x256x128xf32>
    %473 = vector.shape_cast %472 : vector<1x256x128xf32> to vector<256x128xf32>
    %cst_257 = arith.constant dense<0.000000e+00> : vector<4x128xf32>
    %474 = tpu.matmul %471, %473, %cst_257 {dimension_numbers = #tpu.dot_dimension_numbers<[1], [0], [0], [1], [0, 0, 1, 1], [], []>} : vector<4x256xf32>, vector<256x128xf32>, vector<4x128xf32> -> vector<4x128xf32>
    %475 = arith.addf %470, %474 : vector<4x128xf32>
    %cst_258 = arith.constant 0.000000e+00 : f32
    %476 = vector.broadcast %cst_258 : f32 to vector<4x128xf32>
    %477 = arith.maximumf %475, %476 : vector<4x128xf32>
    %cst_259 = arith.constant 0.000000e+00 : f32
    %478 = vector.broadcast %cst_259 : f32 to vector<4x128xf32>
    %c0_260 = arith.constant 0 : index
    %c0_261 = arith.constant 0 : index
    %479 = vector.load %arg14[%c0_260, %c0_261] : memref<1x128xf32, #tpu.memory_space<vmem>>, vector<1x128xf32>
    %480 = vector.broadcast %479 : vector<1x128xf32> to vector<4x128xf32>
    %481 = arith.addf %478, %480 : vector<4x128xf32>
    %cst_262 = arith.constant dense<0.000000e+00> : vector<4x256xf32>
    %482 = tpu.matmul %438, %429, %cst_262 {dimension_numbers = #tpu.dot_dimension_numbers<[1], [0], [0], [1], [0, 0, 1, 1], [], []>} : vector<4x4xf32>, vector<4x256xf32>, vector<4x256xf32> -> vector<4x256xf32>
    %c0_263 = arith.constant 0 : index
    %c0_264 = arith.constant 0 : index
    %c0_265 = arith.constant 0 : index
    %483 = vector.load %arg13[%c0_263, %c0_264, %c0_265] : memref<3x256x128xf32, #tpu.memory_space<vmem>>, vector<1x256x128xf32>
    %484 = vector.shape_cast %483 : vector<1x256x128xf32> to vector<256x128xf32>
    %cst_266 = arith.constant dense<0.000000e+00> : vector<4x128xf32>
    %485 = tpu.matmul %482, %484, %cst_266 {dimension_numbers = #tpu.dot_dimension_numbers<[1], [0], [0], [1], [0, 0, 1, 1], [], []>} : vector<4x256xf32>, vector<256x128xf32>, vector<4x128xf32> -> vector<4x128xf32>
    %486 = arith.addf %481, %485 : vector<4x128xf32>
    %cst_267 = arith.constant dense<0.000000e+00> : vector<4x256xf32>
    %487 = tpu.matmul %447, %429, %cst_267 {dimension_numbers = #tpu.dot_dimension_numbers<[1], [0], [0], [1], [0, 0, 1, 1], [], []>} : vector<4x4xf32>, vector<4x256xf32>, vector<4x256xf32> -> vector<4x256xf32>
    %c1_268 = arith.constant 1 : index
    %c0_269 = arith.constant 0 : index
    %c0_270 = arith.constant 0 : index
    %488 = vector.load %arg13[%c1_268, %c0_269, %c0_270] : memref<3x256x128xf32, #tpu.memory_space<vmem>>, vector<1x256x128xf32>
    %489 = vector.shape_cast %488 : vector<1x256x128xf32> to vector<256x128xf32>
    %cst_271 = arith.constant dense<0.000000e+00> : vector<4x128xf32>
    %490 = tpu.matmul %487, %489, %cst_271 {dimension_numbers = #tpu.dot_dimension_numbers<[1], [0], [0], [1], [0, 0, 1, 1], [], []>} : vector<4x256xf32>, vector<256x128xf32>, vector<4x128xf32> -> vector<4x128xf32>
    %491 = arith.addf %486, %490 : vector<4x128xf32>
    %cst_272 = arith.constant dense<0.000000e+00> : vector<4x256xf32>
    %492 = tpu.matmul %456, %429, %cst_272 {dimension_numbers = #tpu.dot_dimension_numbers<[1], [0], [0], [1], [0, 0, 1, 1], [], []>} : vector<4x4xf32>, vector<4x256xf32>, vector<4x256xf32> -> vector<4x256xf32>
    %c2_273 = arith.constant 2 : index
    %c0_274 = arith.constant 0 : index
    %c0_275 = arith.constant 0 : index
    %493 = vector.load %arg13[%c2_273, %c0_274, %c0_275] : memref<3x256x128xf32, #tpu.memory_space<vmem>>, vector<1x256x128xf32>
    %494 = vector.shape_cast %493 : vector<1x256x128xf32> to vector<256x128xf32>
    %cst_276 = arith.constant dense<0.000000e+00> : vector<4x128xf32>
    %495 = tpu.matmul %492, %494, %cst_276 {dimension_numbers = #tpu.dot_dimension_numbers<[1], [0], [0], [1], [0, 0, 1, 1], [], []>} : vector<4x256xf32>, vector<256x128xf32>, vector<4x128xf32> -> vector<4x128xf32>
    %496 = arith.addf %491, %495 : vector<4x128xf32>
    %cst_277 = arith.constant 0.000000e+00 : f32
    %497 = vector.broadcast %cst_277 : f32 to vector<4x128xf32>
    %498 = arith.maximumf %496, %497 : vector<4x128xf32>
    %cst_278 = arith.constant 0.000000e+00 : f32
    %499 = vector.broadcast %cst_278 : f32 to vector<1x32xf32>
    %500 = vector.extract_strided_slice %477 {offsets = [0, 0], sizes = [4, 32], strides = [1, 1]} : vector<4x128xf32> to vector<4x32xf32>
    %cst_279 = arith.constant dense<0.000000e+00> : vector<32xf32>
    %501 = vector.multi_reduction <add>, %500, %cst_279 [0] : vector<4x32xf32> to vector<32xf32>
    %502 = vector.shape_cast %501 : vector<32xf32> to vector<1x32xf32>
    %503 = arith.addf %499, %502 : vector<1x32xf32>
    %504 = vector.extract_strided_slice %477 {offsets = [0, 32], sizes = [4, 32], strides = [1, 1]} : vector<4x128xf32> to vector<4x32xf32>
    %cst_280 = arith.constant dense<0.000000e+00> : vector<32xf32>
    %505 = vector.multi_reduction <add>, %504, %cst_280 [0] : vector<4x32xf32> to vector<32xf32>
    %506 = vector.shape_cast %505 : vector<32xf32> to vector<1x32xf32>
    %507 = arith.addf %503, %506 : vector<1x32xf32>
    %508 = vector.extract_strided_slice %477 {offsets = [0, 64], sizes = [4, 32], strides = [1, 1]} : vector<4x128xf32> to vector<4x32xf32>
    %cst_281 = arith.constant dense<0.000000e+00> : vector<32xf32>
    %509 = vector.multi_reduction <add>, %508, %cst_281 [0] : vector<4x32xf32> to vector<32xf32>
    %510 = vector.shape_cast %509 : vector<32xf32> to vector<1x32xf32>
    %511 = arith.addf %507, %510 : vector<1x32xf32>
    %512 = vector.extract_strided_slice %477 {offsets = [0, 96], sizes = [4, 32], strides = [1, 1]} : vector<4x128xf32> to vector<4x32xf32>
    %cst_282 = arith.constant dense<0.000000e+00> : vector<32xf32>
    %513 = vector.multi_reduction <add>, %512, %cst_282 [0] : vector<4x32xf32> to vector<32xf32>
    %514 = vector.shape_cast %513 : vector<32xf32> to vector<1x32xf32>
    %515 = arith.addf %511, %514 : vector<1x32xf32>
    %516 = vector.extract_strided_slice %498 {offsets = [0, 0], sizes = [4, 32], strides = [1, 1]} : vector<4x128xf32> to vector<4x32xf32>
    %cst_283 = arith.constant dense<0.000000e+00> : vector<32xf32>
    %517 = vector.multi_reduction <add>, %516, %cst_283 [0] : vector<4x32xf32> to vector<32xf32>
    %518 = vector.shape_cast %517 : vector<32xf32> to vector<1x32xf32>
    %519 = arith.addf %515, %518 : vector<1x32xf32>
    %520 = vector.extract_strided_slice %498 {offsets = [0, 32], sizes = [4, 32], strides = [1, 1]} : vector<4x128xf32> to vector<4x32xf32>
    %cst_284 = arith.constant dense<0.000000e+00> : vector<32xf32>
    %521 = vector.multi_reduction <add>, %520, %cst_284 [0] : vector<4x32xf32> to vector<32xf32>
    %522 = vector.shape_cast %521 : vector<32xf32> to vector<1x32xf32>
    %523 = arith.addf %519, %522 : vector<1x32xf32>
    %524 = vector.extract_strided_slice %498 {offsets = [0, 64], sizes = [4, 32], strides = [1, 1]} : vector<4x128xf32> to vector<4x32xf32>
    %cst_285 = arith.constant dense<0.000000e+00> : vector<32xf32>
    %525 = vector.multi_reduction <add>, %524, %cst_285 [0] : vector<4x32xf32> to vector<32xf32>
    %526 = vector.shape_cast %525 : vector<32xf32> to vector<1x32xf32>
    %527 = arith.addf %523, %526 : vector<1x32xf32>
    %528 = vector.extract_strided_slice %498 {offsets = [0, 96], sizes = [4, 32], strides = [1, 1]} : vector<4x128xf32> to vector<4x32xf32>
    %cst_286 = arith.constant dense<0.000000e+00> : vector<32xf32>
    %529 = vector.multi_reduction <add>, %528, %cst_286 [0] : vector<4x32xf32> to vector<32xf32>
    %530 = vector.shape_cast %529 : vector<32xf32> to vector<1x32xf32>
    %531 = arith.addf %527, %530 : vector<1x32xf32>
    %cst_287 = arith.constant 3.125000e-02 : f32
    %532 = vector.broadcast %cst_287 : f32 to vector<1x32xf32>
    %533 = arith.mulf %531, %532 : vector<1x32xf32>
    %534 = tpu.concatenate %533, %533, %533, %533 in 1 : vector<1x32xf32>, vector<1x32xf32>, vector<1x32xf32>, vector<1x32xf32> -> vector<1x128xf32>
    %cst_288 = arith.constant 0.000000e+00 : f32
    %535 = vector.broadcast %cst_288 : f32 to vector<1x32xf32>
    %536 = vector.broadcast %534 : vector<1x128xf32> to vector<4x128xf32>
    %537 = arith.subf %477, %536 : vector<4x128xf32>
    %538 = arith.mulf %537, %537 : vector<4x128xf32>
    %539 = vector.extract_strided_slice %538 {offsets = [0, 0], sizes = [4, 32], strides = [1, 1]} : vector<4x128xf32> to vector<4x32xf32>
    %cst_289 = arith.constant dense<0.000000e+00> : vector<32xf32>
    %540 = vector.multi_reduction <add>, %539, %cst_289 [0] : vector<4x32xf32> to vector<32xf32>
    %541 = vector.shape_cast %540 : vector<32xf32> to vector<1x32xf32>
    %542 = arith.addf %535, %541 : vector<1x32xf32>
    %543 = vector.extract_strided_slice %538 {offsets = [0, 32], sizes = [4, 32], strides = [1, 1]} : vector<4x128xf32> to vector<4x32xf32>
    %cst_290 = arith.constant dense<0.000000e+00> : vector<32xf32>
    %544 = vector.multi_reduction <add>, %543, %cst_290 [0] : vector<4x32xf32> to vector<32xf32>
    %545 = vector.shape_cast %544 : vector<32xf32> to vector<1x32xf32>
    %546 = arith.addf %542, %545 : vector<1x32xf32>
    %547 = vector.extract_strided_slice %538 {offsets = [0, 64], sizes = [4, 32], strides = [1, 1]} : vector<4x128xf32> to vector<4x32xf32>
    %cst_291 = arith.constant dense<0.000000e+00> : vector<32xf32>
    %548 = vector.multi_reduction <add>, %547, %cst_291 [0] : vector<4x32xf32> to vector<32xf32>
    %549 = vector.shape_cast %548 : vector<32xf32> to vector<1x32xf32>
    %550 = arith.addf %546, %549 : vector<1x32xf32>
    %551 = vector.extract_strided_slice %538 {offsets = [0, 96], sizes = [4, 32], strides = [1, 1]} : vector<4x128xf32> to vector<4x32xf32>
    %cst_292 = arith.constant dense<0.000000e+00> : vector<32xf32>
    %552 = vector.multi_reduction <add>, %551, %cst_292 [0] : vector<4x32xf32> to vector<32xf32>
    %553 = vector.shape_cast %552 : vector<32xf32> to vector<1x32xf32>
    %554 = arith.addf %550, %553 : vector<1x32xf32>
    %555 = vector.broadcast %534 : vector<1x128xf32> to vector<4x128xf32>
    %556 = arith.subf %498, %555 : vector<4x128xf32>
    %557 = arith.mulf %556, %556 : vector<4x128xf32>
    %558 = vector.extract_strided_slice %557 {offsets = [0, 0], sizes = [4, 32], strides = [1, 1]} : vector<4x128xf32> to vector<4x32xf32>
    %cst_293 = arith.constant dense<0.000000e+00> : vector<32xf32>
    %559 = vector.multi_reduction <add>, %558, %cst_293 [0] : vector<4x32xf32> to vector<32xf32>
    %560 = vector.shape_cast %559 : vector<32xf32> to vector<1x32xf32>
    %561 = arith.addf %554, %560 : vector<1x32xf32>
    %562 = vector.extract_strided_slice %557 {offsets = [0, 32], sizes = [4, 32], strides = [1, 1]} : vector<4x128xf32> to vector<4x32xf32>
    %cst_294 = arith.constant dense<0.000000e+00> : vector<32xf32>
    %563 = vector.multi_reduction <add>, %562, %cst_294 [0] : vector<4x32xf32> to vector<32xf32>
    %564 = vector.shape_cast %563 : vector<32xf32> to vector<1x32xf32>
    %565 = arith.addf %561, %564 : vector<1x32xf32>
    %566 = vector.extract_strided_slice %557 {offsets = [0, 64], sizes = [4, 32], strides = [1, 1]} : vector<4x128xf32> to vector<4x32xf32>
    %cst_295 = arith.constant dense<0.000000e+00> : vector<32xf32>
    %567 = vector.multi_reduction <add>, %566, %cst_295 [0] : vector<4x32xf32> to vector<32xf32>
    %568 = vector.shape_cast %567 : vector<32xf32> to vector<1x32xf32>
    %569 = arith.addf %565, %568 : vector<1x32xf32>
    %570 = vector.extract_strided_slice %557 {offsets = [0, 96], sizes = [4, 32], strides = [1, 1]} : vector<4x128xf32> to vector<4x32xf32>
    %cst_296 = arith.constant dense<0.000000e+00> : vector<32xf32>
    %571 = vector.multi_reduction <add>, %570, %cst_296 [0] : vector<4x32xf32> to vector<32xf32>
    %572 = vector.shape_cast %571 : vector<32xf32> to vector<1x32xf32>
    %573 = arith.addf %569, %572 : vector<1x32xf32>
    %cst_297 = arith.constant 3.125000e-02 : f32
    %574 = vector.broadcast %cst_297 : f32 to vector<1x32xf32>
    %575 = arith.mulf %573, %574 : vector<1x32xf32>
    %c0_298 = arith.constant 0 : index
    %c0_299 = arith.constant 0 : index
    %576 = vector.load %arg15[%c0_298, %c0_299] : memref<1x32xf32, #tpu.memory_space<vmem>>, vector<1x32xf32>
    %cst_300 = arith.constant 9.99999974E-6 : f32
    %577 = vector.broadcast %cst_300 : f32 to vector<1x32xf32>
    %578 = arith.addf %575, %577 : vector<1x32xf32>
    %579 = math.rsqrt %578 : vector<1x32xf32>
    %580 = arith.mulf %576, %579 : vector<1x32xf32>
    %c0_301 = arith.constant 0 : index
    %c0_302 = arith.constant 0 : index
    %581 = vector.load %arg16[%c0_301, %c0_302] : memref<1x32xf32, #tpu.memory_space<vmem>>, vector<1x32xf32>
    %582 = arith.mulf %533, %580 : vector<1x32xf32>
    %583 = arith.subf %581, %582 : vector<1x32xf32>
    %584 = tpu.concatenate %580, %580, %580, %580 in 1 : vector<1x32xf32>, vector<1x32xf32>, vector<1x32xf32>, vector<1x32xf32> -> vector<1x128xf32>
    %585 = tpu.concatenate %583, %583, %583, %583 in 1 : vector<1x32xf32>, vector<1x32xf32>, vector<1x32xf32>, vector<1x32xf32> -> vector<1x128xf32>
    %586 = vector.broadcast %584 : vector<1x128xf32> to vector<4x128xf32>
    %587 = arith.mulf %477, %586 : vector<4x128xf32>
    %588 = vector.broadcast %585 : vector<1x128xf32> to vector<4x128xf32>
    %589 = arith.addf %587, %588 : vector<4x128xf32>
    %590 = vector.broadcast %584 : vector<1x128xf32> to vector<4x128xf32>
    %591 = arith.mulf %498, %590 : vector<4x128xf32>
    %592 = vector.broadcast %585 : vector<1x128xf32> to vector<4x128xf32>
    %593 = arith.addf %591, %592 : vector<4x128xf32>
    %594 = tpu.iota {dimensions = array<i32: 0>} : vector<8x4xi32>
    %595 = tpu.iota {dimensions = array<i32: 1>} : vector<8x4xi32>
    %c2_i32_303 = arith.constant 2 : i32
    %596 = vector.broadcast %c2_i32_303 : i32 to vector<8x4xi32>
    %597 = arith.muli %596, %595 : vector<8x4xi32>
    %c0_i32_304 = arith.constant 0 : i32
    %598 = vector.broadcast %c0_i32_304 : i32 to vector<8x4xi32>
    %599 = arith.addi %597, %598 : vector<8x4xi32>
    %600 = arith.cmpi eq, %594, %599 : vector<8x4xi32>
    %601 = arith.extui %600 : vector<8x4xi1> to vector<8x4xi32>
    %602 = arith.sitofp %601 : vector<8x4xi32> to vector<8x4xf32>
    %603 = tpu.iota {dimensions = array<i32: 0>} : vector<8x4xi32>
    %604 = tpu.iota {dimensions = array<i32: 1>} : vector<8x4xi32>
    %c2_i32_305 = arith.constant 2 : i32
    %605 = vector.broadcast %c2_i32_305 : i32 to vector<8x4xi32>
    %606 = arith.muli %605, %604 : vector<8x4xi32>
    %c1_i32_306 = arith.constant 1 : i32
    %607 = vector.broadcast %c1_i32_306 : i32 to vector<8x4xi32>
    %608 = arith.addi %606, %607 : vector<8x4xi32>
    %609 = arith.cmpi eq, %603, %608 : vector<8x4xi32>
    %610 = arith.extui %609 : vector<8x4xi1> to vector<8x4xi32>
    %611 = arith.sitofp %610 : vector<8x4xi32> to vector<8x4xf32>
    %cst_307 = arith.constant 0.000000e+00 : f32
    %612 = vector.broadcast %cst_307 : f32 to vector<8x128xf32>
    %c0_308 = arith.constant 0 : index
    %c0_309 = arith.constant 0 : index
    %613 = vector.load %arg18[%c0_308, %c0_309] : memref<1x128xf32, #tpu.memory_space<vmem>>, vector<1x128xf32>
    %614 = vector.broadcast %613 : vector<1x128xf32> to vector<8x128xf32>
    %615 = arith.addf %612, %614 : vector<8x128xf32>
    %c0_310 = arith.constant 0 : index
    %c0_311 = arith.constant 0 : index
    %c0_312 = arith.constant 0 : index
    %616 = vector.load %arg17[%c0_310, %c0_311, %c0_312] : memref<2x128x128xf32, #tpu.memory_space<vmem>>, vector<1x128x128xf32>
    %617 = vector.shape_cast %616 : vector<1x128x128xf32> to vector<128x128xf32>
    %cst_313 = arith.constant dense<0.000000e+00> : vector<4x128xf32>
    %618 = tpu.matmul %589, %617, %cst_313 {dimension_numbers = #tpu.dot_dimension_numbers<[1], [0], [0], [1], [0, 0, 1, 1], [], []>} : vector<4x128xf32>, vector<128x128xf32>, vector<4x128xf32> -> vector<4x128xf32>
    %cst_314 = arith.constant dense<0.000000e+00> : vector<8x128xf32>
    %619 = tpu.matmul %602, %618, %cst_314 {dimension_numbers = #tpu.dot_dimension_numbers<[1], [0], [0], [1], [0, 0, 1, 1], [], []>} : vector<8x4xf32>, vector<4x128xf32>, vector<8x128xf32> -> vector<8x128xf32>
    %620 = arith.addf %615, %619 : vector<8x128xf32>
    %c1_315 = arith.constant 1 : index
    %c0_316 = arith.constant 0 : index
    %c0_317 = arith.constant 0 : index
    %621 = vector.load %arg17[%c1_315, %c0_316, %c0_317] : memref<2x128x128xf32, #tpu.memory_space<vmem>>, vector<1x128x128xf32>
    %622 = vector.shape_cast %621 : vector<1x128x128xf32> to vector<128x128xf32>
    %cst_318 = arith.constant dense<0.000000e+00> : vector<4x128xf32>
    %623 = tpu.matmul %589, %622, %cst_318 {dimension_numbers = #tpu.dot_dimension_numbers<[1], [0], [0], [1], [0, 0, 1, 1], [], []>} : vector<4x128xf32>, vector<128x128xf32>, vector<4x128xf32> -> vector<4x128xf32>
    %cst_319 = arith.constant dense<0.000000e+00> : vector<8x128xf32>
    %624 = tpu.matmul %611, %623, %cst_319 {dimension_numbers = #tpu.dot_dimension_numbers<[1], [0], [0], [1], [0, 0, 1, 1], [], []>} : vector<8x4xf32>, vector<4x128xf32>, vector<8x128xf32> -> vector<8x128xf32>
    %625 = arith.addf %620, %624 : vector<8x128xf32>
    %cst_320 = arith.constant 0.000000e+00 : f32
    %626 = vector.broadcast %cst_320 : f32 to vector<8x128xf32>
    %c0_321 = arith.constant 0 : index
    %c0_322 = arith.constant 0 : index
    %627 = vector.load %arg18[%c0_321, %c0_322] : memref<1x128xf32, #tpu.memory_space<vmem>>, vector<1x128xf32>
    %628 = vector.broadcast %627 : vector<1x128xf32> to vector<8x128xf32>
    %629 = arith.addf %626, %628 : vector<8x128xf32>
    %c0_323 = arith.constant 0 : index
    %c0_324 = arith.constant 0 : index
    %c0_325 = arith.constant 0 : index
    %630 = vector.load %arg17[%c0_323, %c0_324, %c0_325] : memref<2x128x128xf32, #tpu.memory_space<vmem>>, vector<1x128x128xf32>
    %631 = vector.shape_cast %630 : vector<1x128x128xf32> to vector<128x128xf32>
    %cst_326 = arith.constant dense<0.000000e+00> : vector<4x128xf32>
    %632 = tpu.matmul %593, %631, %cst_326 {dimension_numbers = #tpu.dot_dimension_numbers<[1], [0], [0], [1], [0, 0, 1, 1], [], []>} : vector<4x128xf32>, vector<128x128xf32>, vector<4x128xf32> -> vector<4x128xf32>
    %cst_327 = arith.constant dense<0.000000e+00> : vector<8x128xf32>
    %633 = tpu.matmul %602, %632, %cst_327 {dimension_numbers = #tpu.dot_dimension_numbers<[1], [0], [0], [1], [0, 0, 1, 1], [], []>} : vector<8x4xf32>, vector<4x128xf32>, vector<8x128xf32> -> vector<8x128xf32>
    %634 = arith.addf %629, %633 : vector<8x128xf32>
    %c1_328 = arith.constant 1 : index
    %c0_329 = arith.constant 0 : index
    %c0_330 = arith.constant 0 : index
    %635 = vector.load %arg17[%c1_328, %c0_329, %c0_330] : memref<2x128x128xf32, #tpu.memory_space<vmem>>, vector<1x128x128xf32>
    %636 = vector.shape_cast %635 : vector<1x128x128xf32> to vector<128x128xf32>
    %cst_331 = arith.constant dense<0.000000e+00> : vector<4x128xf32>
    %637 = tpu.matmul %593, %636, %cst_331 {dimension_numbers = #tpu.dot_dimension_numbers<[1], [0], [0], [1], [0, 0, 1, 1], [], []>} : vector<4x128xf32>, vector<128x128xf32>, vector<4x128xf32> -> vector<4x128xf32>
    %cst_332 = arith.constant dense<0.000000e+00> : vector<8x128xf32>
    %638 = tpu.matmul %611, %637, %cst_332 {dimension_numbers = #tpu.dot_dimension_numbers<[1], [0], [0], [1], [0, 0, 1, 1], [], []>} : vector<8x4xf32>, vector<4x128xf32>, vector<8x128xf32> -> vector<8x128xf32>
    %639 = arith.addf %634, %638 : vector<8x128xf32>
    %640 = tpu.iota {dimensions = array<i32: 1>} : vector<8x8xi32>
    %641 = tpu.iota {dimensions = array<i32: 0>} : vector<8x8xi32>
    %c1_i32_333 = arith.constant 1 : i32
    %642 = vector.broadcast %c1_i32_333 : i32 to vector<8x8xi32>
    %643 = arith.muli %642, %641 : vector<8x8xi32>
    %c-1_i32_334 = arith.constant -1 : i32
    %644 = vector.broadcast %c-1_i32_334 : i32 to vector<8x8xi32>
    %645 = arith.addi %643, %644 : vector<8x8xi32>
    %646 = arith.cmpi eq, %640, %645 : vector<8x8xi32>
    %647 = arith.extui %646 : vector<8x8xi1> to vector<8x8xi32>
    %648 = arith.sitofp %647 : vector<8x8xi32> to vector<8x8xf32>
    %649 = tpu.iota {dimensions = array<i32: 1>} : vector<8x8xi32>
    %650 = tpu.iota {dimensions = array<i32: 0>} : vector<8x8xi32>
    %c1_i32_335 = arith.constant 1 : i32
    %651 = vector.broadcast %c1_i32_335 : i32 to vector<8x8xi32>
    %652 = arith.muli %651, %650 : vector<8x8xi32>
    %c0_i32_336 = arith.constant 0 : i32
    %653 = vector.broadcast %c0_i32_336 : i32 to vector<8x8xi32>
    %654 = arith.addi %652, %653 : vector<8x8xi32>
    %655 = arith.cmpi eq, %649, %654 : vector<8x8xi32>
    %656 = arith.extui %655 : vector<8x8xi1> to vector<8x8xi32>
    %657 = arith.sitofp %656 : vector<8x8xi32> to vector<8x8xf32>
    %658 = tpu.iota {dimensions = array<i32: 1>} : vector<8x8xi32>
    %659 = tpu.iota {dimensions = array<i32: 0>} : vector<8x8xi32>
    %c1_i32_337 = arith.constant 1 : i32
    %660 = vector.broadcast %c1_i32_337 : i32 to vector<8x8xi32>
    %661 = arith.muli %660, %659 : vector<8x8xi32>
    %c1_i32_338 = arith.constant 1 : i32
    %662 = vector.broadcast %c1_i32_338 : i32 to vector<8x8xi32>
    %663 = arith.addi %661, %662 : vector<8x8xi32>
    %664 = arith.cmpi eq, %658, %663 : vector<8x8xi32>
    %665 = arith.extui %664 : vector<8x8xi1> to vector<8x8xi32>
    %666 = arith.sitofp %665 : vector<8x8xi32> to vector<8x8xf32>
    %cst_339 = arith.constant 0.000000e+00 : f32
    %667 = vector.broadcast %cst_339 : f32 to vector<8x128xf32>
    %c0_340 = arith.constant 0 : index
    %c0_341 = arith.constant 0 : index
    %668 = vector.load %arg21[%c0_340, %c0_341] : memref<1x128xf32, #tpu.memory_space<vmem>>, vector<1x128xf32>
    %669 = vector.broadcast %668 : vector<1x128xf32> to vector<8x128xf32>
    %670 = arith.addf %667, %669 : vector<8x128xf32>
    %cst_342 = arith.constant dense<0.000000e+00> : vector<8x128xf32>
    %671 = tpu.matmul %648, %625, %cst_342 {dimension_numbers = #tpu.dot_dimension_numbers<[1], [0], [0], [1], [0, 0, 1, 1], [], []>} : vector<8x8xf32>, vector<8x128xf32>, vector<8x128xf32> -> vector<8x128xf32>
    %c0_343 = arith.constant 0 : index
    %c0_344 = arith.constant 0 : index
    %c0_345 = arith.constant 0 : index
    %672 = vector.load %arg19[%c0_343, %c0_344, %c0_345] : memref<3x128x128xf32, #tpu.memory_space<vmem>>, vector<1x128x128xf32>
    %673 = vector.shape_cast %672 : vector<1x128x128xf32> to vector<128x128xf32>
    %cst_346 = arith.constant dense<0.000000e+00> : vector<8x128xf32>
    %674 = tpu.matmul %671, %673, %cst_346 {dimension_numbers = #tpu.dot_dimension_numbers<[1], [0], [0], [1], [0, 0, 1, 1], [], []>} : vector<8x128xf32>, vector<128x128xf32>, vector<8x128xf32> -> vector<8x128xf32>
    %675 = arith.addf %670, %674 : vector<8x128xf32>
    %cst_347 = arith.constant dense<0.000000e+00> : vector<8x128xf32>
    %676 = tpu.matmul %648, %177, %cst_347 {dimension_numbers = #tpu.dot_dimension_numbers<[1], [0], [0], [1], [0, 0, 1, 1], [], []>} : vector<8x8xf32>, vector<8x128xf32>, vector<8x128xf32> -> vector<8x128xf32>
    %c0_348 = arith.constant 0 : index
    %c0_349 = arith.constant 0 : index
    %c0_350 = arith.constant 0 : index
    %677 = vector.load %arg20[%c0_348, %c0_349, %c0_350] : memref<3x128x128xf32, #tpu.memory_space<vmem>>, vector<1x128x128xf32>
    %678 = vector.shape_cast %677 : vector<1x128x128xf32> to vector<128x128xf32>
    %cst_351 = arith.constant dense<0.000000e+00> : vector<8x128xf32>
    %679 = tpu.matmul %676, %678, %cst_351 {dimension_numbers = #tpu.dot_dimension_numbers<[1], [0], [0], [1], [0, 0, 1, 1], [], []>} : vector<8x128xf32>, vector<128x128xf32>, vector<8x128xf32> -> vector<8x128xf32>
    %680 = arith.addf %675, %679 : vector<8x128xf32>
    %cst_352 = arith.constant dense<0.000000e+00> : vector<8x128xf32>
    %681 = tpu.matmul %657, %625, %cst_352 {dimension_numbers = #tpu.dot_dimension_numbers<[1], [0], [0], [1], [0, 0, 1, 1], [], []>} : vector<8x8xf32>, vector<8x128xf32>, vector<8x128xf32> -> vector<8x128xf32>
    %c1_353 = arith.constant 1 : index
    %c0_354 = arith.constant 0 : index
    %c0_355 = arith.constant 0 : index
    %682 = vector.load %arg19[%c1_353, %c0_354, %c0_355] : memref<3x128x128xf32, #tpu.memory_space<vmem>>, vector<1x128x128xf32>
    %683 = vector.shape_cast %682 : vector<1x128x128xf32> to vector<128x128xf32>
    %cst_356 = arith.constant dense<0.000000e+00> : vector<8x128xf32>
    %684 = tpu.matmul %681, %683, %cst_356 {dimension_numbers = #tpu.dot_dimension_numbers<[1], [0], [0], [1], [0, 0, 1, 1], [], []>} : vector<8x128xf32>, vector<128x128xf32>, vector<8x128xf32> -> vector<8x128xf32>
    %685 = arith.addf %680, %684 : vector<8x128xf32>
    %cst_357 = arith.constant dense<0.000000e+00> : vector<8x128xf32>
    %686 = tpu.matmul %657, %177, %cst_357 {dimension_numbers = #tpu.dot_dimension_numbers<[1], [0], [0], [1], [0, 0, 1, 1], [], []>} : vector<8x8xf32>, vector<8x128xf32>, vector<8x128xf32> -> vector<8x128xf32>
    %c1_358 = arith.constant 1 : index
    %c0_359 = arith.constant 0 : index
    %c0_360 = arith.constant 0 : index
    %687 = vector.load %arg20[%c1_358, %c0_359, %c0_360] : memref<3x128x128xf32, #tpu.memory_space<vmem>>, vector<1x128x128xf32>
    %688 = vector.shape_cast %687 : vector<1x128x128xf32> to vector<128x128xf32>
    %cst_361 = arith.constant dense<0.000000e+00> : vector<8x128xf32>
    %689 = tpu.matmul %686, %688, %cst_361 {dimension_numbers = #tpu.dot_dimension_numbers<[1], [0], [0], [1], [0, 0, 1, 1], [], []>} : vector<8x128xf32>, vector<128x128xf32>, vector<8x128xf32> -> vector<8x128xf32>
    %690 = arith.addf %685, %689 : vector<8x128xf32>
    %cst_362 = arith.constant dense<0.000000e+00> : vector<8x128xf32>
    %691 = tpu.matmul %666, %625, %cst_362 {dimension_numbers = #tpu.dot_dimension_numbers<[1], [0], [0], [1], [0, 0, 1, 1], [], []>} : vector<8x8xf32>, vector<8x128xf32>, vector<8x128xf32> -> vector<8x128xf32>
    %c2_363 = arith.constant 2 : index
    %c0_364 = arith.constant 0 : index
    %c0_365 = arith.constant 0 : index
    %692 = vector.load %arg19[%c2_363, %c0_364, %c0_365] : memref<3x128x128xf32, #tpu.memory_space<vmem>>, vector<1x128x128xf32>
    %693 = vector.shape_cast %692 : vector<1x128x128xf32> to vector<128x128xf32>
    %cst_366 = arith.constant dense<0.000000e+00> : vector<8x128xf32>
    %694 = tpu.matmul %691, %693, %cst_366 {dimension_numbers = #tpu.dot_dimension_numbers<[1], [0], [0], [1], [0, 0, 1, 1], [], []>} : vector<8x128xf32>, vector<128x128xf32>, vector<8x128xf32> -> vector<8x128xf32>
    %695 = arith.addf %690, %694 : vector<8x128xf32>
    %cst_367 = arith.constant dense<0.000000e+00> : vector<8x128xf32>
    %696 = tpu.matmul %666, %177, %cst_367 {dimension_numbers = #tpu.dot_dimension_numbers<[1], [0], [0], [1], [0, 0, 1, 1], [], []>} : vector<8x8xf32>, vector<8x128xf32>, vector<8x128xf32> -> vector<8x128xf32>
    %c2_368 = arith.constant 2 : index
    %c0_369 = arith.constant 0 : index
    %c0_370 = arith.constant 0 : index
    %697 = vector.load %arg20[%c2_368, %c0_369, %c0_370] : memref<3x128x128xf32, #tpu.memory_space<vmem>>, vector<1x128x128xf32>
    %698 = vector.shape_cast %697 : vector<1x128x128xf32> to vector<128x128xf32>
    %cst_371 = arith.constant dense<0.000000e+00> : vector<8x128xf32>
    %699 = tpu.matmul %696, %698, %cst_371 {dimension_numbers = #tpu.dot_dimension_numbers<[1], [0], [0], [1], [0, 0, 1, 1], [], []>} : vector<8x128xf32>, vector<128x128xf32>, vector<8x128xf32> -> vector<8x128xf32>
    %700 = arith.addf %695, %699 : vector<8x128xf32>
    %cst_372 = arith.constant 0.000000e+00 : f32
    %701 = vector.broadcast %cst_372 : f32 to vector<8x128xf32>
    %702 = arith.maximumf %700, %701 : vector<8x128xf32>
    %cst_373 = arith.constant 0.000000e+00 : f32
    %703 = vector.broadcast %cst_373 : f32 to vector<8x128xf32>
    %c0_374 = arith.constant 0 : index
    %c0_375 = arith.constant 0 : index
    %704 = vector.load %arg21[%c0_374, %c0_375] : memref<1x128xf32, #tpu.memory_space<vmem>>, vector<1x128xf32>
    %705 = vector.broadcast %704 : vector<1x128xf32> to vector<8x128xf32>
    %706 = arith.addf %703, %705 : vector<8x128xf32>
    %cst_376 = arith.constant dense<0.000000e+00> : vector<8x128xf32>
    %707 = tpu.matmul %648, %639, %cst_376 {dimension_numbers = #tpu.dot_dimension_numbers<[1], [0], [0], [1], [0, 0, 1, 1], [], []>} : vector<8x8xf32>, vector<8x128xf32>, vector<8x128xf32> -> vector<8x128xf32>
    %c0_377 = arith.constant 0 : index
    %c0_378 = arith.constant 0 : index
    %c0_379 = arith.constant 0 : index
    %708 = vector.load %arg19[%c0_377, %c0_378, %c0_379] : memref<3x128x128xf32, #tpu.memory_space<vmem>>, vector<1x128x128xf32>
    %709 = vector.shape_cast %708 : vector<1x128x128xf32> to vector<128x128xf32>
    %cst_380 = arith.constant dense<0.000000e+00> : vector<8x128xf32>
    %710 = tpu.matmul %707, %709, %cst_380 {dimension_numbers = #tpu.dot_dimension_numbers<[1], [0], [0], [1], [0, 0, 1, 1], [], []>} : vector<8x128xf32>, vector<128x128xf32>, vector<8x128xf32> -> vector<8x128xf32>
    %711 = arith.addf %706, %710 : vector<8x128xf32>
    %cst_381 = arith.constant dense<0.000000e+00> : vector<8x128xf32>
    %712 = tpu.matmul %648, %196, %cst_381 {dimension_numbers = #tpu.dot_dimension_numbers<[1], [0], [0], [1], [0, 0, 1, 1], [], []>} : vector<8x8xf32>, vector<8x128xf32>, vector<8x128xf32> -> vector<8x128xf32>
    %c0_382 = arith.constant 0 : index
    %c0_383 = arith.constant 0 : index
    %c0_384 = arith.constant 0 : index
    %713 = vector.load %arg20[%c0_382, %c0_383, %c0_384] : memref<3x128x128xf32, #tpu.memory_space<vmem>>, vector<1x128x128xf32>
    %714 = vector.shape_cast %713 : vector<1x128x128xf32> to vector<128x128xf32>
    %cst_385 = arith.constant dense<0.000000e+00> : vector<8x128xf32>
    %715 = tpu.matmul %712, %714, %cst_385 {dimension_numbers = #tpu.dot_dimension_numbers<[1], [0], [0], [1], [0, 0, 1, 1], [], []>} : vector<8x128xf32>, vector<128x128xf32>, vector<8x128xf32> -> vector<8x128xf32>
    %716 = arith.addf %711, %715 : vector<8x128xf32>
    %cst_386 = arith.constant dense<0.000000e+00> : vector<8x128xf32>
    %717 = tpu.matmul %657, %639, %cst_386 {dimension_numbers = #tpu.dot_dimension_numbers<[1], [0], [0], [1], [0, 0, 1, 1], [], []>} : vector<8x8xf32>, vector<8x128xf32>, vector<8x128xf32> -> vector<8x128xf32>
    %c1_387 = arith.constant 1 : index
    %c0_388 = arith.constant 0 : index
    %c0_389 = arith.constant 0 : index
    %718 = vector.load %arg19[%c1_387, %c0_388, %c0_389] : memref<3x128x128xf32, #tpu.memory_space<vmem>>, vector<1x128x128xf32>
    %719 = vector.shape_cast %718 : vector<1x128x128xf32> to vector<128x128xf32>
    %cst_390 = arith.constant dense<0.000000e+00> : vector<8x128xf32>
    %720 = tpu.matmul %717, %719, %cst_390 {dimension_numbers = #tpu.dot_dimension_numbers<[1], [0], [0], [1], [0, 0, 1, 1], [], []>} : vector<8x128xf32>, vector<128x128xf32>, vector<8x128xf32> -> vector<8x128xf32>
    %721 = arith.addf %716, %720 : vector<8x128xf32>
    %cst_391 = arith.constant dense<0.000000e+00> : vector<8x128xf32>
    %722 = tpu.matmul %657, %196, %cst_391 {dimension_numbers = #tpu.dot_dimension_numbers<[1], [0], [0], [1], [0, 0, 1, 1], [], []>} : vector<8x8xf32>, vector<8x128xf32>, vector<8x128xf32> -> vector<8x128xf32>
    %c1_392 = arith.constant 1 : index
    %c0_393 = arith.constant 0 : index
    %c0_394 = arith.constant 0 : index
    %723 = vector.load %arg20[%c1_392, %c0_393, %c0_394] : memref<3x128x128xf32, #tpu.memory_space<vmem>>, vector<1x128x128xf32>
    %724 = vector.shape_cast %723 : vector<1x128x128xf32> to vector<128x128xf32>
    %cst_395 = arith.constant dense<0.000000e+00> : vector<8x128xf32>
    %725 = tpu.matmul %722, %724, %cst_395 {dimension_numbers = #tpu.dot_dimension_numbers<[1], [0], [0], [1], [0, 0, 1, 1], [], []>} : vector<8x128xf32>, vector<128x128xf32>, vector<8x128xf32> -> vector<8x128xf32>
    %726 = arith.addf %721, %725 : vector<8x128xf32>
    %cst_396 = arith.constant dense<0.000000e+00> : vector<8x128xf32>
    %727 = tpu.matmul %666, %639, %cst_396 {dimension_numbers = #tpu.dot_dimension_numbers<[1], [0], [0], [1], [0, 0, 1, 1], [], []>} : vector<8x8xf32>, vector<8x128xf32>, vector<8x128xf32> -> vector<8x128xf32>
    %c2_397 = arith.constant 2 : index
    %c0_398 = arith.constant 0 : index
    %c0_399 = arith.constant 0 : index
    %728 = vector.load %arg19[%c2_397, %c0_398, %c0_399] : memref<3x128x128xf32, #tpu.memory_space<vmem>>, vector<1x128x128xf32>
    %729 = vector.shape_cast %728 : vector<1x128x128xf32> to vector<128x128xf32>
    %cst_400 = arith.constant dense<0.000000e+00> : vector<8x128xf32>
    %730 = tpu.matmul %727, %729, %cst_400 {dimension_numbers = #tpu.dot_dimension_numbers<[1], [0], [0], [1], [0, 0, 1, 1], [], []>} : vector<8x128xf32>, vector<128x128xf32>, vector<8x128xf32> -> vector<8x128xf32>
    %731 = arith.addf %726, %730 : vector<8x128xf32>
    %cst_401 = arith.constant dense<0.000000e+00> : vector<8x128xf32>
    %732 = tpu.matmul %666, %196, %cst_401 {dimension_numbers = #tpu.dot_dimension_numbers<[1], [0], [0], [1], [0, 0, 1, 1], [], []>} : vector<8x8xf32>, vector<8x128xf32>, vector<8x128xf32> -> vector<8x128xf32>
    %c2_402 = arith.constant 2 : index
    %c0_403 = arith.constant 0 : index
    %c0_404 = arith.constant 0 : index
    %733 = vector.load %arg20[%c2_402, %c0_403, %c0_404] : memref<3x128x128xf32, #tpu.memory_space<vmem>>, vector<1x128x128xf32>
    %734 = vector.shape_cast %733 : vector<1x128x128xf32> to vector<128x128xf32>
    %cst_405 = arith.constant dense<0.000000e+00> : vector<8x128xf32>
    %735 = tpu.matmul %732, %734, %cst_405 {dimension_numbers = #tpu.dot_dimension_numbers<[1], [0], [0], [1], [0, 0, 1, 1], [], []>} : vector<8x128xf32>, vector<128x128xf32>, vector<8x128xf32> -> vector<8x128xf32>
    %736 = arith.addf %731, %735 : vector<8x128xf32>
    %cst_406 = arith.constant 0.000000e+00 : f32
    %737 = vector.broadcast %cst_406 : f32 to vector<8x128xf32>
    %738 = arith.maximumf %736, %737 : vector<8x128xf32>
    %739 = tpu.iota {dimensions = array<i32: 1>} : vector<8x8xi32>
    %740 = tpu.iota {dimensions = array<i32: 0>} : vector<8x8xi32>
    %c1_i32_407 = arith.constant 1 : i32
    %741 = vector.broadcast %c1_i32_407 : i32 to vector<8x8xi32>
    %742 = arith.muli %741, %740 : vector<8x8xi32>
    %c-1_i32_408 = arith.constant -1 : i32
    %743 = vector.broadcast %c-1_i32_408 : i32 to vector<8x8xi32>
    %744 = arith.addi %742, %743 : vector<8x8xi32>
    %745 = arith.cmpi eq, %739, %744 : vector<8x8xi32>
    %746 = arith.extui %745 : vector<8x8xi1> to vector<8x8xi32>
    %747 = arith.sitofp %746 : vector<8x8xi32> to vector<8x8xf32>
    %748 = tpu.iota {dimensions = array<i32: 1>} : vector<8x8xi32>
    %749 = tpu.iota {dimensions = array<i32: 0>} : vector<8x8xi32>
    %c1_i32_409 = arith.constant 1 : i32
    %750 = vector.broadcast %c1_i32_409 : i32 to vector<8x8xi32>
    %751 = arith.muli %750, %749 : vector<8x8xi32>
    %c0_i32_410 = arith.constant 0 : i32
    %752 = vector.broadcast %c0_i32_410 : i32 to vector<8x8xi32>
    %753 = arith.addi %751, %752 : vector<8x8xi32>
    %754 = arith.cmpi eq, %748, %753 : vector<8x8xi32>
    %755 = arith.extui %754 : vector<8x8xi1> to vector<8x8xi32>
    %756 = arith.sitofp %755 : vector<8x8xi32> to vector<8x8xf32>
    %757 = tpu.iota {dimensions = array<i32: 1>} : vector<8x8xi32>
    %758 = tpu.iota {dimensions = array<i32: 0>} : vector<8x8xi32>
    %c1_i32_411 = arith.constant 1 : i32
    %759 = vector.broadcast %c1_i32_411 : i32 to vector<8x8xi32>
    %760 = arith.muli %759, %758 : vector<8x8xi32>
    %c1_i32_412 = arith.constant 1 : i32
    %761 = vector.broadcast %c1_i32_412 : i32 to vector<8x8xi32>
    %762 = arith.addi %760, %761 : vector<8x8xi32>
    %763 = arith.cmpi eq, %757, %762 : vector<8x8xi32>
    %764 = arith.extui %763 : vector<8x8xi1> to vector<8x8xi32>
    %765 = arith.sitofp %764 : vector<8x8xi32> to vector<8x8xf32>
    %cst_413 = arith.constant 0.000000e+00 : f32
    %766 = vector.broadcast %cst_413 : f32 to vector<8x128xf32>
    %c0_414 = arith.constant 0 : index
    %c0_415 = arith.constant 0 : index
    %767 = vector.load %arg23[%c0_414, %c0_415] : memref<1x128xf32, #tpu.memory_space<vmem>>, vector<1x128xf32>
    %768 = vector.broadcast %767 : vector<1x128xf32> to vector<8x128xf32>
    %769 = arith.addf %766, %768 : vector<8x128xf32>
    %cst_416 = arith.constant dense<0.000000e+00> : vector<8x128xf32>
    %770 = tpu.matmul %747, %702, %cst_416 {dimension_numbers = #tpu.dot_dimension_numbers<[1], [0], [0], [1], [0, 0, 1, 1], [], []>} : vector<8x8xf32>, vector<8x128xf32>, vector<8x128xf32> -> vector<8x128xf32>
    %c0_417 = arith.constant 0 : index
    %c0_418 = arith.constant 0 : index
    %c0_419 = arith.constant 0 : index
    %771 = vector.load %arg22[%c0_417, %c0_418, %c0_419] : memref<3x128x128xf32, #tpu.memory_space<vmem>>, vector<1x128x128xf32>
    %772 = vector.shape_cast %771 : vector<1x128x128xf32> to vector<128x128xf32>
    %cst_420 = arith.constant dense<0.000000e+00> : vector<8x128xf32>
    %773 = tpu.matmul %770, %772, %cst_420 {dimension_numbers = #tpu.dot_dimension_numbers<[1], [0], [0], [1], [0, 0, 1, 1], [], []>} : vector<8x128xf32>, vector<128x128xf32>, vector<8x128xf32> -> vector<8x128xf32>
    %774 = arith.addf %769, %773 : vector<8x128xf32>
    %cst_421 = arith.constant dense<0.000000e+00> : vector<8x128xf32>
    %775 = tpu.matmul %756, %702, %cst_421 {dimension_numbers = #tpu.dot_dimension_numbers<[1], [0], [0], [1], [0, 0, 1, 1], [], []>} : vector<8x8xf32>, vector<8x128xf32>, vector<8x128xf32> -> vector<8x128xf32>
    %c1_422 = arith.constant 1 : index
    %c0_423 = arith.constant 0 : index
    %c0_424 = arith.constant 0 : index
    %776 = vector.load %arg22[%c1_422, %c0_423, %c0_424] : memref<3x128x128xf32, #tpu.memory_space<vmem>>, vector<1x128x128xf32>
    %777 = vector.shape_cast %776 : vector<1x128x128xf32> to vector<128x128xf32>
    %cst_425 = arith.constant dense<0.000000e+00> : vector<8x128xf32>
    %778 = tpu.matmul %775, %777, %cst_425 {dimension_numbers = #tpu.dot_dimension_numbers<[1], [0], [0], [1], [0, 0, 1, 1], [], []>} : vector<8x128xf32>, vector<128x128xf32>, vector<8x128xf32> -> vector<8x128xf32>
    %779 = arith.addf %774, %778 : vector<8x128xf32>
    %cst_426 = arith.constant dense<0.000000e+00> : vector<8x128xf32>
    %780 = tpu.matmul %765, %702, %cst_426 {dimension_numbers = #tpu.dot_dimension_numbers<[1], [0], [0], [1], [0, 0, 1, 1], [], []>} : vector<8x8xf32>, vector<8x128xf32>, vector<8x128xf32> -> vector<8x128xf32>
    %c2_427 = arith.constant 2 : index
    %c0_428 = arith.constant 0 : index
    %c0_429 = arith.constant 0 : index
    %781 = vector.load %arg22[%c2_427, %c0_428, %c0_429] : memref<3x128x128xf32, #tpu.memory_space<vmem>>, vector<1x128x128xf32>
    %782 = vector.shape_cast %781 : vector<1x128x128xf32> to vector<128x128xf32>
    %cst_430 = arith.constant dense<0.000000e+00> : vector<8x128xf32>
    %783 = tpu.matmul %780, %782, %cst_430 {dimension_numbers = #tpu.dot_dimension_numbers<[1], [0], [0], [1], [0, 0, 1, 1], [], []>} : vector<8x128xf32>, vector<128x128xf32>, vector<8x128xf32> -> vector<8x128xf32>
    %784 = arith.addf %779, %783 : vector<8x128xf32>
    %cst_431 = arith.constant 0.000000e+00 : f32
    %785 = vector.broadcast %cst_431 : f32 to vector<8x128xf32>
    %786 = arith.maximumf %784, %785 : vector<8x128xf32>
    %cst_432 = arith.constant 0.000000e+00 : f32
    %787 = vector.broadcast %cst_432 : f32 to vector<8x128xf32>
    %c0_433 = arith.constant 0 : index
    %c0_434 = arith.constant 0 : index
    %788 = vector.load %arg23[%c0_433, %c0_434] : memref<1x128xf32, #tpu.memory_space<vmem>>, vector<1x128xf32>
    %789 = vector.broadcast %788 : vector<1x128xf32> to vector<8x128xf32>
    %790 = arith.addf %787, %789 : vector<8x128xf32>
    %cst_435 = arith.constant dense<0.000000e+00> : vector<8x128xf32>
    %791 = tpu.matmul %747, %738, %cst_435 {dimension_numbers = #tpu.dot_dimension_numbers<[1], [0], [0], [1], [0, 0, 1, 1], [], []>} : vector<8x8xf32>, vector<8x128xf32>, vector<8x128xf32> -> vector<8x128xf32>
    %c0_436 = arith.constant 0 : index
    %c0_437 = arith.constant 0 : index
    %c0_438 = arith.constant 0 : index
    %792 = vector.load %arg22[%c0_436, %c0_437, %c0_438] : memref<3x128x128xf32, #tpu.memory_space<vmem>>, vector<1x128x128xf32>
    %793 = vector.shape_cast %792 : vector<1x128x128xf32> to vector<128x128xf32>
    %cst_439 = arith.constant dense<0.000000e+00> : vector<8x128xf32>
    %794 = tpu.matmul %791, %793, %cst_439 {dimension_numbers = #tpu.dot_dimension_numbers<[1], [0], [0], [1], [0, 0, 1, 1], [], []>} : vector<8x128xf32>, vector<128x128xf32>, vector<8x128xf32> -> vector<8x128xf32>
    %795 = arith.addf %790, %794 : vector<8x128xf32>
    %cst_440 = arith.constant dense<0.000000e+00> : vector<8x128xf32>
    %796 = tpu.matmul %756, %738, %cst_440 {dimension_numbers = #tpu.dot_dimension_numbers<[1], [0], [0], [1], [0, 0, 1, 1], [], []>} : vector<8x8xf32>, vector<8x128xf32>, vector<8x128xf32> -> vector<8x128xf32>
    %c1_441 = arith.constant 1 : index
    %c0_442 = arith.constant 0 : index
    %c0_443 = arith.constant 0 : index
    %797 = vector.load %arg22[%c1_441, %c0_442, %c0_443] : memref<3x128x128xf32, #tpu.memory_space<vmem>>, vector<1x128x128xf32>
    %798 = vector.shape_cast %797 : vector<1x128x128xf32> to vector<128x128xf32>
    %cst_444 = arith.constant dense<0.000000e+00> : vector<8x128xf32>
    %799 = tpu.matmul %796, %798, %cst_444 {dimension_numbers = #tpu.dot_dimension_numbers<[1], [0], [0], [1], [0, 0, 1, 1], [], []>} : vector<8x128xf32>, vector<128x128xf32>, vector<8x128xf32> -> vector<8x128xf32>
    %800 = arith.addf %795, %799 : vector<8x128xf32>
    %cst_445 = arith.constant dense<0.000000e+00> : vector<8x128xf32>
    %801 = tpu.matmul %765, %738, %cst_445 {dimension_numbers = #tpu.dot_dimension_numbers<[1], [0], [0], [1], [0, 0, 1, 1], [], []>} : vector<8x8xf32>, vector<8x128xf32>, vector<8x128xf32> -> vector<8x128xf32>
    %c2_446 = arith.constant 2 : index
    %c0_447 = arith.constant 0 : index
    %c0_448 = arith.constant 0 : index
    %802 = vector.load %arg22[%c2_446, %c0_447, %c0_448] : memref<3x128x128xf32, #tpu.memory_space<vmem>>, vector<1x128x128xf32>
    %803 = vector.shape_cast %802 : vector<1x128x128xf32> to vector<128x128xf32>
    %cst_449 = arith.constant dense<0.000000e+00> : vector<8x128xf32>
    %804 = tpu.matmul %801, %803, %cst_449 {dimension_numbers = #tpu.dot_dimension_numbers<[1], [0], [0], [1], [0, 0, 1, 1], [], []>} : vector<8x128xf32>, vector<128x128xf32>, vector<8x128xf32> -> vector<8x128xf32>
    %805 = arith.addf %800, %804 : vector<8x128xf32>
    %cst_450 = arith.constant 0.000000e+00 : f32
    %806 = vector.broadcast %cst_450 : f32 to vector<8x128xf32>
    %807 = arith.maximumf %805, %806 : vector<8x128xf32>
    %cst_451 = arith.constant 0.000000e+00 : f32
    %808 = vector.broadcast %cst_451 : f32 to vector<1x16xf32>
    %809 = vector.extract_strided_slice %786 {offsets = [0, 0], sizes = [8, 16], strides = [1, 1]} : vector<8x128xf32> to vector<8x16xf32>
    %cst_452 = arith.constant dense<0.000000e+00> : vector<16xf32>
    %810 = vector.multi_reduction <add>, %809, %cst_452 [0] : vector<8x16xf32> to vector<16xf32>
    %811 = vector.shape_cast %810 : vector<16xf32> to vector<1x16xf32>
    %812 = arith.addf %808, %811 : vector<1x16xf32>
    %813 = vector.extract_strided_slice %786 {offsets = [0, 16], sizes = [8, 16], strides = [1, 1]} : vector<8x128xf32> to vector<8x16xf32>
    %cst_453 = arith.constant dense<0.000000e+00> : vector<16xf32>
    %814 = vector.multi_reduction <add>, %813, %cst_453 [0] : vector<8x16xf32> to vector<16xf32>
    %815 = vector.shape_cast %814 : vector<16xf32> to vector<1x16xf32>
    %816 = arith.addf %812, %815 : vector<1x16xf32>
    %817 = vector.extract_strided_slice %786 {offsets = [0, 32], sizes = [8, 16], strides = [1, 1]} : vector<8x128xf32> to vector<8x16xf32>
    %cst_454 = arith.constant dense<0.000000e+00> : vector<16xf32>
    %818 = vector.multi_reduction <add>, %817, %cst_454 [0] : vector<8x16xf32> to vector<16xf32>
    %819 = vector.shape_cast %818 : vector<16xf32> to vector<1x16xf32>
    %820 = arith.addf %816, %819 : vector<1x16xf32>
    %821 = vector.extract_strided_slice %786 {offsets = [0, 48], sizes = [8, 16], strides = [1, 1]} : vector<8x128xf32> to vector<8x16xf32>
    %cst_455 = arith.constant dense<0.000000e+00> : vector<16xf32>
    %822 = vector.multi_reduction <add>, %821, %cst_455 [0] : vector<8x16xf32> to vector<16xf32>
    %823 = vector.shape_cast %822 : vector<16xf32> to vector<1x16xf32>
    %824 = arith.addf %820, %823 : vector<1x16xf32>
    %825 = vector.extract_strided_slice %786 {offsets = [0, 64], sizes = [8, 16], strides = [1, 1]} : vector<8x128xf32> to vector<8x16xf32>
    %cst_456 = arith.constant dense<0.000000e+00> : vector<16xf32>
    %826 = vector.multi_reduction <add>, %825, %cst_456 [0] : vector<8x16xf32> to vector<16xf32>
    %827 = vector.shape_cast %826 : vector<16xf32> to vector<1x16xf32>
    %828 = arith.addf %824, %827 : vector<1x16xf32>
    %829 = vector.extract_strided_slice %786 {offsets = [0, 80], sizes = [8, 16], strides = [1, 1]} : vector<8x128xf32> to vector<8x16xf32>
    %cst_457 = arith.constant dense<0.000000e+00> : vector<16xf32>
    %830 = vector.multi_reduction <add>, %829, %cst_457 [0] : vector<8x16xf32> to vector<16xf32>
    %831 = vector.shape_cast %830 : vector<16xf32> to vector<1x16xf32>
    %832 = arith.addf %828, %831 : vector<1x16xf32>
    %833 = vector.extract_strided_slice %786 {offsets = [0, 96], sizes = [8, 16], strides = [1, 1]} : vector<8x128xf32> to vector<8x16xf32>
    %cst_458 = arith.constant dense<0.000000e+00> : vector<16xf32>
    %834 = vector.multi_reduction <add>, %833, %cst_458 [0] : vector<8x16xf32> to vector<16xf32>
    %835 = vector.shape_cast %834 : vector<16xf32> to vector<1x16xf32>
    %836 = arith.addf %832, %835 : vector<1x16xf32>
    %837 = vector.extract_strided_slice %786 {offsets = [0, 112], sizes = [8, 16], strides = [1, 1]} : vector<8x128xf32> to vector<8x16xf32>
    %cst_459 = arith.constant dense<0.000000e+00> : vector<16xf32>
    %838 = vector.multi_reduction <add>, %837, %cst_459 [0] : vector<8x16xf32> to vector<16xf32>
    %839 = vector.shape_cast %838 : vector<16xf32> to vector<1x16xf32>
    %840 = arith.addf %836, %839 : vector<1x16xf32>
    %841 = vector.extract_strided_slice %807 {offsets = [0, 0], sizes = [8, 16], strides = [1, 1]} : vector<8x128xf32> to vector<8x16xf32>
    %cst_460 = arith.constant dense<0.000000e+00> : vector<16xf32>
    %842 = vector.multi_reduction <add>, %841, %cst_460 [0] : vector<8x16xf32> to vector<16xf32>
    %843 = vector.shape_cast %842 : vector<16xf32> to vector<1x16xf32>
    %844 = arith.addf %840, %843 : vector<1x16xf32>
    %845 = vector.extract_strided_slice %807 {offsets = [0, 16], sizes = [8, 16], strides = [1, 1]} : vector<8x128xf32> to vector<8x16xf32>
    %cst_461 = arith.constant dense<0.000000e+00> : vector<16xf32>
    %846 = vector.multi_reduction <add>, %845, %cst_461 [0] : vector<8x16xf32> to vector<16xf32>
    %847 = vector.shape_cast %846 : vector<16xf32> to vector<1x16xf32>
    %848 = arith.addf %844, %847 : vector<1x16xf32>
    %849 = vector.extract_strided_slice %807 {offsets = [0, 32], sizes = [8, 16], strides = [1, 1]} : vector<8x128xf32> to vector<8x16xf32>
    %cst_462 = arith.constant dense<0.000000e+00> : vector<16xf32>
    %850 = vector.multi_reduction <add>, %849, %cst_462 [0] : vector<8x16xf32> to vector<16xf32>
    %851 = vector.shape_cast %850 : vector<16xf32> to vector<1x16xf32>
    %852 = arith.addf %848, %851 : vector<1x16xf32>
    %853 = vector.extract_strided_slice %807 {offsets = [0, 48], sizes = [8, 16], strides = [1, 1]} : vector<8x128xf32> to vector<8x16xf32>
    %cst_463 = arith.constant dense<0.000000e+00> : vector<16xf32>
    %854 = vector.multi_reduction <add>, %853, %cst_463 [0] : vector<8x16xf32> to vector<16xf32>
    %855 = vector.shape_cast %854 : vector<16xf32> to vector<1x16xf32>
    %856 = arith.addf %852, %855 : vector<1x16xf32>
    %857 = vector.extract_strided_slice %807 {offsets = [0, 64], sizes = [8, 16], strides = [1, 1]} : vector<8x128xf32> to vector<8x16xf32>
    %cst_464 = arith.constant dense<0.000000e+00> : vector<16xf32>
    %858 = vector.multi_reduction <add>, %857, %cst_464 [0] : vector<8x16xf32> to vector<16xf32>
    %859 = vector.shape_cast %858 : vector<16xf32> to vector<1x16xf32>
    %860 = arith.addf %856, %859 : vector<1x16xf32>
    %861 = vector.extract_strided_slice %807 {offsets = [0, 80], sizes = [8, 16], strides = [1, 1]} : vector<8x128xf32> to vector<8x16xf32>
    %cst_465 = arith.constant dense<0.000000e+00> : vector<16xf32>
    %862 = vector.multi_reduction <add>, %861, %cst_465 [0] : vector<8x16xf32> to vector<16xf32>
    %863 = vector.shape_cast %862 : vector<16xf32> to vector<1x16xf32>
    %864 = arith.addf %860, %863 : vector<1x16xf32>
    %865 = vector.extract_strided_slice %807 {offsets = [0, 96], sizes = [8, 16], strides = [1, 1]} : vector<8x128xf32> to vector<8x16xf32>
    %cst_466 = arith.constant dense<0.000000e+00> : vector<16xf32>
    %866 = vector.multi_reduction <add>, %865, %cst_466 [0] : vector<8x16xf32> to vector<16xf32>
    %867 = vector.shape_cast %866 : vector<16xf32> to vector<1x16xf32>
    %868 = arith.addf %864, %867 : vector<1x16xf32>
    %869 = vector.extract_strided_slice %807 {offsets = [0, 112], sizes = [8, 16], strides = [1, 1]} : vector<8x128xf32> to vector<8x16xf32>
    %cst_467 = arith.constant dense<0.000000e+00> : vector<16xf32>
    %870 = vector.multi_reduction <add>, %869, %cst_467 [0] : vector<8x16xf32> to vector<16xf32>
    %871 = vector.shape_cast %870 : vector<16xf32> to vector<1x16xf32>
    %872 = arith.addf %868, %871 : vector<1x16xf32>
    %cst_468 = arith.constant 7.812500e-03 : f32
    %873 = vector.broadcast %cst_468 : f32 to vector<1x16xf32>
    %874 = arith.mulf %872, %873 : vector<1x16xf32>
    %875 = tpu.concatenate %874, %874, %874, %874, %874, %874, %874, %874 in 1 : vector<1x16xf32>, vector<1x16xf32>, vector<1x16xf32>, vector<1x16xf32>, vector<1x16xf32>, vector<1x16xf32>, vector<1x16xf32>, vector<1x16xf32> -> vector<1x128xf32>
    %cst_469 = arith.constant 0.000000e+00 : f32
    %876 = vector.broadcast %cst_469 : f32 to vector<1x16xf32>
    %877 = vector.broadcast %875 : vector<1x128xf32> to vector<8x128xf32>
    %878 = arith.subf %786, %877 : vector<8x128xf32>
    %879 = arith.mulf %878, %878 : vector<8x128xf32>
    %880 = vector.extract_strided_slice %879 {offsets = [0, 0], sizes = [8, 16], strides = [1, 1]} : vector<8x128xf32> to vector<8x16xf32>
    %cst_470 = arith.constant dense<0.000000e+00> : vector<16xf32>
    %881 = vector.multi_reduction <add>, %880, %cst_470 [0] : vector<8x16xf32> to vector<16xf32>
    %882 = vector.shape_cast %881 : vector<16xf32> to vector<1x16xf32>
    %883 = arith.addf %876, %882 : vector<1x16xf32>
    %884 = vector.extract_strided_slice %879 {offsets = [0, 16], sizes = [8, 16], strides = [1, 1]} : vector<8x128xf32> to vector<8x16xf32>
    %cst_471 = arith.constant dense<0.000000e+00> : vector<16xf32>
    %885 = vector.multi_reduction <add>, %884, %cst_471 [0] : vector<8x16xf32> to vector<16xf32>
    %886 = vector.shape_cast %885 : vector<16xf32> to vector<1x16xf32>
    %887 = arith.addf %883, %886 : vector<1x16xf32>
    %888 = vector.extract_strided_slice %879 {offsets = [0, 32], sizes = [8, 16], strides = [1, 1]} : vector<8x128xf32> to vector<8x16xf32>
    %cst_472 = arith.constant dense<0.000000e+00> : vector<16xf32>
    %889 = vector.multi_reduction <add>, %888, %cst_472 [0] : vector<8x16xf32> to vector<16xf32>
    %890 = vector.shape_cast %889 : vector<16xf32> to vector<1x16xf32>
    %891 = arith.addf %887, %890 : vector<1x16xf32>
    %892 = vector.extract_strided_slice %879 {offsets = [0, 48], sizes = [8, 16], strides = [1, 1]} : vector<8x128xf32> to vector<8x16xf32>
    %cst_473 = arith.constant dense<0.000000e+00> : vector<16xf32>
    %893 = vector.multi_reduction <add>, %892, %cst_473 [0] : vector<8x16xf32> to vector<16xf32>
    %894 = vector.shape_cast %893 : vector<16xf32> to vector<1x16xf32>
    %895 = arith.addf %891, %894 : vector<1x16xf32>
    %896 = vector.extract_strided_slice %879 {offsets = [0, 64], sizes = [8, 16], strides = [1, 1]} : vector<8x128xf32> to vector<8x16xf32>
    %cst_474 = arith.constant dense<0.000000e+00> : vector<16xf32>
    %897 = vector.multi_reduction <add>, %896, %cst_474 [0] : vector<8x16xf32> to vector<16xf32>
    %898 = vector.shape_cast %897 : vector<16xf32> to vector<1x16xf32>
    %899 = arith.addf %895, %898 : vector<1x16xf32>
    %900 = vector.extract_strided_slice %879 {offsets = [0, 80], sizes = [8, 16], strides = [1, 1]} : vector<8x128xf32> to vector<8x16xf32>
    %cst_475 = arith.constant dense<0.000000e+00> : vector<16xf32>
    %901 = vector.multi_reduction <add>, %900, %cst_475 [0] : vector<8x16xf32> to vector<16xf32>
    %902 = vector.shape_cast %901 : vector<16xf32> to vector<1x16xf32>
    %903 = arith.addf %899, %902 : vector<1x16xf32>
    %904 = vector.extract_strided_slice %879 {offsets = [0, 96], sizes = [8, 16], strides = [1, 1]} : vector<8x128xf32> to vector<8x16xf32>
    %cst_476 = arith.constant dense<0.000000e+00> : vector<16xf32>
    %905 = vector.multi_reduction <add>, %904, %cst_476 [0] : vector<8x16xf32> to vector<16xf32>
    %906 = vector.shape_cast %905 : vector<16xf32> to vector<1x16xf32>
    %907 = arith.addf %903, %906 : vector<1x16xf32>
    %908 = vector.extract_strided_slice %879 {offsets = [0, 112], sizes = [8, 16], strides = [1, 1]} : vector<8x128xf32> to vector<8x16xf32>
    %cst_477 = arith.constant dense<0.000000e+00> : vector<16xf32>
    %909 = vector.multi_reduction <add>, %908, %cst_477 [0] : vector<8x16xf32> to vector<16xf32>
    %910 = vector.shape_cast %909 : vector<16xf32> to vector<1x16xf32>
    %911 = arith.addf %907, %910 : vector<1x16xf32>
    %912 = vector.broadcast %875 : vector<1x128xf32> to vector<8x128xf32>
    %913 = arith.subf %807, %912 : vector<8x128xf32>
    %914 = arith.mulf %913, %913 : vector<8x128xf32>
    %915 = vector.extract_strided_slice %914 {offsets = [0, 0], sizes = [8, 16], strides = [1, 1]} : vector<8x128xf32> to vector<8x16xf32>
    %cst_478 = arith.constant dense<0.000000e+00> : vector<16xf32>
    %916 = vector.multi_reduction <add>, %915, %cst_478 [0] : vector<8x16xf32> to vector<16xf32>
    %917 = vector.shape_cast %916 : vector<16xf32> to vector<1x16xf32>
    %918 = arith.addf %911, %917 : vector<1x16xf32>
    %919 = vector.extract_strided_slice %914 {offsets = [0, 16], sizes = [8, 16], strides = [1, 1]} : vector<8x128xf32> to vector<8x16xf32>
    %cst_479 = arith.constant dense<0.000000e+00> : vector<16xf32>
    %920 = vector.multi_reduction <add>, %919, %cst_479 [0] : vector<8x16xf32> to vector<16xf32>
    %921 = vector.shape_cast %920 : vector<16xf32> to vector<1x16xf32>
    %922 = arith.addf %918, %921 : vector<1x16xf32>
    %923 = vector.extract_strided_slice %914 {offsets = [0, 32], sizes = [8, 16], strides = [1, 1]} : vector<8x128xf32> to vector<8x16xf32>
    %cst_480 = arith.constant dense<0.000000e+00> : vector<16xf32>
    %924 = vector.multi_reduction <add>, %923, %cst_480 [0] : vector<8x16xf32> to vector<16xf32>
    %925 = vector.shape_cast %924 : vector<16xf32> to vector<1x16xf32>
    %926 = arith.addf %922, %925 : vector<1x16xf32>
    %927 = vector.extract_strided_slice %914 {offsets = [0, 48], sizes = [8, 16], strides = [1, 1]} : vector<8x128xf32> to vector<8x16xf32>
    %cst_481 = arith.constant dense<0.000000e+00> : vector<16xf32>
    %928 = vector.multi_reduction <add>, %927, %cst_481 [0] : vector<8x16xf32> to vector<16xf32>
    %929 = vector.shape_cast %928 : vector<16xf32> to vector<1x16xf32>
    %930 = arith.addf %926, %929 : vector<1x16xf32>
    %931 = vector.extract_strided_slice %914 {offsets = [0, 64], sizes = [8, 16], strides = [1, 1]} : vector<8x128xf32> to vector<8x16xf32>
    %cst_482 = arith.constant dense<0.000000e+00> : vector<16xf32>
    %932 = vector.multi_reduction <add>, %931, %cst_482 [0] : vector<8x16xf32> to vector<16xf32>
    %933 = vector.shape_cast %932 : vector<16xf32> to vector<1x16xf32>
    %934 = arith.addf %930, %933 : vector<1x16xf32>
    %935 = vector.extract_strided_slice %914 {offsets = [0, 80], sizes = [8, 16], strides = [1, 1]} : vector<8x128xf32> to vector<8x16xf32>
    %cst_483 = arith.constant dense<0.000000e+00> : vector<16xf32>
    %936 = vector.multi_reduction <add>, %935, %cst_483 [0] : vector<8x16xf32> to vector<16xf32>
    %937 = vector.shape_cast %936 : vector<16xf32> to vector<1x16xf32>
    %938 = arith.addf %934, %937 : vector<1x16xf32>
    %939 = vector.extract_strided_slice %914 {offsets = [0, 96], sizes = [8, 16], strides = [1, 1]} : vector<8x128xf32> to vector<8x16xf32>
    %cst_484 = arith.constant dense<0.000000e+00> : vector<16xf32>
    %940 = vector.multi_reduction <add>, %939, %cst_484 [0] : vector<8x16xf32> to vector<16xf32>
    %941 = vector.shape_cast %940 : vector<16xf32> to vector<1x16xf32>
    %942 = arith.addf %938, %941 : vector<1x16xf32>
    %943 = vector.extract_strided_slice %914 {offsets = [0, 112], sizes = [8, 16], strides = [1, 1]} : vector<8x128xf32> to vector<8x16xf32>
    %cst_485 = arith.constant dense<0.000000e+00> : vector<16xf32>
    %944 = vector.multi_reduction <add>, %943, %cst_485 [0] : vector<8x16xf32> to vector<16xf32>
    %945 = vector.shape_cast %944 : vector<16xf32> to vector<1x16xf32>
    %946 = arith.addf %942, %945 : vector<1x16xf32>
    %cst_486 = arith.constant 7.812500e-03 : f32
    %947 = vector.broadcast %cst_486 : f32 to vector<1x16xf32>
    %948 = arith.mulf %946, %947 : vector<1x16xf32>
    %c0_487 = arith.constant 0 : index
    %c0_488 = arith.constant 0 : index
    %949 = vector.load %arg24[%c0_487, %c0_488] : memref<1x16xf32, #tpu.memory_space<vmem>>, vector<1x16xf32>
    %cst_489 = arith.constant 9.99999974E-6 : f32
    %950 = vector.broadcast %cst_489 : f32 to vector<1x16xf32>
    %951 = arith.addf %948, %950 : vector<1x16xf32>
    %952 = math.rsqrt %951 : vector<1x16xf32>
    %953 = arith.mulf %949, %952 : vector<1x16xf32>
    %c0_490 = arith.constant 0 : index
    %c0_491 = arith.constant 0 : index
    %954 = vector.load %arg25[%c0_490, %c0_491] : memref<1x16xf32, #tpu.memory_space<vmem>>, vector<1x16xf32>
    %955 = arith.mulf %874, %953 : vector<1x16xf32>
    %956 = arith.subf %954, %955 : vector<1x16xf32>
    %957 = tpu.concatenate %953, %953, %953, %953, %953, %953, %953, %953 in 1 : vector<1x16xf32>, vector<1x16xf32>, vector<1x16xf32>, vector<1x16xf32>, vector<1x16xf32>, vector<1x16xf32>, vector<1x16xf32>, vector<1x16xf32> -> vector<1x128xf32>
    %958 = tpu.concatenate %956, %956, %956, %956, %956, %956, %956, %956 in 1 : vector<1x16xf32>, vector<1x16xf32>, vector<1x16xf32>, vector<1x16xf32>, vector<1x16xf32>, vector<1x16xf32>, vector<1x16xf32>, vector<1x16xf32> -> vector<1x128xf32>
    %959 = vector.broadcast %957 : vector<1x128xf32> to vector<8x128xf32>
    %960 = arith.mulf %786, %959 : vector<8x128xf32>
    %961 = vector.broadcast %958 : vector<1x128xf32> to vector<8x128xf32>
    %962 = arith.addf %960, %961 : vector<8x128xf32>
    %963 = vector.broadcast %957 : vector<1x128xf32> to vector<8x128xf32>
    %964 = arith.mulf %807, %963 : vector<8x128xf32>
    %965 = vector.broadcast %958 : vector<1x128xf32> to vector<8x128xf32>
    %966 = arith.addf %964, %965 : vector<8x128xf32>
    %967 = tpu.iota {dimensions = array<i32: 0>} : vector<16x8xi32>
    %968 = tpu.iota {dimensions = array<i32: 1>} : vector<16x8xi32>
    %c2_i32_492 = arith.constant 2 : i32
    %969 = vector.broadcast %c2_i32_492 : i32 to vector<16x8xi32>
    %970 = arith.muli %969, %968 : vector<16x8xi32>
    %c0_i32_493 = arith.constant 0 : i32
    %971 = vector.broadcast %c0_i32_493 : i32 to vector<16x8xi32>
    %972 = arith.addi %970, %971 : vector<16x8xi32>
    %973 = arith.cmpi eq, %967, %972 : vector<16x8xi32>
    %974 = arith.extui %973 : vector<16x8xi1> to vector<16x8xi32>
    %975 = arith.sitofp %974 : vector<16x8xi32> to vector<16x8xf32>
    %976 = tpu.iota {dimensions = array<i32: 0>} : vector<16x8xi32>
    %977 = tpu.iota {dimensions = array<i32: 1>} : vector<16x8xi32>
    %c2_i32_494 = arith.constant 2 : i32
    %978 = vector.broadcast %c2_i32_494 : i32 to vector<16x8xi32>
    %979 = arith.muli %978, %977 : vector<16x8xi32>
    %c1_i32_495 = arith.constant 1 : i32
    %980 = vector.broadcast %c1_i32_495 : i32 to vector<16x8xi32>
    %981 = arith.addi %979, %980 : vector<16x8xi32>
    %982 = arith.cmpi eq, %976, %981 : vector<16x8xi32>
    %983 = arith.extui %982 : vector<16x8xi1> to vector<16x8xi32>
    %984 = arith.sitofp %983 : vector<16x8xi32> to vector<16x8xf32>
    %cst_496 = arith.constant 0.000000e+00 : f32
    %985 = vector.broadcast %cst_496 : f32 to vector<16x128xf32>
    %c0_497 = arith.constant 0 : index
    %c0_498 = arith.constant 0 : index
    %986 = vector.load %arg27[%c0_497, %c0_498] : memref<1x128xf32, #tpu.memory_space<vmem>>, vector<1x128xf32>
    %987 = vector.broadcast %986 : vector<1x128xf32> to vector<16x128xf32>
    %988 = arith.addf %985, %987 : vector<16x128xf32>
    %c0_499 = arith.constant 0 : index
    %c0_500 = arith.constant 0 : index
    %c0_501 = arith.constant 0 : index
    %989 = vector.load %arg26[%c0_499, %c0_500, %c0_501] : memref<2x128x128xf32, #tpu.memory_space<vmem>>, vector<1x128x128xf32>
    %990 = vector.shape_cast %989 : vector<1x128x128xf32> to vector<128x128xf32>
    %cst_502 = arith.constant dense<0.000000e+00> : vector<8x128xf32>
    %991 = tpu.matmul %962, %990, %cst_502 {dimension_numbers = #tpu.dot_dimension_numbers<[1], [0], [0], [1], [0, 0, 1, 1], [], []>} : vector<8x128xf32>, vector<128x128xf32>, vector<8x128xf32> -> vector<8x128xf32>
    %cst_503 = arith.constant dense<0.000000e+00> : vector<16x128xf32>
    %992 = tpu.matmul %975, %991, %cst_503 {dimension_numbers = #tpu.dot_dimension_numbers<[1], [0], [0], [1], [0, 0, 1, 1], [], []>} : vector<16x8xf32>, vector<8x128xf32>, vector<16x128xf32> -> vector<16x128xf32>
    %993 = arith.addf %988, %992 : vector<16x128xf32>
    %c1_504 = arith.constant 1 : index
    %c0_505 = arith.constant 0 : index
    %c0_506 = arith.constant 0 : index
    %994 = vector.load %arg26[%c1_504, %c0_505, %c0_506] : memref<2x128x128xf32, #tpu.memory_space<vmem>>, vector<1x128x128xf32>
    %995 = vector.shape_cast %994 : vector<1x128x128xf32> to vector<128x128xf32>
    %cst_507 = arith.constant dense<0.000000e+00> : vector<8x128xf32>
    %996 = tpu.matmul %962, %995, %cst_507 {dimension_numbers = #tpu.dot_dimension_numbers<[1], [0], [0], [1], [0, 0, 1, 1], [], []>} : vector<8x128xf32>, vector<128x128xf32>, vector<8x128xf32> -> vector<8x128xf32>
    %cst_508 = arith.constant dense<0.000000e+00> : vector<16x128xf32>
    %997 = tpu.matmul %984, %996, %cst_508 {dimension_numbers = #tpu.dot_dimension_numbers<[1], [0], [0], [1], [0, 0, 1, 1], [], []>} : vector<16x8xf32>, vector<8x128xf32>, vector<16x128xf32> -> vector<16x128xf32>
    %998 = arith.addf %993, %997 : vector<16x128xf32>
    %cst_509 = arith.constant 0.000000e+00 : f32
    %999 = vector.broadcast %cst_509 : f32 to vector<16x128xf32>
    %c0_510 = arith.constant 0 : index
    %c0_511 = arith.constant 0 : index
    %1000 = vector.load %arg27[%c0_510, %c0_511] : memref<1x128xf32, #tpu.memory_space<vmem>>, vector<1x128xf32>
    %1001 = vector.broadcast %1000 : vector<1x128xf32> to vector<16x128xf32>
    %1002 = arith.addf %999, %1001 : vector<16x128xf32>
    %c0_512 = arith.constant 0 : index
    %c0_513 = arith.constant 0 : index
    %c0_514 = arith.constant 0 : index
    %1003 = vector.load %arg26[%c0_512, %c0_513, %c0_514] : memref<2x128x128xf32, #tpu.memory_space<vmem>>, vector<1x128x128xf32>
    %1004 = vector.shape_cast %1003 : vector<1x128x128xf32> to vector<128x128xf32>
    %cst_515 = arith.constant dense<0.000000e+00> : vector<8x128xf32>
    %1005 = tpu.matmul %966, %1004, %cst_515 {dimension_numbers = #tpu.dot_dimension_numbers<[1], [0], [0], [1], [0, 0, 1, 1], [], []>} : vector<8x128xf32>, vector<128x128xf32>, vector<8x128xf32> -> vector<8x128xf32>
    %cst_516 = arith.constant dense<0.000000e+00> : vector<16x128xf32>
    %1006 = tpu.matmul %975, %1005, %cst_516 {dimension_numbers = #tpu.dot_dimension_numbers<[1], [0], [0], [1], [0, 0, 1, 1], [], []>} : vector<16x8xf32>, vector<8x128xf32>, vector<16x128xf32> -> vector<16x128xf32>
    %1007 = arith.addf %1002, %1006 : vector<16x128xf32>
    %c1_517 = arith.constant 1 : index
    %c0_518 = arith.constant 0 : index
    %c0_519 = arith.constant 0 : index
    %1008 = vector.load %arg26[%c1_517, %c0_518, %c0_519] : memref<2x128x128xf32, #tpu.memory_space<vmem>>, vector<1x128x128xf32>
    %1009 = vector.shape_cast %1008 : vector<1x128x128xf32> to vector<128x128xf32>
    %cst_520 = arith.constant dense<0.000000e+00> : vector<8x128xf32>
    %1010 = tpu.matmul %966, %1009, %cst_520 {dimension_numbers = #tpu.dot_dimension_numbers<[1], [0], [0], [1], [0, 0, 1, 1], [], []>} : vector<8x128xf32>, vector<128x128xf32>, vector<8x128xf32> -> vector<8x128xf32>
    %cst_521 = arith.constant dense<0.000000e+00> : vector<16x128xf32>
    %1011 = tpu.matmul %984, %1010, %cst_521 {dimension_numbers = #tpu.dot_dimension_numbers<[1], [0], [0], [1], [0, 0, 1, 1], [], []>} : vector<16x8xf32>, vector<8x128xf32>, vector<16x128xf32> -> vector<16x128xf32>
    %1012 = arith.addf %1007, %1011 : vector<16x128xf32>
    %1013 = tpu.iota {dimensions = array<i32: 1>} : vector<16x16xi32>
    %1014 = tpu.iota {dimensions = array<i32: 0>} : vector<16x16xi32>
    %c1_i32_522 = arith.constant 1 : i32
    %1015 = vector.broadcast %c1_i32_522 : i32 to vector<16x16xi32>
    %1016 = arith.muli %1015, %1014 : vector<16x16xi32>
    %c-1_i32_523 = arith.constant -1 : i32
    %1017 = vector.broadcast %c-1_i32_523 : i32 to vector<16x16xi32>
    %1018 = arith.addi %1016, %1017 : vector<16x16xi32>
    %1019 = arith.cmpi eq, %1013, %1018 : vector<16x16xi32>
    %1020 = arith.extui %1019 : vector<16x16xi1> to vector<16x16xi32>
    %1021 = arith.sitofp %1020 : vector<16x16xi32> to vector<16x16xf32>
    %1022 = tpu.iota {dimensions = array<i32: 1>} : vector<16x16xi32>
    %1023 = tpu.iota {dimensions = array<i32: 0>} : vector<16x16xi32>
    %c1_i32_524 = arith.constant 1 : i32
    %1024 = vector.broadcast %c1_i32_524 : i32 to vector<16x16xi32>
    %1025 = arith.muli %1024, %1023 : vector<16x16xi32>
    %c0_i32_525 = arith.constant 0 : i32
    %1026 = vector.broadcast %c0_i32_525 : i32 to vector<16x16xi32>
    %1027 = arith.addi %1025, %1026 : vector<16x16xi32>
    %1028 = arith.cmpi eq, %1022, %1027 : vector<16x16xi32>
    %1029 = arith.extui %1028 : vector<16x16xi1> to vector<16x16xi32>
    %1030 = arith.sitofp %1029 : vector<16x16xi32> to vector<16x16xf32>
    %1031 = tpu.iota {dimensions = array<i32: 1>} : vector<16x16xi32>
    %1032 = tpu.iota {dimensions = array<i32: 0>} : vector<16x16xi32>
    %c1_i32_526 = arith.constant 1 : i32
    %1033 = vector.broadcast %c1_i32_526 : i32 to vector<16x16xi32>
    %1034 = arith.muli %1033, %1032 : vector<16x16xi32>
    %c1_i32_527 = arith.constant 1 : i32
    %1035 = vector.broadcast %c1_i32_527 : i32 to vector<16x16xi32>
    %1036 = arith.addi %1034, %1035 : vector<16x16xi32>
    %1037 = arith.cmpi eq, %1031, %1036 : vector<16x16xi32>
    %1038 = arith.extui %1037 : vector<16x16xi1> to vector<16x16xi32>
    %1039 = arith.sitofp %1038 : vector<16x16xi32> to vector<16x16xf32>
    %cst_528 = arith.constant 0.000000e+00 : f32
    %1040 = vector.broadcast %cst_528 : f32 to vector<16x128xf32>
    %c0_529 = arith.constant 0 : index
    %c0_530 = arith.constant 0 : index
    %1041 = vector.load %arg30[%c0_529, %c0_530] : memref<1x128xf32, #tpu.memory_space<vmem>>, vector<1x128xf32>
    %1042 = vector.broadcast %1041 : vector<1x128xf32> to vector<16x128xf32>
    %1043 = arith.addf %1040, %1042 : vector<16x128xf32>
    %cst_531 = arith.constant dense<0.000000e+00> : vector<16x128xf32>
    %1044 = tpu.matmul %1021, %998, %cst_531 {dimension_numbers = #tpu.dot_dimension_numbers<[1], [0], [0], [1], [0, 0, 1, 1], [], []>} : vector<16x16xf32>, vector<16x128xf32>, vector<16x128xf32> -> vector<16x128xf32>
    %c0_532 = arith.constant 0 : index
    %c0_533 = arith.constant 0 : index
    %c0_534 = arith.constant 0 : index
    %1045 = vector.load %arg28[%c0_532, %c0_533, %c0_534] : memref<3x128x128xf32, #tpu.memory_space<vmem>>, vector<1x128x128xf32>
    %1046 = vector.shape_cast %1045 : vector<1x128x128xf32> to vector<128x128xf32>
    %cst_535 = arith.constant dense<0.000000e+00> : vector<16x128xf32>
    %1047 = tpu.matmul %1044, %1046, %cst_535 {dimension_numbers = #tpu.dot_dimension_numbers<[1], [0], [0], [1], [0, 0, 1, 1], [], []>} : vector<16x128xf32>, vector<128x128xf32>, vector<16x128xf32> -> vector<16x128xf32>
    %1048 = arith.addf %1043, %1047 : vector<16x128xf32>
    %cst_536 = arith.constant dense<0.000000e+00> : vector<16x128xf32>
    %1049 = tpu.matmul %1021, %112, %cst_536 {dimension_numbers = #tpu.dot_dimension_numbers<[1], [0], [0], [1], [0, 0, 1, 1], [], []>} : vector<16x16xf32>, vector<16x128xf32>, vector<16x128xf32> -> vector<16x128xf32>
    %c0_537 = arith.constant 0 : index
    %c0_538 = arith.constant 0 : index
    %c0_539 = arith.constant 0 : index
    %1050 = vector.load %arg29[%c0_537, %c0_538, %c0_539] : memref<3x128x128xf32, #tpu.memory_space<vmem>>, vector<1x128x128xf32>
    %1051 = vector.shape_cast %1050 : vector<1x128x128xf32> to vector<128x128xf32>
    %cst_540 = arith.constant dense<0.000000e+00> : vector<16x128xf32>
    %1052 = tpu.matmul %1049, %1051, %cst_540 {dimension_numbers = #tpu.dot_dimension_numbers<[1], [0], [0], [1], [0, 0, 1, 1], [], []>} : vector<16x128xf32>, vector<128x128xf32>, vector<16x128xf32> -> vector<16x128xf32>
    %1053 = arith.addf %1048, %1052 : vector<16x128xf32>
    %cst_541 = arith.constant dense<0.000000e+00> : vector<16x128xf32>
    %1054 = tpu.matmul %1030, %998, %cst_541 {dimension_numbers = #tpu.dot_dimension_numbers<[1], [0], [0], [1], [0, 0, 1, 1], [], []>} : vector<16x16xf32>, vector<16x128xf32>, vector<16x128xf32> -> vector<16x128xf32>
    %c1_542 = arith.constant 1 : index
    %c0_543 = arith.constant 0 : index
    %c0_544 = arith.constant 0 : index
    %1055 = vector.load %arg28[%c1_542, %c0_543, %c0_544] : memref<3x128x128xf32, #tpu.memory_space<vmem>>, vector<1x128x128xf32>
    %1056 = vector.shape_cast %1055 : vector<1x128x128xf32> to vector<128x128xf32>
    %cst_545 = arith.constant dense<0.000000e+00> : vector<16x128xf32>
    %1057 = tpu.matmul %1054, %1056, %cst_545 {dimension_numbers = #tpu.dot_dimension_numbers<[1], [0], [0], [1], [0, 0, 1, 1], [], []>} : vector<16x128xf32>, vector<128x128xf32>, vector<16x128xf32> -> vector<16x128xf32>
    %1058 = arith.addf %1053, %1057 : vector<16x128xf32>
    %cst_546 = arith.constant dense<0.000000e+00> : vector<16x128xf32>
    %1059 = tpu.matmul %1030, %112, %cst_546 {dimension_numbers = #tpu.dot_dimension_numbers<[1], [0], [0], [1], [0, 0, 1, 1], [], []>} : vector<16x16xf32>, vector<16x128xf32>, vector<16x128xf32> -> vector<16x128xf32>
    %c1_547 = arith.constant 1 : index
    %c0_548 = arith.constant 0 : index
    %c0_549 = arith.constant 0 : index
    %1060 = vector.load %arg29[%c1_547, %c0_548, %c0_549] : memref<3x128x128xf32, #tpu.memory_space<vmem>>, vector<1x128x128xf32>
    %1061 = vector.shape_cast %1060 : vector<1x128x128xf32> to vector<128x128xf32>
    %cst_550 = arith.constant dense<0.000000e+00> : vector<16x128xf32>
    %1062 = tpu.matmul %1059, %1061, %cst_550 {dimension_numbers = #tpu.dot_dimension_numbers<[1], [0], [0], [1], [0, 0, 1, 1], [], []>} : vector<16x128xf32>, vector<128x128xf32>, vector<16x128xf32> -> vector<16x128xf32>
    %1063 = arith.addf %1058, %1062 : vector<16x128xf32>
    %cst_551 = arith.constant dense<0.000000e+00> : vector<16x128xf32>
    %1064 = tpu.matmul %1039, %998, %cst_551 {dimension_numbers = #tpu.dot_dimension_numbers<[1], [0], [0], [1], [0, 0, 1, 1], [], []>} : vector<16x16xf32>, vector<16x128xf32>, vector<16x128xf32> -> vector<16x128xf32>
    %c2_552 = arith.constant 2 : index
    %c0_553 = arith.constant 0 : index
    %c0_554 = arith.constant 0 : index
    %1065 = vector.load %arg28[%c2_552, %c0_553, %c0_554] : memref<3x128x128xf32, #tpu.memory_space<vmem>>, vector<1x128x128xf32>
    %1066 = vector.shape_cast %1065 : vector<1x128x128xf32> to vector<128x128xf32>
    %cst_555 = arith.constant dense<0.000000e+00> : vector<16x128xf32>
    %1067 = tpu.matmul %1064, %1066, %cst_555 {dimension_numbers = #tpu.dot_dimension_numbers<[1], [0], [0], [1], [0, 0, 1, 1], [], []>} : vector<16x128xf32>, vector<128x128xf32>, vector<16x128xf32> -> vector<16x128xf32>
    %1068 = arith.addf %1063, %1067 : vector<16x128xf32>
    %cst_556 = arith.constant dense<0.000000e+00> : vector<16x128xf32>
    %1069 = tpu.matmul %1039, %112, %cst_556 {dimension_numbers = #tpu.dot_dimension_numbers<[1], [0], [0], [1], [0, 0, 1, 1], [], []>} : vector<16x16xf32>, vector<16x128xf32>, vector<16x128xf32> -> vector<16x128xf32>
    %c2_557 = arith.constant 2 : index
    %c0_558 = arith.constant 0 : index
    %c0_559 = arith.constant 0 : index
    %1070 = vector.load %arg29[%c2_557, %c0_558, %c0_559] : memref<3x128x128xf32, #tpu.memory_space<vmem>>, vector<1x128x128xf32>
    %1071 = vector.shape_cast %1070 : vector<1x128x128xf32> to vector<128x128xf32>
    %cst_560 = arith.constant dense<0.000000e+00> : vector<16x128xf32>
    %1072 = tpu.matmul %1069, %1071, %cst_560 {dimension_numbers = #tpu.dot_dimension_numbers<[1], [0], [0], [1], [0, 0, 1, 1], [], []>} : vector<16x128xf32>, vector<128x128xf32>, vector<16x128xf32> -> vector<16x128xf32>
    %1073 = arith.addf %1068, %1072 : vector<16x128xf32>
    %cst_561 = arith.constant 0.000000e+00 : f32
    %1074 = vector.broadcast %cst_561 : f32 to vector<16x128xf32>
    %1075 = arith.maximumf %1073, %1074 : vector<16x128xf32>
    %cst_562 = arith.constant 0.000000e+00 : f32
    %1076 = vector.broadcast %cst_562 : f32 to vector<16x128xf32>
    %c0_563 = arith.constant 0 : index
    %c0_564 = arith.constant 0 : index
    %1077 = vector.load %arg30[%c0_563, %c0_564] : memref<1x128xf32, #tpu.memory_space<vmem>>, vector<1x128xf32>
    %1078 = vector.broadcast %1077 : vector<1x128xf32> to vector<16x128xf32>
    %1079 = arith.addf %1076, %1078 : vector<16x128xf32>
    %cst_565 = arith.constant dense<0.000000e+00> : vector<16x128xf32>
    %1080 = tpu.matmul %1021, %1012, %cst_565 {dimension_numbers = #tpu.dot_dimension_numbers<[1], [0], [0], [1], [0, 0, 1, 1], [], []>} : vector<16x16xf32>, vector<16x128xf32>, vector<16x128xf32> -> vector<16x128xf32>
    %c0_566 = arith.constant 0 : index
    %c0_567 = arith.constant 0 : index
    %c0_568 = arith.constant 0 : index
    %1081 = vector.load %arg28[%c0_566, %c0_567, %c0_568] : memref<3x128x128xf32, #tpu.memory_space<vmem>>, vector<1x128x128xf32>
    %1082 = vector.shape_cast %1081 : vector<1x128x128xf32> to vector<128x128xf32>
    %cst_569 = arith.constant dense<0.000000e+00> : vector<16x128xf32>
    %1083 = tpu.matmul %1080, %1082, %cst_569 {dimension_numbers = #tpu.dot_dimension_numbers<[1], [0], [0], [1], [0, 0, 1, 1], [], []>} : vector<16x128xf32>, vector<128x128xf32>, vector<16x128xf32> -> vector<16x128xf32>
    %1084 = arith.addf %1079, %1083 : vector<16x128xf32>
    %cst_570 = arith.constant dense<0.000000e+00> : vector<16x128xf32>
    %1085 = tpu.matmul %1021, %131, %cst_570 {dimension_numbers = #tpu.dot_dimension_numbers<[1], [0], [0], [1], [0, 0, 1, 1], [], []>} : vector<16x16xf32>, vector<16x128xf32>, vector<16x128xf32> -> vector<16x128xf32>
    %c0_571 = arith.constant 0 : index
    %c0_572 = arith.constant 0 : index
    %c0_573 = arith.constant 0 : index
    %1086 = vector.load %arg29[%c0_571, %c0_572, %c0_573] : memref<3x128x128xf32, #tpu.memory_space<vmem>>, vector<1x128x128xf32>
    %1087 = vector.shape_cast %1086 : vector<1x128x128xf32> to vector<128x128xf32>
    %cst_574 = arith.constant dense<0.000000e+00> : vector<16x128xf32>
    %1088 = tpu.matmul %1085, %1087, %cst_574 {dimension_numbers = #tpu.dot_dimension_numbers<[1], [0], [0], [1], [0, 0, 1, 1], [], []>} : vector<16x128xf32>, vector<128x128xf32>, vector<16x128xf32> -> vector<16x128xf32>
    %1089 = arith.addf %1084, %1088 : vector<16x128xf32>
    %cst_575 = arith.constant dense<0.000000e+00> : vector<16x128xf32>
    %1090 = tpu.matmul %1030, %1012, %cst_575 {dimension_numbers = #tpu.dot_dimension_numbers<[1], [0], [0], [1], [0, 0, 1, 1], [], []>} : vector<16x16xf32>, vector<16x128xf32>, vector<16x128xf32> -> vector<16x128xf32>
    %c1_576 = arith.constant 1 : index
    %c0_577 = arith.constant 0 : index
    %c0_578 = arith.constant 0 : index
    %1091 = vector.load %arg28[%c1_576, %c0_577, %c0_578] : memref<3x128x128xf32, #tpu.memory_space<vmem>>, vector<1x128x128xf32>
    %1092 = vector.shape_cast %1091 : vector<1x128x128xf32> to vector<128x128xf32>
    %cst_579 = arith.constant dense<0.000000e+00> : vector<16x128xf32>
    %1093 = tpu.matmul %1090, %1092, %cst_579 {dimension_numbers = #tpu.dot_dimension_numbers<[1], [0], [0], [1], [0, 0, 1, 1], [], []>} : vector<16x128xf32>, vector<128x128xf32>, vector<16x128xf32> -> vector<16x128xf32>
    %1094 = arith.addf %1089, %1093 : vector<16x128xf32>
    %cst_580 = arith.constant dense<0.000000e+00> : vector<16x128xf32>
    %1095 = tpu.matmul %1030, %131, %cst_580 {dimension_numbers = #tpu.dot_dimension_numbers<[1], [0], [0], [1], [0, 0, 1, 1], [], []>} : vector<16x16xf32>, vector<16x128xf32>, vector<16x128xf32> -> vector<16x128xf32>
    %c1_581 = arith.constant 1 : index
    %c0_582 = arith.constant 0 : index
    %c0_583 = arith.constant 0 : index
    %1096 = vector.load %arg29[%c1_581, %c0_582, %c0_583] : memref<3x128x128xf32, #tpu.memory_space<vmem>>, vector<1x128x128xf32>
    %1097 = vector.shape_cast %1096 : vector<1x128x128xf32> to vector<128x128xf32>
    %cst_584 = arith.constant dense<0.000000e+00> : vector<16x128xf32>
    %1098 = tpu.matmul %1095, %1097, %cst_584 {dimension_numbers = #tpu.dot_dimension_numbers<[1], [0], [0], [1], [0, 0, 1, 1], [], []>} : vector<16x128xf32>, vector<128x128xf32>, vector<16x128xf32> -> vector<16x128xf32>
    %1099 = arith.addf %1094, %1098 : vector<16x128xf32>
    %cst_585 = arith.constant dense<0.000000e+00> : vector<16x128xf32>
    %1100 = tpu.matmul %1039, %1012, %cst_585 {dimension_numbers = #tpu.dot_dimension_numbers<[1], [0], [0], [1], [0, 0, 1, 1], [], []>} : vector<16x16xf32>, vector<16x128xf32>, vector<16x128xf32> -> vector<16x128xf32>
    %c2_586 = arith.constant 2 : index
    %c0_587 = arith.constant 0 : index
    %c0_588 = arith.constant 0 : index
    %1101 = vector.load %arg28[%c2_586, %c0_587, %c0_588] : memref<3x128x128xf32, #tpu.memory_space<vmem>>, vector<1x128x128xf32>
    %1102 = vector.shape_cast %1101 : vector<1x128x128xf32> to vector<128x128xf32>
    %cst_589 = arith.constant dense<0.000000e+00> : vector<16x128xf32>
    %1103 = tpu.matmul %1100, %1102, %cst_589 {dimension_numbers = #tpu.dot_dimension_numbers<[1], [0], [0], [1], [0, 0, 1, 1], [], []>} : vector<16x128xf32>, vector<128x128xf32>, vector<16x128xf32> -> vector<16x128xf32>
    %1104 = arith.addf %1099, %1103 : vector<16x128xf32>
    %cst_590 = arith.constant dense<0.000000e+00> : vector<16x128xf32>
    %1105 = tpu.matmul %1039, %131, %cst_590 {dimension_numbers = #tpu.dot_dimension_numbers<[1], [0], [0], [1], [0, 0, 1, 1], [], []>} : vector<16x16xf32>, vector<16x128xf32>, vector<16x128xf32> -> vector<16x128xf32>
    %c2_591 = arith.constant 2 : index
    %c0_592 = arith.constant 0 : index
    %c0_593 = arith.constant 0 : index
    %1106 = vector.load %arg29[%c2_591, %c0_592, %c0_593] : memref<3x128x128xf32, #tpu.memory_space<vmem>>, vector<1x128x128xf32>
    %1107 = vector.shape_cast %1106 : vector<1x128x128xf32> to vector<128x128xf32>
    %cst_594 = arith.constant dense<0.000000e+00> : vector<16x128xf32>
    %1108 = tpu.matmul %1105, %1107, %cst_594 {dimension_numbers = #tpu.dot_dimension_numbers<[1], [0], [0], [1], [0, 0, 1, 1], [], []>} : vector<16x128xf32>, vector<128x128xf32>, vector<16x128xf32> -> vector<16x128xf32>
    %1109 = arith.addf %1104, %1108 : vector<16x128xf32>
    %cst_595 = arith.constant 0.000000e+00 : f32
    %1110 = vector.broadcast %cst_595 : f32 to vector<16x128xf32>
    %1111 = arith.maximumf %1109, %1110 : vector<16x128xf32>
    %1112 = tpu.iota {dimensions = array<i32: 1>} : vector<16x16xi32>
    %1113 = tpu.iota {dimensions = array<i32: 0>} : vector<16x16xi32>
    %c1_i32_596 = arith.constant 1 : i32
    %1114 = vector.broadcast %c1_i32_596 : i32 to vector<16x16xi32>
    %1115 = arith.muli %1114, %1113 : vector<16x16xi32>
    %c-1_i32_597 = arith.constant -1 : i32
    %1116 = vector.broadcast %c-1_i32_597 : i32 to vector<16x16xi32>
    %1117 = arith.addi %1115, %1116 : vector<16x16xi32>
    %1118 = arith.cmpi eq, %1112, %1117 : vector<16x16xi32>
    %1119 = arith.extui %1118 : vector<16x16xi1> to vector<16x16xi32>
    %1120 = arith.sitofp %1119 : vector<16x16xi32> to vector<16x16xf32>
    %1121 = tpu.iota {dimensions = array<i32: 1>} : vector<16x16xi32>
    %1122 = tpu.iota {dimensions = array<i32: 0>} : vector<16x16xi32>
    %c1_i32_598 = arith.constant 1 : i32
    %1123 = vector.broadcast %c1_i32_598 : i32 to vector<16x16xi32>
    %1124 = arith.muli %1123, %1122 : vector<16x16xi32>
    %c0_i32_599 = arith.constant 0 : i32
    %1125 = vector.broadcast %c0_i32_599 : i32 to vector<16x16xi32>
    %1126 = arith.addi %1124, %1125 : vector<16x16xi32>
    %1127 = arith.cmpi eq, %1121, %1126 : vector<16x16xi32>
    %1128 = arith.extui %1127 : vector<16x16xi1> to vector<16x16xi32>
    %1129 = arith.sitofp %1128 : vector<16x16xi32> to vector<16x16xf32>
    %1130 = tpu.iota {dimensions = array<i32: 1>} : vector<16x16xi32>
    %1131 = tpu.iota {dimensions = array<i32: 0>} : vector<16x16xi32>
    %c1_i32_600 = arith.constant 1 : i32
    %1132 = vector.broadcast %c1_i32_600 : i32 to vector<16x16xi32>
    %1133 = arith.muli %1132, %1131 : vector<16x16xi32>
    %c1_i32_601 = arith.constant 1 : i32
    %1134 = vector.broadcast %c1_i32_601 : i32 to vector<16x16xi32>
    %1135 = arith.addi %1133, %1134 : vector<16x16xi32>
    %1136 = arith.cmpi eq, %1130, %1135 : vector<16x16xi32>
    %1137 = arith.extui %1136 : vector<16x16xi1> to vector<16x16xi32>
    %1138 = arith.sitofp %1137 : vector<16x16xi32> to vector<16x16xf32>
    %cst_602 = arith.constant 0.000000e+00 : f32
    %1139 = vector.broadcast %cst_602 : f32 to vector<16x128xf32>
    %c0_603 = arith.constant 0 : index
    %c0_604 = arith.constant 0 : index
    %1140 = vector.load %arg32[%c0_603, %c0_604] : memref<1x128xf32, #tpu.memory_space<vmem>>, vector<1x128xf32>
    %1141 = vector.broadcast %1140 : vector<1x128xf32> to vector<16x128xf32>
    %1142 = arith.addf %1139, %1141 : vector<16x128xf32>
    %cst_605 = arith.constant dense<0.000000e+00> : vector<16x128xf32>
    %1143 = tpu.matmul %1120, %1075, %cst_605 {dimension_numbers = #tpu.dot_dimension_numbers<[1], [0], [0], [1], [0, 0, 1, 1], [], []>} : vector<16x16xf32>, vector<16x128xf32>, vector<16x128xf32> -> vector<16x128xf32>
    %c0_606 = arith.constant 0 : index
    %c0_607 = arith.constant 0 : index
    %c0_608 = arith.constant 0 : index
    %1144 = vector.load %arg31[%c0_606, %c0_607, %c0_608] : memref<3x128x128xf32, #tpu.memory_space<vmem>>, vector<1x128x128xf32>
    %1145 = vector.shape_cast %1144 : vector<1x128x128xf32> to vector<128x128xf32>
    %cst_609 = arith.constant dense<0.000000e+00> : vector<16x128xf32>
    %1146 = tpu.matmul %1143, %1145, %cst_609 {dimension_numbers = #tpu.dot_dimension_numbers<[1], [0], [0], [1], [0, 0, 1, 1], [], []>} : vector<16x128xf32>, vector<128x128xf32>, vector<16x128xf32> -> vector<16x128xf32>
    %1147 = arith.addf %1142, %1146 : vector<16x128xf32>
    %cst_610 = arith.constant dense<0.000000e+00> : vector<16x128xf32>
    %1148 = tpu.matmul %1129, %1075, %cst_610 {dimension_numbers = #tpu.dot_dimension_numbers<[1], [0], [0], [1], [0, 0, 1, 1], [], []>} : vector<16x16xf32>, vector<16x128xf32>, vector<16x128xf32> -> vector<16x128xf32>
    %c1_611 = arith.constant 1 : index
    %c0_612 = arith.constant 0 : index
    %c0_613 = arith.constant 0 : index
    %1149 = vector.load %arg31[%c1_611, %c0_612, %c0_613] : memref<3x128x128xf32, #tpu.memory_space<vmem>>, vector<1x128x128xf32>
    %1150 = vector.shape_cast %1149 : vector<1x128x128xf32> to vector<128x128xf32>
    %cst_614 = arith.constant dense<0.000000e+00> : vector<16x128xf32>
    %1151 = tpu.matmul %1148, %1150, %cst_614 {dimension_numbers = #tpu.dot_dimension_numbers<[1], [0], [0], [1], [0, 0, 1, 1], [], []>} : vector<16x128xf32>, vector<128x128xf32>, vector<16x128xf32> -> vector<16x128xf32>
    %1152 = arith.addf %1147, %1151 : vector<16x128xf32>
    %cst_615 = arith.constant dense<0.000000e+00> : vector<16x128xf32>
    %1153 = tpu.matmul %1138, %1075, %cst_615 {dimension_numbers = #tpu.dot_dimension_numbers<[1], [0], [0], [1], [0, 0, 1, 1], [], []>} : vector<16x16xf32>, vector<16x128xf32>, vector<16x128xf32> -> vector<16x128xf32>
    %c2_616 = arith.constant 2 : index
    %c0_617 = arith.constant 0 : index
    %c0_618 = arith.constant 0 : index
    %1154 = vector.load %arg31[%c2_616, %c0_617, %c0_618] : memref<3x128x128xf32, #tpu.memory_space<vmem>>, vector<1x128x128xf32>
    %1155 = vector.shape_cast %1154 : vector<1x128x128xf32> to vector<128x128xf32>
    %cst_619 = arith.constant dense<0.000000e+00> : vector<16x128xf32>
    %1156 = tpu.matmul %1153, %1155, %cst_619 {dimension_numbers = #tpu.dot_dimension_numbers<[1], [0], [0], [1], [0, 0, 1, 1], [], []>} : vector<16x128xf32>, vector<128x128xf32>, vector<16x128xf32> -> vector<16x128xf32>
    %1157 = arith.addf %1152, %1156 : vector<16x128xf32>
    %cst_620 = arith.constant 0.000000e+00 : f32
    %1158 = vector.broadcast %cst_620 : f32 to vector<16x128xf32>
    %1159 = arith.maximumf %1157, %1158 : vector<16x128xf32>
    %cst_621 = arith.constant 0.000000e+00 : f32
    %1160 = vector.broadcast %cst_621 : f32 to vector<16x128xf32>
    %c0_622 = arith.constant 0 : index
    %c0_623 = arith.constant 0 : index
    %1161 = vector.load %arg32[%c0_622, %c0_623] : memref<1x128xf32, #tpu.memory_space<vmem>>, vector<1x128xf32>
    %1162 = vector.broadcast %1161 : vector<1x128xf32> to vector<16x128xf32>
    %1163 = arith.addf %1160, %1162 : vector<16x128xf32>
    %cst_624 = arith.constant dense<0.000000e+00> : vector<16x128xf32>
    %1164 = tpu.matmul %1120, %1111, %cst_624 {dimension_numbers = #tpu.dot_dimension_numbers<[1], [0], [0], [1], [0, 0, 1, 1], [], []>} : vector<16x16xf32>, vector<16x128xf32>, vector<16x128xf32> -> vector<16x128xf32>
    %c0_625 = arith.constant 0 : index
    %c0_626 = arith.constant 0 : index
    %c0_627 = arith.constant 0 : index
    %1165 = vector.load %arg31[%c0_625, %c0_626, %c0_627] : memref<3x128x128xf32, #tpu.memory_space<vmem>>, vector<1x128x128xf32>
    %1166 = vector.shape_cast %1165 : vector<1x128x128xf32> to vector<128x128xf32>
    %cst_628 = arith.constant dense<0.000000e+00> : vector<16x128xf32>
    %1167 = tpu.matmul %1164, %1166, %cst_628 {dimension_numbers = #tpu.dot_dimension_numbers<[1], [0], [0], [1], [0, 0, 1, 1], [], []>} : vector<16x128xf32>, vector<128x128xf32>, vector<16x128xf32> -> vector<16x128xf32>
    %1168 = arith.addf %1163, %1167 : vector<16x128xf32>
    %cst_629 = arith.constant dense<0.000000e+00> : vector<16x128xf32>
    %1169 = tpu.matmul %1129, %1111, %cst_629 {dimension_numbers = #tpu.dot_dimension_numbers<[1], [0], [0], [1], [0, 0, 1, 1], [], []>} : vector<16x16xf32>, vector<16x128xf32>, vector<16x128xf32> -> vector<16x128xf32>
    %c1_630 = arith.constant 1 : index
    %c0_631 = arith.constant 0 : index
    %c0_632 = arith.constant 0 : index
    %1170 = vector.load %arg31[%c1_630, %c0_631, %c0_632] : memref<3x128x128xf32, #tpu.memory_space<vmem>>, vector<1x128x128xf32>
    %1171 = vector.shape_cast %1170 : vector<1x128x128xf32> to vector<128x128xf32>
    %cst_633 = arith.constant dense<0.000000e+00> : vector<16x128xf32>
    %1172 = tpu.matmul %1169, %1171, %cst_633 {dimension_numbers = #tpu.dot_dimension_numbers<[1], [0], [0], [1], [0, 0, 1, 1], [], []>} : vector<16x128xf32>, vector<128x128xf32>, vector<16x128xf32> -> vector<16x128xf32>
    %1173 = arith.addf %1168, %1172 : vector<16x128xf32>
    %cst_634 = arith.constant dense<0.000000e+00> : vector<16x128xf32>
    %1174 = tpu.matmul %1138, %1111, %cst_634 {dimension_numbers = #tpu.dot_dimension_numbers<[1], [0], [0], [1], [0, 0, 1, 1], [], []>} : vector<16x16xf32>, vector<16x128xf32>, vector<16x128xf32> -> vector<16x128xf32>
    %c2_635 = arith.constant 2 : index
    %c0_636 = arith.constant 0 : index
    %c0_637 = arith.constant 0 : index
    %1175 = vector.load %arg31[%c2_635, %c0_636, %c0_637] : memref<3x128x128xf32, #tpu.memory_space<vmem>>, vector<1x128x128xf32>
    %1176 = vector.shape_cast %1175 : vector<1x128x128xf32> to vector<128x128xf32>
    %cst_638 = arith.constant dense<0.000000e+00> : vector<16x128xf32>
    %1177 = tpu.matmul %1174, %1176, %cst_638 {dimension_numbers = #tpu.dot_dimension_numbers<[1], [0], [0], [1], [0, 0, 1, 1], [], []>} : vector<16x128xf32>, vector<128x128xf32>, vector<16x128xf32> -> vector<16x128xf32>
    %1178 = arith.addf %1173, %1177 : vector<16x128xf32>
    %cst_639 = arith.constant 0.000000e+00 : f32
    %1179 = vector.broadcast %cst_639 : f32 to vector<16x128xf32>
    %1180 = arith.maximumf %1178, %1179 : vector<16x128xf32>
    %cst_640 = arith.constant 0.000000e+00 : f32
    %1181 = vector.broadcast %cst_640 : f32 to vector<1x8xf32>
    %1182 = vector.extract_strided_slice %1159 {offsets = [0, 0], sizes = [16, 8], strides = [1, 1]} : vector<16x128xf32> to vector<16x8xf32>
    %cst_641 = arith.constant dense<0.000000e+00> : vector<8xf32>
    %1183 = vector.multi_reduction <add>, %1182, %cst_641 [0] : vector<16x8xf32> to vector<8xf32>
    %1184 = vector.shape_cast %1183 : vector<8xf32> to vector<1x8xf32>
    %1185 = arith.addf %1181, %1184 : vector<1x8xf32>
    %1186 = vector.extract_strided_slice %1159 {offsets = [0, 8], sizes = [16, 8], strides = [1, 1]} : vector<16x128xf32> to vector<16x8xf32>
    %cst_642 = arith.constant dense<0.000000e+00> : vector<8xf32>
    %1187 = vector.multi_reduction <add>, %1186, %cst_642 [0] : vector<16x8xf32> to vector<8xf32>
    %1188 = vector.shape_cast %1187 : vector<8xf32> to vector<1x8xf32>
    %1189 = arith.addf %1185, %1188 : vector<1x8xf32>
    %1190 = vector.extract_strided_slice %1159 {offsets = [0, 16], sizes = [16, 8], strides = [1, 1]} : vector<16x128xf32> to vector<16x8xf32>
    %cst_643 = arith.constant dense<0.000000e+00> : vector<8xf32>
    %1191 = vector.multi_reduction <add>, %1190, %cst_643 [0] : vector<16x8xf32> to vector<8xf32>
    %1192 = vector.shape_cast %1191 : vector<8xf32> to vector<1x8xf32>
    %1193 = arith.addf %1189, %1192 : vector<1x8xf32>
    %1194 = vector.extract_strided_slice %1159 {offsets = [0, 24], sizes = [16, 8], strides = [1, 1]} : vector<16x128xf32> to vector<16x8xf32>
    %cst_644 = arith.constant dense<0.000000e+00> : vector<8xf32>
    %1195 = vector.multi_reduction <add>, %1194, %cst_644 [0] : vector<16x8xf32> to vector<8xf32>
    %1196 = vector.shape_cast %1195 : vector<8xf32> to vector<1x8xf32>
    %1197 = arith.addf %1193, %1196 : vector<1x8xf32>
    %1198 = vector.extract_strided_slice %1159 {offsets = [0, 32], sizes = [16, 8], strides = [1, 1]} : vector<16x128xf32> to vector<16x8xf32>
    %cst_645 = arith.constant dense<0.000000e+00> : vector<8xf32>
    %1199 = vector.multi_reduction <add>, %1198, %cst_645 [0] : vector<16x8xf32> to vector<8xf32>
    %1200 = vector.shape_cast %1199 : vector<8xf32> to vector<1x8xf32>
    %1201 = arith.addf %1197, %1200 : vector<1x8xf32>
    %1202 = vector.extract_strided_slice %1159 {offsets = [0, 40], sizes = [16, 8], strides = [1, 1]} : vector<16x128xf32> to vector<16x8xf32>
    %cst_646 = arith.constant dense<0.000000e+00> : vector<8xf32>
    %1203 = vector.multi_reduction <add>, %1202, %cst_646 [0] : vector<16x8xf32> to vector<8xf32>
    %1204 = vector.shape_cast %1203 : vector<8xf32> to vector<1x8xf32>
    %1205 = arith.addf %1201, %1204 : vector<1x8xf32>
    %1206 = vector.extract_strided_slice %1159 {offsets = [0, 48], sizes = [16, 8], strides = [1, 1]} : vector<16x128xf32> to vector<16x8xf32>
    %cst_647 = arith.constant dense<0.000000e+00> : vector<8xf32>
    %1207 = vector.multi_reduction <add>, %1206, %cst_647 [0] : vector<16x8xf32> to vector<8xf32>
    %1208 = vector.shape_cast %1207 : vector<8xf32> to vector<1x8xf32>
    %1209 = arith.addf %1205, %1208 : vector<1x8xf32>
    %1210 = vector.extract_strided_slice %1159 {offsets = [0, 56], sizes = [16, 8], strides = [1, 1]} : vector<16x128xf32> to vector<16x8xf32>
    %cst_648 = arith.constant dense<0.000000e+00> : vector<8xf32>
    %1211 = vector.multi_reduction <add>, %1210, %cst_648 [0] : vector<16x8xf32> to vector<8xf32>
    %1212 = vector.shape_cast %1211 : vector<8xf32> to vector<1x8xf32>
    %1213 = arith.addf %1209, %1212 : vector<1x8xf32>
    %1214 = vector.extract_strided_slice %1159 {offsets = [0, 64], sizes = [16, 8], strides = [1, 1]} : vector<16x128xf32> to vector<16x8xf32>
    %cst_649 = arith.constant dense<0.000000e+00> : vector<8xf32>
    %1215 = vector.multi_reduction <add>, %1214, %cst_649 [0] : vector<16x8xf32> to vector<8xf32>
    %1216 = vector.shape_cast %1215 : vector<8xf32> to vector<1x8xf32>
    %1217 = arith.addf %1213, %1216 : vector<1x8xf32>
    %1218 = vector.extract_strided_slice %1159 {offsets = [0, 72], sizes = [16, 8], strides = [1, 1]} : vector<16x128xf32> to vector<16x8xf32>
    %cst_650 = arith.constant dense<0.000000e+00> : vector<8xf32>
    %1219 = vector.multi_reduction <add>, %1218, %cst_650 [0] : vector<16x8xf32> to vector<8xf32>
    %1220 = vector.shape_cast %1219 : vector<8xf32> to vector<1x8xf32>
    %1221 = arith.addf %1217, %1220 : vector<1x8xf32>
    %1222 = vector.extract_strided_slice %1159 {offsets = [0, 80], sizes = [16, 8], strides = [1, 1]} : vector<16x128xf32> to vector<16x8xf32>
    %cst_651 = arith.constant dense<0.000000e+00> : vector<8xf32>
    %1223 = vector.multi_reduction <add>, %1222, %cst_651 [0] : vector<16x8xf32> to vector<8xf32>
    %1224 = vector.shape_cast %1223 : vector<8xf32> to vector<1x8xf32>
    %1225 = arith.addf %1221, %1224 : vector<1x8xf32>
    %1226 = vector.extract_strided_slice %1159 {offsets = [0, 88], sizes = [16, 8], strides = [1, 1]} : vector<16x128xf32> to vector<16x8xf32>
    %cst_652 = arith.constant dense<0.000000e+00> : vector<8xf32>
    %1227 = vector.multi_reduction <add>, %1226, %cst_652 [0] : vector<16x8xf32> to vector<8xf32>
    %1228 = vector.shape_cast %1227 : vector<8xf32> to vector<1x8xf32>
    %1229 = arith.addf %1225, %1228 : vector<1x8xf32>
    %1230 = vector.extract_strided_slice %1159 {offsets = [0, 96], sizes = [16, 8], strides = [1, 1]} : vector<16x128xf32> to vector<16x8xf32>
    %cst_653 = arith.constant dense<0.000000e+00> : vector<8xf32>
    %1231 = vector.multi_reduction <add>, %1230, %cst_653 [0] : vector<16x8xf32> to vector<8xf32>
    %1232 = vector.shape_cast %1231 : vector<8xf32> to vector<1x8xf32>
    %1233 = arith.addf %1229, %1232 : vector<1x8xf32>
    %1234 = vector.extract_strided_slice %1159 {offsets = [0, 104], sizes = [16, 8], strides = [1, 1]} : vector<16x128xf32> to vector<16x8xf32>
    %cst_654 = arith.constant dense<0.000000e+00> : vector<8xf32>
    %1235 = vector.multi_reduction <add>, %1234, %cst_654 [0] : vector<16x8xf32> to vector<8xf32>
    %1236 = vector.shape_cast %1235 : vector<8xf32> to vector<1x8xf32>
    %1237 = arith.addf %1233, %1236 : vector<1x8xf32>
    %1238 = vector.extract_strided_slice %1159 {offsets = [0, 112], sizes = [16, 8], strides = [1, 1]} : vector<16x128xf32> to vector<16x8xf32>
    %cst_655 = arith.constant dense<0.000000e+00> : vector<8xf32>
    %1239 = vector.multi_reduction <add>, %1238, %cst_655 [0] : vector<16x8xf32> to vector<8xf32>
    %1240 = vector.shape_cast %1239 : vector<8xf32> to vector<1x8xf32>
    %1241 = arith.addf %1237, %1240 : vector<1x8xf32>
    %1242 = vector.extract_strided_slice %1159 {offsets = [0, 120], sizes = [16, 8], strides = [1, 1]} : vector<16x128xf32> to vector<16x8xf32>
    %cst_656 = arith.constant dense<0.000000e+00> : vector<8xf32>
    %1243 = vector.multi_reduction <add>, %1242, %cst_656 [0] : vector<16x8xf32> to vector<8xf32>
    %1244 = vector.shape_cast %1243 : vector<8xf32> to vector<1x8xf32>
    %1245 = arith.addf %1241, %1244 : vector<1x8xf32>
    %1246 = vector.extract_strided_slice %1180 {offsets = [0, 0], sizes = [16, 8], strides = [1, 1]} : vector<16x128xf32> to vector<16x8xf32>
    %cst_657 = arith.constant dense<0.000000e+00> : vector<8xf32>
    %1247 = vector.multi_reduction <add>, %1246, %cst_657 [0] : vector<16x8xf32> to vector<8xf32>
    %1248 = vector.shape_cast %1247 : vector<8xf32> to vector<1x8xf32>
    %1249 = arith.addf %1245, %1248 : vector<1x8xf32>
    %1250 = vector.extract_strided_slice %1180 {offsets = [0, 8], sizes = [16, 8], strides = [1, 1]} : vector<16x128xf32> to vector<16x8xf32>
    %cst_658 = arith.constant dense<0.000000e+00> : vector<8xf32>
    %1251 = vector.multi_reduction <add>, %1250, %cst_658 [0] : vector<16x8xf32> to vector<8xf32>
    %1252 = vector.shape_cast %1251 : vector<8xf32> to vector<1x8xf32>
    %1253 = arith.addf %1249, %1252 : vector<1x8xf32>
    %1254 = vector.extract_strided_slice %1180 {offsets = [0, 16], sizes = [16, 8], strides = [1, 1]} : vector<16x128xf32> to vector<16x8xf32>
    %cst_659 = arith.constant dense<0.000000e+00> : vector<8xf32>
    %1255 = vector.multi_reduction <add>, %1254, %cst_659 [0] : vector<16x8xf32> to vector<8xf32>
    %1256 = vector.shape_cast %1255 : vector<8xf32> to vector<1x8xf32>
    %1257 = arith.addf %1253, %1256 : vector<1x8xf32>
    %1258 = vector.extract_strided_slice %1180 {offsets = [0, 24], sizes = [16, 8], strides = [1, 1]} : vector<16x128xf32> to vector<16x8xf32>
    %cst_660 = arith.constant dense<0.000000e+00> : vector<8xf32>
    %1259 = vector.multi_reduction <add>, %1258, %cst_660 [0] : vector<16x8xf32> to vector<8xf32>
    %1260 = vector.shape_cast %1259 : vector<8xf32> to vector<1x8xf32>
    %1261 = arith.addf %1257, %1260 : vector<1x8xf32>
    %1262 = vector.extract_strided_slice %1180 {offsets = [0, 32], sizes = [16, 8], strides = [1, 1]} : vector<16x128xf32> to vector<16x8xf32>
    %cst_661 = arith.constant dense<0.000000e+00> : vector<8xf32>
    %1263 = vector.multi_reduction <add>, %1262, %cst_661 [0] : vector<16x8xf32> to vector<8xf32>
    %1264 = vector.shape_cast %1263 : vector<8xf32> to vector<1x8xf32>
    %1265 = arith.addf %1261, %1264 : vector<1x8xf32>
    %1266 = vector.extract_strided_slice %1180 {offsets = [0, 40], sizes = [16, 8], strides = [1, 1]} : vector<16x128xf32> to vector<16x8xf32>
    %cst_662 = arith.constant dense<0.000000e+00> : vector<8xf32>
    %1267 = vector.multi_reduction <add>, %1266, %cst_662 [0] : vector<16x8xf32> to vector<8xf32>
    %1268 = vector.shape_cast %1267 : vector<8xf32> to vector<1x8xf32>
    %1269 = arith.addf %1265, %1268 : vector<1x8xf32>
    %1270 = vector.extract_strided_slice %1180 {offsets = [0, 48], sizes = [16, 8], strides = [1, 1]} : vector<16x128xf32> to vector<16x8xf32>
    %cst_663 = arith.constant dense<0.000000e+00> : vector<8xf32>
    %1271 = vector.multi_reduction <add>, %1270, %cst_663 [0] : vector<16x8xf32> to vector<8xf32>
    %1272 = vector.shape_cast %1271 : vector<8xf32> to vector<1x8xf32>
    %1273 = arith.addf %1269, %1272 : vector<1x8xf32>
    %1274 = vector.extract_strided_slice %1180 {offsets = [0, 56], sizes = [16, 8], strides = [1, 1]} : vector<16x128xf32> to vector<16x8xf32>
    %cst_664 = arith.constant dense<0.000000e+00> : vector<8xf32>
    %1275 = vector.multi_reduction <add>, %1274, %cst_664 [0] : vector<16x8xf32> to vector<8xf32>
    %1276 = vector.shape_cast %1275 : vector<8xf32> to vector<1x8xf32>
    %1277 = arith.addf %1273, %1276 : vector<1x8xf32>
    %1278 = vector.extract_strided_slice %1180 {offsets = [0, 64], sizes = [16, 8], strides = [1, 1]} : vector<16x128xf32> to vector<16x8xf32>
    %cst_665 = arith.constant dense<0.000000e+00> : vector<8xf32>
    %1279 = vector.multi_reduction <add>, %1278, %cst_665 [0] : vector<16x8xf32> to vector<8xf32>
    %1280 = vector.shape_cast %1279 : vector<8xf32> to vector<1x8xf32>
    %1281 = arith.addf %1277, %1280 : vector<1x8xf32>
    %1282 = vector.extract_strided_slice %1180 {offsets = [0, 72], sizes = [16, 8], strides = [1, 1]} : vector<16x128xf32> to vector<16x8xf32>
    %cst_666 = arith.constant dense<0.000000e+00> : vector<8xf32>
    %1283 = vector.multi_reduction <add>, %1282, %cst_666 [0] : vector<16x8xf32> to vector<8xf32>
    %1284 = vector.shape_cast %1283 : vector<8xf32> to vector<1x8xf32>
    %1285 = arith.addf %1281, %1284 : vector<1x8xf32>
    %1286 = vector.extract_strided_slice %1180 {offsets = [0, 80], sizes = [16, 8], strides = [1, 1]} : vector<16x128xf32> to vector<16x8xf32>
    %cst_667 = arith.constant dense<0.000000e+00> : vector<8xf32>
    %1287 = vector.multi_reduction <add>, %1286, %cst_667 [0] : vector<16x8xf32> to vector<8xf32>
    %1288 = vector.shape_cast %1287 : vector<8xf32> to vector<1x8xf32>
    %1289 = arith.addf %1285, %1288 : vector<1x8xf32>
    %1290 = vector.extract_strided_slice %1180 {offsets = [0, 88], sizes = [16, 8], strides = [1, 1]} : vector<16x128xf32> to vector<16x8xf32>
    %cst_668 = arith.constant dense<0.000000e+00> : vector<8xf32>
    %1291 = vector.multi_reduction <add>, %1290, %cst_668 [0] : vector<16x8xf32> to vector<8xf32>
    %1292 = vector.shape_cast %1291 : vector<8xf32> to vector<1x8xf32>
    %1293 = arith.addf %1289, %1292 : vector<1x8xf32>
    %1294 = vector.extract_strided_slice %1180 {offsets = [0, 96], sizes = [16, 8], strides = [1, 1]} : vector<16x128xf32> to vector<16x8xf32>
    %cst_669 = arith.constant dense<0.000000e+00> : vector<8xf32>
    %1295 = vector.multi_reduction <add>, %1294, %cst_669 [0] : vector<16x8xf32> to vector<8xf32>
    %1296 = vector.shape_cast %1295 : vector<8xf32> to vector<1x8xf32>
    %1297 = arith.addf %1293, %1296 : vector<1x8xf32>
    %1298 = vector.extract_strided_slice %1180 {offsets = [0, 104], sizes = [16, 8], strides = [1, 1]} : vector<16x128xf32> to vector<16x8xf32>
    %cst_670 = arith.constant dense<0.000000e+00> : vector<8xf32>
    %1299 = vector.multi_reduction <add>, %1298, %cst_670 [0] : vector<16x8xf32> to vector<8xf32>
    %1300 = vector.shape_cast %1299 : vector<8xf32> to vector<1x8xf32>
    %1301 = arith.addf %1297, %1300 : vector<1x8xf32>
    %1302 = vector.extract_strided_slice %1180 {offsets = [0, 112], sizes = [16, 8], strides = [1, 1]} : vector<16x128xf32> to vector<16x8xf32>
    %cst_671 = arith.constant dense<0.000000e+00> : vector<8xf32>
    %1303 = vector.multi_reduction <add>, %1302, %cst_671 [0] : vector<16x8xf32> to vector<8xf32>
    %1304 = vector.shape_cast %1303 : vector<8xf32> to vector<1x8xf32>
    %1305 = arith.addf %1301, %1304 : vector<1x8xf32>
    %1306 = vector.extract_strided_slice %1180 {offsets = [0, 120], sizes = [16, 8], strides = [1, 1]} : vector<16x128xf32> to vector<16x8xf32>
    %cst_672 = arith.constant dense<0.000000e+00> : vector<8xf32>
    %1307 = vector.multi_reduction <add>, %1306, %cst_672 [0] : vector<16x8xf32> to vector<8xf32>
    %1308 = vector.shape_cast %1307 : vector<8xf32> to vector<1x8xf32>
    %1309 = arith.addf %1305, %1308 : vector<1x8xf32>
    %cst_673 = arith.constant 0.001953125 : f32
    %1310 = vector.broadcast %cst_673 : f32 to vector<1x8xf32>
    %1311 = arith.mulf %1309, %1310 : vector<1x8xf32>
    %1312 = tpu.concatenate %1311, %1311, %1311, %1311, %1311, %1311, %1311, %1311, %1311, %1311, %1311, %1311, %1311, %1311, %1311, %1311 in 1 : vector<1x8xf32>, vector<1x8xf32>, vector<1x8xf32>, vector<1x8xf32>, vector<1x8xf32>, vector<1x8xf32>, vector<1x8xf32>, vector<1x8xf32>, vector<1x8xf32>, vector<1x8xf32>, vector<1x8xf32>, vector<1x8xf32>, vector<1x8xf32>, vector<1x8xf32>, vector<1x8xf32>, vector<1x8xf32> -> vector<1x128xf32>
    %cst_674 = arith.constant 0.000000e+00 : f32
    %1313 = vector.broadcast %cst_674 : f32 to vector<1x8xf32>
    %1314 = vector.broadcast %1312 : vector<1x128xf32> to vector<16x128xf32>
    %1315 = arith.subf %1159, %1314 : vector<16x128xf32>
    %1316 = arith.mulf %1315, %1315 : vector<16x128xf32>
    %1317 = vector.extract_strided_slice %1316 {offsets = [0, 0], sizes = [16, 8], strides = [1, 1]} : vector<16x128xf32> to vector<16x8xf32>
    %cst_675 = arith.constant dense<0.000000e+00> : vector<8xf32>
    %1318 = vector.multi_reduction <add>, %1317, %cst_675 [0] : vector<16x8xf32> to vector<8xf32>
    %1319 = vector.shape_cast %1318 : vector<8xf32> to vector<1x8xf32>
    %1320 = arith.addf %1313, %1319 : vector<1x8xf32>
    %1321 = vector.extract_strided_slice %1316 {offsets = [0, 8], sizes = [16, 8], strides = [1, 1]} : vector<16x128xf32> to vector<16x8xf32>
    %cst_676 = arith.constant dense<0.000000e+00> : vector<8xf32>
    %1322 = vector.multi_reduction <add>, %1321, %cst_676 [0] : vector<16x8xf32> to vector<8xf32>
    %1323 = vector.shape_cast %1322 : vector<8xf32> to vector<1x8xf32>
    %1324 = arith.addf %1320, %1323 : vector<1x8xf32>
    %1325 = vector.extract_strided_slice %1316 {offsets = [0, 16], sizes = [16, 8], strides = [1, 1]} : vector<16x128xf32> to vector<16x8xf32>
    %cst_677 = arith.constant dense<0.000000e+00> : vector<8xf32>
    %1326 = vector.multi_reduction <add>, %1325, %cst_677 [0] : vector<16x8xf32> to vector<8xf32>
    %1327 = vector.shape_cast %1326 : vector<8xf32> to vector<1x8xf32>
    %1328 = arith.addf %1324, %1327 : vector<1x8xf32>
    %1329 = vector.extract_strided_slice %1316 {offsets = [0, 24], sizes = [16, 8], strides = [1, 1]} : vector<16x128xf32> to vector<16x8xf32>
    %cst_678 = arith.constant dense<0.000000e+00> : vector<8xf32>
    %1330 = vector.multi_reduction <add>, %1329, %cst_678 [0] : vector<16x8xf32> to vector<8xf32>
    %1331 = vector.shape_cast %1330 : vector<8xf32> to vector<1x8xf32>
    %1332 = arith.addf %1328, %1331 : vector<1x8xf32>
    %1333 = vector.extract_strided_slice %1316 {offsets = [0, 32], sizes = [16, 8], strides = [1, 1]} : vector<16x128xf32> to vector<16x8xf32>
    %cst_679 = arith.constant dense<0.000000e+00> : vector<8xf32>
    %1334 = vector.multi_reduction <add>, %1333, %cst_679 [0] : vector<16x8xf32> to vector<8xf32>
    %1335 = vector.shape_cast %1334 : vector<8xf32> to vector<1x8xf32>
    %1336 = arith.addf %1332, %1335 : vector<1x8xf32>
    %1337 = vector.extract_strided_slice %1316 {offsets = [0, 40], sizes = [16, 8], strides = [1, 1]} : vector<16x128xf32> to vector<16x8xf32>
    %cst_680 = arith.constant dense<0.000000e+00> : vector<8xf32>
    %1338 = vector.multi_reduction <add>, %1337, %cst_680 [0] : vector<16x8xf32> to vector<8xf32>
    %1339 = vector.shape_cast %1338 : vector<8xf32> to vector<1x8xf32>
    %1340 = arith.addf %1336, %1339 : vector<1x8xf32>
    %1341 = vector.extract_strided_slice %1316 {offsets = [0, 48], sizes = [16, 8], strides = [1, 1]} : vector<16x128xf32> to vector<16x8xf32>
    %cst_681 = arith.constant dense<0.000000e+00> : vector<8xf32>
    %1342 = vector.multi_reduction <add>, %1341, %cst_681 [0] : vector<16x8xf32> to vector<8xf32>
    %1343 = vector.shape_cast %1342 : vector<8xf32> to vector<1x8xf32>
    %1344 = arith.addf %1340, %1343 : vector<1x8xf32>
    %1345 = vector.extract_strided_slice %1316 {offsets = [0, 56], sizes = [16, 8], strides = [1, 1]} : vector<16x128xf32> to vector<16x8xf32>
    %cst_682 = arith.constant dense<0.000000e+00> : vector<8xf32>
    %1346 = vector.multi_reduction <add>, %1345, %cst_682 [0] : vector<16x8xf32> to vector<8xf32>
    %1347 = vector.shape_cast %1346 : vector<8xf32> to vector<1x8xf32>
    %1348 = arith.addf %1344, %1347 : vector<1x8xf32>
    %1349 = vector.extract_strided_slice %1316 {offsets = [0, 64], sizes = [16, 8], strides = [1, 1]} : vector<16x128xf32> to vector<16x8xf32>
    %cst_683 = arith.constant dense<0.000000e+00> : vector<8xf32>
    %1350 = vector.multi_reduction <add>, %1349, %cst_683 [0] : vector<16x8xf32> to vector<8xf32>
    %1351 = vector.shape_cast %1350 : vector<8xf32> to vector<1x8xf32>
    %1352 = arith.addf %1348, %1351 : vector<1x8xf32>
    %1353 = vector.extract_strided_slice %1316 {offsets = [0, 72], sizes = [16, 8], strides = [1, 1]} : vector<16x128xf32> to vector<16x8xf32>
    %cst_684 = arith.constant dense<0.000000e+00> : vector<8xf32>
    %1354 = vector.multi_reduction <add>, %1353, %cst_684 [0] : vector<16x8xf32> to vector<8xf32>
    %1355 = vector.shape_cast %1354 : vector<8xf32> to vector<1x8xf32>
    %1356 = arith.addf %1352, %1355 : vector<1x8xf32>
    %1357 = vector.extract_strided_slice %1316 {offsets = [0, 80], sizes = [16, 8], strides = [1, 1]} : vector<16x128xf32> to vector<16x8xf32>
    %cst_685 = arith.constant dense<0.000000e+00> : vector<8xf32>
    %1358 = vector.multi_reduction <add>, %1357, %cst_685 [0] : vector<16x8xf32> to vector<8xf32>
    %1359 = vector.shape_cast %1358 : vector<8xf32> to vector<1x8xf32>
    %1360 = arith.addf %1356, %1359 : vector<1x8xf32>
    %1361 = vector.extract_strided_slice %1316 {offsets = [0, 88], sizes = [16, 8], strides = [1, 1]} : vector<16x128xf32> to vector<16x8xf32>
    %cst_686 = arith.constant dense<0.000000e+00> : vector<8xf32>
    %1362 = vector.multi_reduction <add>, %1361, %cst_686 [0] : vector<16x8xf32> to vector<8xf32>
    %1363 = vector.shape_cast %1362 : vector<8xf32> to vector<1x8xf32>
    %1364 = arith.addf %1360, %1363 : vector<1x8xf32>
    %1365 = vector.extract_strided_slice %1316 {offsets = [0, 96], sizes = [16, 8], strides = [1, 1]} : vector<16x128xf32> to vector<16x8xf32>
    %cst_687 = arith.constant dense<0.000000e+00> : vector<8xf32>
    %1366 = vector.multi_reduction <add>, %1365, %cst_687 [0] : vector<16x8xf32> to vector<8xf32>
    %1367 = vector.shape_cast %1366 : vector<8xf32> to vector<1x8xf32>
    %1368 = arith.addf %1364, %1367 : vector<1x8xf32>
    %1369 = vector.extract_strided_slice %1316 {offsets = [0, 104], sizes = [16, 8], strides = [1, 1]} : vector<16x128xf32> to vector<16x8xf32>
    %cst_688 = arith.constant dense<0.000000e+00> : vector<8xf32>
    %1370 = vector.multi_reduction <add>, %1369, %cst_688 [0] : vector<16x8xf32> to vector<8xf32>
    %1371 = vector.shape_cast %1370 : vector<8xf32> to vector<1x8xf32>
    %1372 = arith.addf %1368, %1371 : vector<1x8xf32>
    %1373 = vector.extract_strided_slice %1316 {offsets = [0, 112], sizes = [16, 8], strides = [1, 1]} : vector<16x128xf32> to vector<16x8xf32>
    %cst_689 = arith.constant dense<0.000000e+00> : vector<8xf32>
    %1374 = vector.multi_reduction <add>, %1373, %cst_689 [0] : vector<16x8xf32> to vector<8xf32>
    %1375 = vector.shape_cast %1374 : vector<8xf32> to vector<1x8xf32>
    %1376 = arith.addf %1372, %1375 : vector<1x8xf32>
    %1377 = vector.extract_strided_slice %1316 {offsets = [0, 120], sizes = [16, 8], strides = [1, 1]} : vector<16x128xf32> to vector<16x8xf32>
    %cst_690 = arith.constant dense<0.000000e+00> : vector<8xf32>
    %1378 = vector.multi_reduction <add>, %1377, %cst_690 [0] : vector<16x8xf32> to vector<8xf32>
    %1379 = vector.shape_cast %1378 : vector<8xf32> to vector<1x8xf32>
    %1380 = arith.addf %1376, %1379 : vector<1x8xf32>
    %1381 = vector.broadcast %1312 : vector<1x128xf32> to vector<16x128xf32>
    %1382 = arith.subf %1180, %1381 : vector<16x128xf32>
    %1383 = arith.mulf %1382, %1382 : vector<16x128xf32>
    %1384 = vector.extract_strided_slice %1383 {offsets = [0, 0], sizes = [16, 8], strides = [1, 1]} : vector<16x128xf32> to vector<16x8xf32>
    %cst_691 = arith.constant dense<0.000000e+00> : vector<8xf32>
    %1385 = vector.multi_reduction <add>, %1384, %cst_691 [0] : vector<16x8xf32> to vector<8xf32>
    %1386 = vector.shape_cast %1385 : vector<8xf32> to vector<1x8xf32>
    %1387 = arith.addf %1380, %1386 : vector<1x8xf32>
    %1388 = vector.extract_strided_slice %1383 {offsets = [0, 8], sizes = [16, 8], strides = [1, 1]} : vector<16x128xf32> to vector<16x8xf32>
    %cst_692 = arith.constant dense<0.000000e+00> : vector<8xf32>
    %1389 = vector.multi_reduction <add>, %1388, %cst_692 [0] : vector<16x8xf32> to vector<8xf32>
    %1390 = vector.shape_cast %1389 : vector<8xf32> to vector<1x8xf32>
    %1391 = arith.addf %1387, %1390 : vector<1x8xf32>
    %1392 = vector.extract_strided_slice %1383 {offsets = [0, 16], sizes = [16, 8], strides = [1, 1]} : vector<16x128xf32> to vector<16x8xf32>
    %cst_693 = arith.constant dense<0.000000e+00> : vector<8xf32>
    %1393 = vector.multi_reduction <add>, %1392, %cst_693 [0] : vector<16x8xf32> to vector<8xf32>
    %1394 = vector.shape_cast %1393 : vector<8xf32> to vector<1x8xf32>
    %1395 = arith.addf %1391, %1394 : vector<1x8xf32>
    %1396 = vector.extract_strided_slice %1383 {offsets = [0, 24], sizes = [16, 8], strides = [1, 1]} : vector<16x128xf32> to vector<16x8xf32>
    %cst_694 = arith.constant dense<0.000000e+00> : vector<8xf32>
    %1397 = vector.multi_reduction <add>, %1396, %cst_694 [0] : vector<16x8xf32> to vector<8xf32>
    %1398 = vector.shape_cast %1397 : vector<8xf32> to vector<1x8xf32>
    %1399 = arith.addf %1395, %1398 : vector<1x8xf32>
    %1400 = vector.extract_strided_slice %1383 {offsets = [0, 32], sizes = [16, 8], strides = [1, 1]} : vector<16x128xf32> to vector<16x8xf32>
    %cst_695 = arith.constant dense<0.000000e+00> : vector<8xf32>
    %1401 = vector.multi_reduction <add>, %1400, %cst_695 [0] : vector<16x8xf32> to vector<8xf32>
    %1402 = vector.shape_cast %1401 : vector<8xf32> to vector<1x8xf32>
    %1403 = arith.addf %1399, %1402 : vector<1x8xf32>
    %1404 = vector.extract_strided_slice %1383 {offsets = [0, 40], sizes = [16, 8], strides = [1, 1]} : vector<16x128xf32> to vector<16x8xf32>
    %cst_696 = arith.constant dense<0.000000e+00> : vector<8xf32>
    %1405 = vector.multi_reduction <add>, %1404, %cst_696 [0] : vector<16x8xf32> to vector<8xf32>
    %1406 = vector.shape_cast %1405 : vector<8xf32> to vector<1x8xf32>
    %1407 = arith.addf %1403, %1406 : vector<1x8xf32>
    %1408 = vector.extract_strided_slice %1383 {offsets = [0, 48], sizes = [16, 8], strides = [1, 1]} : vector<16x128xf32> to vector<16x8xf32>
    %cst_697 = arith.constant dense<0.000000e+00> : vector<8xf32>
    %1409 = vector.multi_reduction <add>, %1408, %cst_697 [0] : vector<16x8xf32> to vector<8xf32>
    %1410 = vector.shape_cast %1409 : vector<8xf32> to vector<1x8xf32>
    %1411 = arith.addf %1407, %1410 : vector<1x8xf32>
    %1412 = vector.extract_strided_slice %1383 {offsets = [0, 56], sizes = [16, 8], strides = [1, 1]} : vector<16x128xf32> to vector<16x8xf32>
    %cst_698 = arith.constant dense<0.000000e+00> : vector<8xf32>
    %1413 = vector.multi_reduction <add>, %1412, %cst_698 [0] : vector<16x8xf32> to vector<8xf32>
    %1414 = vector.shape_cast %1413 : vector<8xf32> to vector<1x8xf32>
    %1415 = arith.addf %1411, %1414 : vector<1x8xf32>
    %1416 = vector.extract_strided_slice %1383 {offsets = [0, 64], sizes = [16, 8], strides = [1, 1]} : vector<16x128xf32> to vector<16x8xf32>
    %cst_699 = arith.constant dense<0.000000e+00> : vector<8xf32>
    %1417 = vector.multi_reduction <add>, %1416, %cst_699 [0] : vector<16x8xf32> to vector<8xf32>
    %1418 = vector.shape_cast %1417 : vector<8xf32> to vector<1x8xf32>
    %1419 = arith.addf %1415, %1418 : vector<1x8xf32>
    %1420 = vector.extract_strided_slice %1383 {offsets = [0, 72], sizes = [16, 8], strides = [1, 1]} : vector<16x128xf32> to vector<16x8xf32>
    %cst_700 = arith.constant dense<0.000000e+00> : vector<8xf32>
    %1421 = vector.multi_reduction <add>, %1420, %cst_700 [0] : vector<16x8xf32> to vector<8xf32>
    %1422 = vector.shape_cast %1421 : vector<8xf32> to vector<1x8xf32>
    %1423 = arith.addf %1419, %1422 : vector<1x8xf32>
    %1424 = vector.extract_strided_slice %1383 {offsets = [0, 80], sizes = [16, 8], strides = [1, 1]} : vector<16x128xf32> to vector<16x8xf32>
    %cst_701 = arith.constant dense<0.000000e+00> : vector<8xf32>
    %1425 = vector.multi_reduction <add>, %1424, %cst_701 [0] : vector<16x8xf32> to vector<8xf32>
    %1426 = vector.shape_cast %1425 : vector<8xf32> to vector<1x8xf32>
    %1427 = arith.addf %1423, %1426 : vector<1x8xf32>
    %1428 = vector.extract_strided_slice %1383 {offsets = [0, 88], sizes = [16, 8], strides = [1, 1]} : vector<16x128xf32> to vector<16x8xf32>
    %cst_702 = arith.constant dense<0.000000e+00> : vector<8xf32>
    %1429 = vector.multi_reduction <add>, %1428, %cst_702 [0] : vector<16x8xf32> to vector<8xf32>
    %1430 = vector.shape_cast %1429 : vector<8xf32> to vector<1x8xf32>
    %1431 = arith.addf %1427, %1430 : vector<1x8xf32>
    %1432 = vector.extract_strided_slice %1383 {offsets = [0, 96], sizes = [16, 8], strides = [1, 1]} : vector<16x128xf32> to vector<16x8xf32>
    %cst_703 = arith.constant dense<0.000000e+00> : vector<8xf32>
    %1433 = vector.multi_reduction <add>, %1432, %cst_703 [0] : vector<16x8xf32> to vector<8xf32>
    %1434 = vector.shape_cast %1433 : vector<8xf32> to vector<1x8xf32>
    %1435 = arith.addf %1431, %1434 : vector<1x8xf32>
    %1436 = vector.extract_strided_slice %1383 {offsets = [0, 104], sizes = [16, 8], strides = [1, 1]} : vector<16x128xf32> to vector<16x8xf32>
    %cst_704 = arith.constant dense<0.000000e+00> : vector<8xf32>
    %1437 = vector.multi_reduction <add>, %1436, %cst_704 [0] : vector<16x8xf32> to vector<8xf32>
    %1438 = vector.shape_cast %1437 : vector<8xf32> to vector<1x8xf32>
    %1439 = arith.addf %1435, %1438 : vector<1x8xf32>
    %1440 = vector.extract_strided_slice %1383 {offsets = [0, 112], sizes = [16, 8], strides = [1, 1]} : vector<16x128xf32> to vector<16x8xf32>
    %cst_705 = arith.constant dense<0.000000e+00> : vector<8xf32>
    %1441 = vector.multi_reduction <add>, %1440, %cst_705 [0] : vector<16x8xf32> to vector<8xf32>
    %1442 = vector.shape_cast %1441 : vector<8xf32> to vector<1x8xf32>
    %1443 = arith.addf %1439, %1442 : vector<1x8xf32>
    %1444 = vector.extract_strided_slice %1383 {offsets = [0, 120], sizes = [16, 8], strides = [1, 1]} : vector<16x128xf32> to vector<16x8xf32>
    %cst_706 = arith.constant dense<0.000000e+00> : vector<8xf32>
    %1445 = vector.multi_reduction <add>, %1444, %cst_706 [0] : vector<16x8xf32> to vector<8xf32>
    %1446 = vector.shape_cast %1445 : vector<8xf32> to vector<1x8xf32>
    %1447 = arith.addf %1443, %1446 : vector<1x8xf32>
    %cst_707 = arith.constant 0.001953125 : f32
    %1448 = vector.broadcast %cst_707 : f32 to vector<1x8xf32>
    %1449 = arith.mulf %1447, %1448 : vector<1x8xf32>
    %c0_708 = arith.constant 0 : index
    %c0_709 = arith.constant 0 : index
    %1450 = vector.load %arg33[%c0_708, %c0_709] : memref<1x8xf32, #tpu.memory_space<vmem>>, vector<1x8xf32>
    %cst_710 = arith.constant 9.99999974E-6 : f32
    %1451 = vector.broadcast %cst_710 : f32 to vector<1x8xf32>
    %1452 = arith.addf %1449, %1451 : vector<1x8xf32>
    %1453 = math.rsqrt %1452 : vector<1x8xf32>
    %1454 = arith.mulf %1450, %1453 : vector<1x8xf32>
    %c0_711 = arith.constant 0 : index
    %c0_712 = arith.constant 0 : index
    %1455 = vector.load %arg34[%c0_711, %c0_712] : memref<1x8xf32, #tpu.memory_space<vmem>>, vector<1x8xf32>
    %1456 = arith.mulf %1311, %1454 : vector<1x8xf32>
    %1457 = arith.subf %1455, %1456 : vector<1x8xf32>
    %1458 = tpu.concatenate %1454, %1454, %1454, %1454, %1454, %1454, %1454, %1454, %1454, %1454, %1454, %1454, %1454, %1454, %1454, %1454 in 1 : vector<1x8xf32>, vector<1x8xf32>, vector<1x8xf32>, vector<1x8xf32>, vector<1x8xf32>, vector<1x8xf32>, vector<1x8xf32>, vector<1x8xf32>, vector<1x8xf32>, vector<1x8xf32>, vector<1x8xf32>, vector<1x8xf32>, vector<1x8xf32>, vector<1x8xf32>, vector<1x8xf32>, vector<1x8xf32> -> vector<1x128xf32>
    %1459 = tpu.concatenate %1457, %1457, %1457, %1457, %1457, %1457, %1457, %1457, %1457, %1457, %1457, %1457, %1457, %1457, %1457, %1457 in 1 : vector<1x8xf32>, vector<1x8xf32>, vector<1x8xf32>, vector<1x8xf32>, vector<1x8xf32>, vector<1x8xf32>, vector<1x8xf32>, vector<1x8xf32>, vector<1x8xf32>, vector<1x8xf32>, vector<1x8xf32>, vector<1x8xf32>, vector<1x8xf32>, vector<1x8xf32>, vector<1x8xf32>, vector<1x8xf32> -> vector<1x128xf32>
    %1460 = vector.broadcast %1458 : vector<1x128xf32> to vector<16x128xf32>
    %1461 = arith.mulf %1159, %1460 : vector<16x128xf32>
    %1462 = vector.broadcast %1459 : vector<1x128xf32> to vector<16x128xf32>
    %1463 = arith.addf %1461, %1462 : vector<16x128xf32>
    %1464 = vector.broadcast %1458 : vector<1x128xf32> to vector<16x128xf32>
    %1465 = arith.mulf %1180, %1464 : vector<16x128xf32>
    %1466 = vector.broadcast %1459 : vector<1x128xf32> to vector<16x128xf32>
    %1467 = arith.addf %1465, %1466 : vector<16x128xf32>
    %1468 = tpu.iota {dimensions = array<i32: 1>} : vector<16x16xi32>
    %1469 = tpu.iota {dimensions = array<i32: 0>} : vector<16x16xi32>
    %c1_i32_713 = arith.constant 1 : i32
    %1470 = vector.broadcast %c1_i32_713 : i32 to vector<16x16xi32>
    %1471 = arith.muli %1470, %1469 : vector<16x16xi32>
    %c0_i32_714 = arith.constant 0 : i32
    %1472 = vector.broadcast %c0_i32_714 : i32 to vector<16x16xi32>
    %1473 = arith.addi %1471, %1472 : vector<16x16xi32>
    %1474 = arith.cmpi eq, %1468, %1473 : vector<16x16xi32>
    %1475 = arith.extui %1474 : vector<16x16xi1> to vector<16x16xi32>
    %1476 = arith.sitofp %1475 : vector<16x16xi32> to vector<16x16xf32>
    %cst_715 = arith.constant 0.000000e+00 : f32
    %1477 = vector.broadcast %cst_715 : f32 to vector<16x48xf32>
    %c0_716 = arith.constant 0 : index
    %c0_717 = arith.constant 0 : index
    %1478 = vector.load %arg36[%c0_716, %c0_717] : memref<1x48xf32, #tpu.memory_space<vmem>>, vector<1x48xf32>
    %1479 = vector.broadcast %1478 : vector<1x48xf32> to vector<16x48xf32>
    %1480 = arith.addf %1477, %1479 : vector<16x48xf32>
    %cst_718 = arith.constant dense<0.000000e+00> : vector<16x128xf32>
    %1481 = tpu.matmul %1476, %1463, %cst_718 {dimension_numbers = #tpu.dot_dimension_numbers<[1], [0], [0], [1], [0, 0, 1, 1], [], []>} : vector<16x16xf32>, vector<16x128xf32>, vector<16x128xf32> -> vector<16x128xf32>
    %c0_719 = arith.constant 0 : index
    %c0_720 = arith.constant 0 : index
    %c0_721 = arith.constant 0 : index
    %1482 = vector.load %arg35[%c0_719, %c0_720, %c0_721] : memref<1x128x48xf32, #tpu.memory_space<vmem>>, vector<1x128x48xf32>
    %1483 = vector.shape_cast %1482 : vector<1x128x48xf32> to vector<128x48xf32>
    %cst_722 = arith.constant dense<0.000000e+00> : vector<16x48xf32>
    %1484 = tpu.matmul %1481, %1483, %cst_722 {dimension_numbers = #tpu.dot_dimension_numbers<[1], [0], [0], [1], [0, 0, 1, 1], [], []>} : vector<16x128xf32>, vector<128x48xf32>, vector<16x48xf32> -> vector<16x48xf32>
    %1485 = arith.addf %1480, %1484 : vector<16x48xf32>
    %1486 = arith.negf %1485 : vector<16x48xf32>
    %1487 = math.exp %1486 : vector<16x48xf32>
    %cst_723 = arith.constant 1.000000e+00 : f32
    %1488 = vector.broadcast %cst_723 : f32 to vector<16x48xf32>
    %1489 = arith.addf %1488, %1487 : vector<16x48xf32>
    %1490 = arith.divf %1488, %1489 : vector<16x48xf32>
    %cst_724 = arith.constant 0.000000e+00 : f32
    %1491 = vector.broadcast %cst_724 : f32 to vector<16x48xf32>
    %c0_725 = arith.constant 0 : index
    %c0_726 = arith.constant 0 : index
    %1492 = vector.load %arg36[%c0_725, %c0_726] : memref<1x48xf32, #tpu.memory_space<vmem>>, vector<1x48xf32>
    %1493 = vector.broadcast %1492 : vector<1x48xf32> to vector<16x48xf32>
    %1494 = arith.addf %1491, %1493 : vector<16x48xf32>
    %cst_727 = arith.constant dense<0.000000e+00> : vector<16x128xf32>
    %1495 = tpu.matmul %1476, %1467, %cst_727 {dimension_numbers = #tpu.dot_dimension_numbers<[1], [0], [0], [1], [0, 0, 1, 1], [], []>} : vector<16x16xf32>, vector<16x128xf32>, vector<16x128xf32> -> vector<16x128xf32>
    %c0_728 = arith.constant 0 : index
    %c0_729 = arith.constant 0 : index
    %c0_730 = arith.constant 0 : index
    %1496 = vector.load %arg35[%c0_728, %c0_729, %c0_730] : memref<1x128x48xf32, #tpu.memory_space<vmem>>, vector<1x128x48xf32>
    %1497 = vector.shape_cast %1496 : vector<1x128x48xf32> to vector<128x48xf32>
    %cst_731 = arith.constant dense<0.000000e+00> : vector<16x48xf32>
    %1498 = tpu.matmul %1495, %1497, %cst_731 {dimension_numbers = #tpu.dot_dimension_numbers<[1], [0], [0], [1], [0, 0, 1, 1], [], []>} : vector<16x128xf32>, vector<128x48xf32>, vector<16x48xf32> -> vector<16x48xf32>
    %1499 = arith.addf %1494, %1498 : vector<16x48xf32>
    %1500 = arith.negf %1499 : vector<16x48xf32>
    %1501 = math.exp %1500 : vector<16x48xf32>
    %cst_732 = arith.constant 1.000000e+00 : f32
    %1502 = vector.broadcast %cst_732 : f32 to vector<16x48xf32>
    %1503 = arith.addf %1502, %1501 : vector<16x48xf32>
    %1504 = arith.divf %1502, %1503 : vector<16x48xf32>
    %c0_733 = arith.constant 0 : index
    %c0_734 = arith.constant 0 : index
    %1505 = vector.load %arg37[%c0_733, %c0_734] : memref<32x48xf32, #tpu.memory_space<vmem>>, vector<16x48xf32>
    tpu.vector_store %arg37[%c0_733, %c0_734], %1490 {strides = array<i32>} : memref<32x48xf32, #tpu.memory_space<vmem>>, vector<16x48xf32>,
    %c16_735 = arith.constant 16 : index
    %c0_736 = arith.constant 0 : index
    %1506 = vector.load %arg37[%c16_735, %c0_736] : memref<32x48xf32, #tpu.memory_space<vmem>>, vector<16x48xf32>
    tpu.vector_store %arg37[%c16_735, %c0_736], %1504 {strides = array<i32>} : memref<32x48xf32, #tpu.memory_space<vmem>>, vector<16x48xf32>,
    return
  }
}

</mosaic_0001>

<bundles_post_ra>
// kernel: tile.113
= control target key start
LH: loop header
LB: loop body
LE: loop exit
PB: predicated region body
PF: predicated region fallthrough
CT: control target
= control target key end

     0   :  { %s28_s0 = inlined_call_operand.vmem [shape: f32[8], index: 0, kind: input, shape index: {}]   ;;  %s29_s1 = inlined_call_operand.vmem [shape: f32[16,8], index: 1, kind: output, shape index: {}]  }
   0x1   :  { %v4_v0 = vld [vmem:[%s28_s0] ss:$0 sm:$0xff] }
   0x2   :  { %5 = vst [vmem:[%s29_s1] sm:$0xff] %v4_v0  ;;  %8 = vst [vmem:[%s29_s1 + $0x8] sm:$0xff] %v4_v0 }

// kernel: tile.114
= control target key start
LH: loop header
LB: loop body
LE: loop exit
PB: predicated region body
PF: predicated region fallthrough
CT: control target
= control target key end

     0   :  { %s131_s10 = smov 120   ;;  %s132_s11 = smov 104   ;;  %vm3_vm0 = vcmask 64512   ;;  %vm9_vm1 = vcmask 1048512   ;;  %vm15_vm2 = vcmask 982912   ;;  %vm21_vm3 = vcmask 917312   ;;  %s207_s0 = inlined_call_operand.vmem [shape: f32[16,8], index: 0, kind: input, shape index: {}]   ;;  %s208_s1 = inlined_call_operand.vmem [shape: f32[1,128], index: 1, kind: output, shape index: {}]  }
   0x1   :  { %v101_v0 = vld [vmem:[%s207_s0 + $0xf] sm:$0x1]   ;;  %v103_v1 = vld [vmem:[%s207_s0 + $0xd] sm:$0x1]   ;;  %v102_v2 = vld [vmem:[%s207_s0 + $0xe] sm:$0x1]  }
   0x2   :  { %7 = vrot.lane.b32.xlu0 %v101_v0, %s131_s10  ;;  %19 = vrot.lane.b32.xlu1 %v103_v1, %s132_s11  ;;  %v104_v3 = vld [vmem:[%s207_s0 + $0xc] sm:$0x1]   ;;  %s133_s16 = smov 112   ;;  %s134_s17 = smov 96   ;;  %v105_v4 = vld [vmem:[%s207_s0 + $0xb] sm:$0x1]  }
   0x3   :  { %v106_v5 = vld [vmem:[%s207_s0 + $0xa] sm:$0x1]   ;;  %v2_v6 = vld [vmem:[%s207_s0] sm:$0x1]   ;;  %s135_s24 = smov 88   ;;  %s136_s25 = smov 80  }
   0x4   :  { %4 = vst.msk [vmem:[#allocation0] sm:$0x1] %vm3_vm0, %v2_v6   ;;  %v107_v7 = vld [vmem:[%s207_s0 + $0x9] sm:$0x1]   ;;  %v108_v8 = vld [vmem:[%s207_s0 + $0x8] sm:$0x1]  }
   0x5   :  { %s137_s30 = smov 72   ;;  %s138_s2 = smov 64   ;;  %v109_v9 = vld [vmem:[%s207_s0 + $0x7] sm:$0x1]   ;;  %v110_v10 = vld [vmem:[%s207_s0 + $0x6] sm:$0x1]  }
   0x6   :  { %13 = vrot.lane.b32.xlu0 %v102_v2, %s133_s16  ;;  %25 = vrot.lane.b32.xlu1 %v104_v3, %s134_s17  ;;  %s139_s7 = smov 56   ;;  %s140_s8 = smov 48   ;;  %v111_v11 = vld [vmem:[%s207_s0 + $0x5] sm:$0x1]   ;;  %v112_v12 = vld [vmem:[%s207_s0 + $0x4] sm:$0x1]  }
   0x7   :  { %s141_s13 = smov 40   ;;  %s142_s14 = smov 32   ;;  %v113_v13 = vld [vmem:[%s207_s0 + $0x3] sm:$0x1]   ;;  %v114_v14 = vld [vmem:[%s207_s0 + $0x2] sm:$0x1]  }
   0x8   :  { %s143_s19 = smov 24   ;;  %s144_s20 = smov 16   ;;  %v115_v15 = vld [vmem:[%s207_s0 + $0x1] sm:$0x1]   ;;  %vm27_vm4 = vcmask 851712   ;;  %vm33_vm5 = vcmask 786112  }
   0x9   :  { %s145_s0 = smov 8   ;;  %vm39_vm6 = vcmask 720512   ;;  %vm45_vm7 = vcmask 654912   ;;  %vm51_vm8 = vcmask 589312   ;;  %vm57_vm9 = vcmask 523712  }
   0xa   :  { %31 = vrot.lane.b32.xlu0 %v105_v4, %s135_s24  ;;  %37 = vrot.lane.b32.xlu1 %v106_v5, %s136_s25  ;;  %vm63_vm10 = vcmask 458112   ;;  %vm69_vm11 = vcmask 392512   ;;  %vm75_vm12 = vcmask 326912   ;;  %vm81_vm13 = vcmask 261312  }
   0xb   :  { %vm87_vm14 = vcmask 195712   ;;  %vm93_vm15 = vcmask 130112  }
   0xe   :  { %43 = vrot.lane.b32.xlu0 %v107_v7, %s137_s30  ;;  %49 = vrot.lane.b32.xlu1 %v108_v8, %s138_s2 }
  0x12   :  { %55 = vrot.lane.b32.xlu0 %v109_v9, %s139_s7  ;;  %61 = vrot.lane.b32.xlu1 %v110_v10, %s140_s8 }
  0x16   :  { %67 = vrot.lane.b32.xlu0 %v111_v11, %s141_s13  ;;  %73 = vrot.lane.b32.xlu1 %v112_v12, %s142_s14 }
  0x1a   :  { %79 = vrot.lane.b32.xlu0 %v113_v13, %s143_s19  ;;  %85 = vrot.lane.b32.xlu1 %v114_v14, %s144_s20 }
  0x1e   :  { %91 = vrot.lane.b32.xlu0 %v115_v15, %s145_s0 }
  0x74   :  { %v8_v16 = vpop.permute.xlu0 %7   ;;  %v20_v17 = vpop.permute.xlu1 %19  }
  0x75   :  { %10 = vst.msk [vmem:[#allocation0] sm:$0x1] %vm9_vm1, %v8_v16  }
  0x78   :  { %v14_v18 = vpop.permute.xlu0 %13   ;;  %v26_v19 = vpop.permute.xlu1 %25  }
  0x79   :  { %16 = vst.msk [vmem:[#allocation0] sm:$0x1] %vm15_vm2, %v14_v18  }
  0x7a   :  { %22 = vst.msk [vmem:[#allocation0] sm:$0x1] %vm21_vm3, %v20_v17  }
  0x7b   :  { %28 = vst.msk [vmem:[#allocation0] sm:$0x1] %vm27_vm4, %v26_v19  }
  0x7c   :  { %v32_v20 = vpop.permute.xlu0 %31   ;;  %v38_v21 = vpop.permute.xlu1 %37  }
  0x7d   :  { %34 = vst.msk [vmem:[#allocation0] sm:$0x1] %vm33_vm5, %v32_v20  }
  0x7e   :  { %40 = vst.msk [vmem:[#allocation0] sm:$0x1] %vm39_vm6, %v38_v21  }
  0x80   :  { %v44_v22 = vpop.permute.xlu0 %43   ;;  %v50_v23 = vpop.permute.xlu1 %49  }
  0x81   :  { %46 = vst.msk [vmem:[#allocation0] sm:$0x1] %vm45_vm7, %v44_v22  }
  0x82   :  { %52 = vst.msk [vmem:[#allocation0] sm:$0x1] %vm51_vm8, %v50_v23  }
  0x84   :  { %v56_v24 = vpop.permute.xlu0 %55   ;;  %v62_v25 = vpop.permute.xlu1 %61  }
  0x85   :  { %58 = vst.msk [vmem:[#allocation0] sm:$0x1] %vm57_vm9, %v56_v24  }
  0x86   :  { %64 = vst.msk [vmem:[#allocation0] sm:$0x1] %vm63_vm10, %v62_v25  }
  0x88   :  { %v68_v26 = vpop.permute.xlu0 %67   ;;  %v74_v27 = vpop.permute.xlu1 %73  }
  0x89   :  { %70 = vst.msk [vmem:[#allocation0] sm:$0x1] %vm69_vm11, %v68_v26  }
  0x8a   :  { %76 = vst.msk [vmem:[#allocation0] sm:$0x1] %vm75_vm12, %v74_v27  }
  0x8c   :  { %v80_v28 = vpop.permute.xlu0 %79   ;;  %v86_v29 = vpop.permute.xlu1 %85  }
  0x8d   :  { %82 = vst.msk [vmem:[#allocation0] sm:$0x1] %vm81_vm13, %v80_v28  }
  0x8e   :  { %88 = vst.msk [vmem:[#allocation0] sm:$0x1] %vm87_vm14, %v86_v29  }
  0x90   :  { %v92_v30 = vpop.permute.xlu0 %91  }
  0x91   :  { %94 = vst.msk [vmem:[#allocation0] sm:$0x1] %vm93_vm15, %v92_v30  }
  0x98   :  { %v98_v31 = vld [vmem:[#allocation0] sm:$0x1] }
  0x99   :  { %100 = vst [vmem:[%s208_s1] sm:$0x1] %v98_v31 }

// kernel: tile.128
= control target key start
LH: loop header
LB: loop body
LE: loop exit
PB: predicated region body
PF: predicated region fallthrough
CT: control target
= control target key end

     0   :  { %s28_s0 = inlined_call_operand.vmem [shape: f32[3], index: 0, kind: input, shape index: {}]   ;;  %s29_s1 = inlined_call_operand.vmem [shape: f32[16,3], index: 1, kind: output, shape index: {}]  }
   0x1   :  { %v4_v0 = vld [vmem:[%s28_s0] ss:$0 sm:$0xff] }
   0x2   :  { %5 = vst [vmem:[%s29_s1] sm:$0xff] %v4_v0  ;;  %8 = vst [vmem:[%s29_s1 + $0x8] sm:$0xff] %v4_v0 }

// kernel: tile.129
= control target key start
LH: loop header
LB: loop body
LE: loop exit
PB: predicated region body
PF: predicated region fallthrough
CT: control target
= control target key end

     0   :  { %s131_s10 = smov 45   ;;  %s132_s11 = smov 39   ;;  %vm3_vm0 = vcmask 23552   ;;  %vm9_vm1 = vcmask 392552   ;;  %vm15_vm2 = vcmask 367952   ;;  %vm21_vm3 = vcmask 343352   ;;  %s207_s0 = inlined_call_operand.vmem [shape: f32[16,3], index: 0, kind: input, shape index: {}]   ;;  %s208_s1 = inlined_call_operand.vmem [shape: f32[1,48], index: 1, kind: output, shape index: {}]  }
   0x1   :  { %v101_v0 = vld [vmem:[%s207_s0 + $0xf] sm:$0x1]   ;;  %v103_v1 = vld [vmem:[%s207_s0 + $0xd] sm:$0x1]   ;;  %v102_v2 = vld [vmem:[%s207_s0 + $0xe] sm:$0x1]  }
   0x2   :  { %7 = vrot.lane.b32.xlu0 %v101_v0, %s131_s10  ;;  %19 = vrot.lane.b32.xlu1 %v103_v1, %s132_s11  ;;  %v104_v3 = vld [vmem:[%s207_s0 + $0xc] sm:$0x1]   ;;  %s133_s16 = smov 42   ;;  %s134_s17 = smov 36   ;;  %v105_v4 = vld [vmem:[%s207_s0 + $0xb] sm:$0x1]  }
   0x3   :  { %v106_v5 = vld [vmem:[%s207_s0 + $0xa] sm:$0x1]   ;;  %v2_v6 = vld [vmem:[%s207_s0] sm:$0x1]   ;;  %s135_s24 = smov 33   ;;  %s136_s25 = smov 30  }
   0x4   :  { %4 = vst.msk [vmem:[#allocation0] sm:$0x1] %vm3_vm0, %v2_v6   ;;  %v107_v7 = vld [vmem:[%s207_s0 + $0x9] sm:$0x1]   ;;  %v108_v8 = vld [vmem:[%s207_s0 + $0x8] sm:$0x1]  }
   0x5   :  { %s137_s30 = smov 27   ;;  %s138_s2 = smov 24   ;;  %v109_v9 = vld [vmem:[%s207_s0 + $0x7] sm:$0x1]   ;;  %v110_v10 = vld [vmem:[%s207_s0 + $0x6] sm:$0x1]  }
   0x6   :  { %13 = vrot.lane.b32.xlu0 %v102_v2, %s133_s16  ;;  %25 = vrot.lane.b32.xlu1 %v104_v3, %s134_s17  ;;  %s139_s7 = smov 21   ;;  %s140_s8 = smov 18   ;;  %v111_v11 = vld [vmem:[%s207_s0 + $0x5] sm:$0x1]   ;;  %v112_v12 = vld [vmem:[%s207_s0 + $0x4] sm:$0x1]  }
   0x7   :  { %s141_s13 = smov 15   ;;  %s142_s14 = smov 12   ;;  %v113_v13 = vld [vmem:[%s207_s0 + $0x3] sm:$0x1]   ;;  %v114_v14 = vld [vmem:[%s207_s0 + $0x2] sm:$0x1]  }
   0x8   :  { %s143_s19 = smov 9   ;;  %s144_s20 = smov 6   ;;  %v115_v15 = vld [vmem:[%s207_s0 + $0x1] sm:$0x1]   ;;  %vm27_vm4 = vcmask 318752   ;;  %vm33_vm5 = vcmask 294152  }
   0x9   :  { %s145_s0 = smov 3   ;;  %vm39_vm6 = vcmask 269552   ;;  %vm45_vm7 = vcmask 244952   ;;  %vm51_vm8 = vcmask 220352   ;;  %vm57_vm9 = vcmask 195752  }
   0xa   :  { %31 = vrot.lane.b32.xlu0 %v105_v4, %s135_s24  ;;  %37 = vrot.lane.b32.xlu1 %v106_v5, %s136_s25  ;;  %vm63_vm10 = vcmask 171152   ;;  %vm69_vm11 = vcmask 146552   ;;  %vm75_vm12 = vcmask 121952   ;;  %vm81_vm13 = vcmask 97352  }
   0xb   :  { %vm87_vm14 = vcmask 72752   ;;  %vm93_vm15 = vcmask 48152  }
   0xe   :  { %43 = vrot.lane.b32.xlu0 %v107_v7, %s137_s30  ;;  %49 = vrot.lane.b32.xlu1 %v108_v8, %s138_s2 }
  0x12   :  { %55 = vrot.lane.b32.xlu0 %v109_v9, %s139_s7  ;;  %61 = vrot.lane.b32.xlu1 %v110_v10, %s140_s8 }
  0x16   :  { %67 = vrot.lane.b32.xlu0 %v111_v11, %s141_s13  ;;  %73 = vrot.lane.b32.xlu1 %v112_v12, %s142_s14 }
  0x1a   :  { %79 = vrot.lane.b32.xlu0 %v113_v13, %s143_s19  ;;  %85 = vrot.lane.b32.xlu1 %v114_v14, %s144_s20 }
  0x1e   :  { %91 = vrot.lane.b32.xlu0 %v115_v15, %s145_s0 }
  0x74   :  { %v8_v16 = vpop.permute.xlu0 %7   ;;  %v20_v17 = vpop.permute.xlu1 %19  }
  0x75   :  { %10 = vst.msk [vmem:[#allocation0] sm:$0x1] %vm9_vm1, %v8_v16  }
  0x78   :  { %v14_v18 = vpop.permute.xlu0 %13   ;;  %v26_v19 = vpop.permute.xlu1 %25  }
  0x79   :  { %16 = vst.msk [vmem:[#allocation0] sm:$0x1] %vm15_vm2, %v14_v18  }
  0x7a   :  { %22 = vst.msk [vmem:[#allocation0] sm:$0x1] %vm21_vm3, %v20_v17  }
  0x7b   :  { %28 = vst.msk [vmem:[#allocation0] sm:$0x1] %vm27_vm4, %v26_v19  }
  0x7c   :  { %v32_v20 = vpop.permute.xlu0 %31   ;;  %v38_v21 = vpop.permute.xlu1 %37  }
  0x7d   :  { %34 = vst.msk [vmem:[#allocation0] sm:$0x1] %vm33_vm5, %v32_v20  }
  0x7e   :  { %40 = vst.msk [vmem:[#allocation0] sm:$0x1] %vm39_vm6, %v38_v21  }
  0x80   :  { %v44_v22 = vpop.permute.xlu0 %43   ;;  %v50_v23 = vpop.permute.xlu1 %49  }
  0x81   :  { %46 = vst.msk [vmem:[#allocation0] sm:$0x1] %vm45_vm7, %v44_v22  }
  0x82   :  { %52 = vst.msk [vmem:[#allocation0] sm:$0x1] %vm51_vm8, %v50_v23  }
  0x84   :  { %v56_v24 = vpop.permute.xlu0 %55   ;;  %v62_v25 = vpop.permute.xlu1 %61  }
  0x85   :  { %58 = vst.msk [vmem:[#allocation0] sm:$0x1] %vm57_vm9, %v56_v24  }
  0x86   :  { %64 = vst.msk [vmem:[#allocation0] sm:$0x1] %vm63_vm10, %v62_v25  }
  0x88   :  { %v68_v26 = vpop.permute.xlu0 %67   ;;  %v74_v27 = vpop.permute.xlu1 %73  }
  0x89   :  { %70 = vst.msk [vmem:[#allocation0] sm:$0x1] %vm69_vm11, %v68_v26  }
  0x8a   :  { %76 = vst.msk [vmem:[#allocation0] sm:$0x1] %vm75_vm12, %v74_v27  }
  0x8c   :  { %v80_v28 = vpop.permute.xlu0 %79   ;;  %v86_v29 = vpop.permute.xlu1 %85  }
  0x8d   :  { %82 = vst.msk [vmem:[#allocation0] sm:$0x1] %vm81_vm13, %v80_v28  }
  0x8e   :  { %88 = vst.msk [vmem:[#allocation0] sm:$0x1] %vm87_vm14, %v86_v29  }
  0x90   :  { %v92_v30 = vpop.permute.xlu0 %91  }
  0x91   :  { %94 = vst.msk [vmem:[#allocation0] sm:$0x1] %vm93_vm15, %v92_v30  }
  0x98   :  { %v98_v31 = vld [vmem:[#allocation0] sm:$0x1] }
  0x99   :  { %100 = vst [vmem:[%s208_s1] sm:$0x1] %v98_v31 }

// kernel: tile.103
= control target key start
LH: loop header
LB: loop body
LE: loop exit
PB: predicated region body
PF: predicated region fallthrough
CT: control target
= control target key end

     0   :  { %s22_s0 = inlined_call_operand.vmem [shape: f32[16], index: 0, kind: input, shape index: {}]   ;;  %s23_s1 = inlined_call_operand.vmem [shape: f32[8,16], index: 1, kind: output, shape index: {}]  }
   0x1   :  { %v4_v0 = vld [vmem:[%s22_s0] ss:$0 sm:$0xff] }
   0x2   :  { %5 = vst [vmem:[%s23_s1] sm:$0xff] %v4_v0 }

// kernel: tile.104
= control target key start
LH: loop header
LB: loop body
LE: loop exit
PB: predicated region body
PF: predicated region fallthrough
CT: control target
= control target key end

     0   :  { %s67_s10 = smov 112   ;;  %s68_s11 = smov 80   ;;  %vm3_vm0 = vcmask 130048   ;;  %vm9_vm1 = vcmask 1048448   ;;  %vm15_vm2 = vcmask 917248   ;;  %vm21_vm3 = vcmask 786048   ;;  %s111_s0 = inlined_call_operand.vmem [shape: f32[8,16], index: 0, kind: input, shape index: {}]   ;;  %s112_s1 = inlined_call_operand.vmem [shape: f32[1,128], index: 1, kind: output, shape index: {}]  }
   0x1   :  { %v53_v0 = vld [vmem:[%s111_s0 + $0x7] sm:$0x1]   ;;  %v55_v1 = vld [vmem:[%s111_s0 + $0x5] sm:$0x1]   ;;  %v54_v2 = vld [vmem:[%s111_s0 + $0x6] sm:$0x1]  }
   0x2   :  { %7 = vrot.lane.b32.xlu0 %v53_v0, %s67_s10  ;;  %19 = vrot.lane.b32.xlu1 %v55_v1, %s68_s11  ;;  %v56_v3 = vld [vmem:[%s111_s0 + $0x4] sm:$0x1]   ;;  %v2_v4 = vld [vmem:[%s111_s0] sm:$0x1]   ;;  %s69_s18 = smov 96   ;;  %s70_s19 = smov 64  }
   0x3   :  { %4 = vst.msk [vmem:[#allocation0] sm:$0x1] %vm3_vm0, %v2_v4   ;;  %v57_v5 = vld [vmem:[%s111_s0 + $0x3] sm:$0x1]   ;;  %v58_v6 = vld [vmem:[%s111_s0 + $0x2] sm:$0x1]  }
   0x4   :  { %s71_s24 = smov 48   ;;  %s72_s25 = smov 32   ;;  %v59_v7 = vld [vmem:[%s111_s0 + $0x1] sm:$0x1]   ;;  %vm27_vm4 = vcmask 654848   ;;  %vm33_vm5 = vcmask 523648  }
   0x5   :  { %s73_s0 = smov 16   ;;  %vm39_vm6 = vcmask 392448   ;;  %vm45_vm7 = vcmask 261248  }
   0x6   :  { %13 = vrot.lane.b32.xlu0 %v54_v2, %s69_s18  ;;  %25 = vrot.lane.b32.xlu1 %v56_v3, %s70_s19 }
   0xa   :  { %31 = vrot.lane.b32.xlu0 %v57_v5, %s71_s24  ;;  %37 = vrot.lane.b32.xlu1 %v58_v6, %s72_s25 }
   0xe   :  { %43 = vrot.lane.b32.xlu0 %v59_v7, %s73_s0 }
  0x74   :  { %v8_v8 = vpop.permute.xlu0 %7   ;;  %v20_v9 = vpop.permute.xlu1 %19  }
  0x75   :  { %10 = vst.msk [vmem:[#allocation0] sm:$0x1] %vm9_vm1, %v8_v8  }
  0x78   :  { %v14_v10 = vpop.permute.xlu0 %13   ;;  %v26_v11 = vpop.permute.xlu1 %25  }
  0x79   :  { %16 = vst.msk [vmem:[#allocation0] sm:$0x1] %vm15_vm2, %v14_v10  }
  0x7a   :  { %22 = vst.msk [vmem:[#allocation0] sm:$0x1] %vm21_vm3, %v20_v9  }
  0x7b   :  { %28 = vst.msk [vmem:[#allocation0] sm:$0x1] %vm27_vm4, %v26_v11  }
  0x7c   :  { %v32_v12 = vpop.permute.xlu0 %31   ;;  %v38_v13 = vpop.permute.xlu1 %37  }
  0x7d   :  { %34 = vst.msk [vmem:[#allocation0] sm:$0x1] %vm33_vm5, %v32_v12  }
  0x7e   :  { %40 = vst.msk [vmem:[#allocation0] sm:$0x1] %vm39_vm6, %v38_v13  }
  0x80   :  { %v44_v14 = vpop.permute.xlu0 %43  }
  0x81   :  { %46 = vst.msk [vmem:[#allocation0] sm:$0x1] %vm45_vm7, %v44_v14  }
  0x88   :  { %v50_v15 = vld [vmem:[#allocation0] sm:$0x1] }
  0x89   :  { %52 = vst [vmem:[%s112_s1] sm:$0x1] %v50_v15 }

// kernel: tile.88
= control target key start
LH: loop header
LB: loop body
LE: loop exit
PB: predicated region body
PF: predicated region fallthrough
CT: control target
= control target key end

     0   :  { %s22_s0 = inlined_call_operand.vmem [shape: f32[64], index: 0, kind: input, shape index: {}]   ;;  %s23_s1 = inlined_call_operand.vmem [shape: f32[4,64], index: 1, kind: output, shape index: {}]  }
   0x1   :  { %v4_v0 = vld [vmem:[%s22_s0] ss:$0 sm:$0xff] }
   0x2   :  { %5 = vst [vmem:[%s23_s1] sm:$0xf] %v4_v0 }

// kernel: tile.89
= control target key start
LH: loop header
LB: loop body
LE: loop exit
PB: predicated region body
PF: predicated region fallthrough
CT: control target
= control target key end

     0   :  { %s6_s8 = smov 3  ;;  %vm8_vm0 = vcmask 523264   ;;  %s30_s9 = smov 64   ;;  %vm15_vm1 = vcmask 1048064   ;;  %s50_s0 = inlined_call_operand.vmem [shape: f32[4,64], index: 0, kind: input, shape index: {}]   ;;  %s51_s1 = inlined_call_operand.vmem [shape: f32[1,256], index: 1, kind: output, shape index: {}]  }
   0x1   :  { %v4_v0 = vld [vmem:[%s50_s0] sm:$0xf]  ;;  %s11_s0 = smov 3 }
   0x2   :  { %5 = vst [vmem:[#allocation1] sm:$0xf] %v4_v0 }
   0x9   :  { %v12_v1 = vld [vmem:[#allocation1 + $0x1] ss:$2 sm:%s11_s0]   ;;  %v7_v2 = vld [vmem:[#allocation1] ss:$2 sm:%s6_s8]  }
   0xa   :  { %13 = vrot.lane.b32.xlu0 %v12_v1, %s30_s9  ;;  %9 = vst.msk [vmem:[#allocation0] ss:$8 sm:$0x3] %vm8_vm0, %v7_v2  }
  0x7c   :  { %v14_v3 = vpop.permute.xlu0 %13  }
  0x7d   :  { %16 = vst.msk [vmem:[#allocation0] ss:$8 sm:$0x3] %vm15_vm1, %v14_v3  }
  0x84   :  { %v20_v4 = vld [vmem:[#allocation0] sm:$0x1]  ;;  %v24_v5 = vld [vmem:[#allocation0 + $0x8] sm:$0x1] }
  0x85   :  { %22 = vst [vmem:[%s51_s1] sm:$0x1] %v20_v4  ;;  %28 = vst [vmem:[%s51_s1 + $0x1] sm:$0x1] %v24_v5 }

// kernel: tile.83
= control target key start
LH: loop header
LB: loop body
LE: loop exit
PB: predicated region body
PF: predicated region fallthrough
CT: control target
= control target key end

     0   :  { %s22_s0 = inlined_call_operand.vmem [shape: f32[32], index: 0, kind: input, shape index: {}]   ;;  %s23_s1 = inlined_call_operand.vmem [shape: f32[4,32], index: 1, kind: output, shape index: {}]  }
   0x1   :  { %v4_v0 = vld [vmem:[%s22_s0] ss:$0 sm:$0xff] }
   0x2   :  { %5 = vst [vmem:[%s23_s1] sm:$0xf] %v4_v0 }

// kernel: tile.84
= control target key start
LH: loop header
LB: loop body
LE: loop exit
PB: predicated region body
PF: predicated region fallthrough
CT: control target
= control target key end

     0   :  { %vm7_vm0 = vcmask 261120   ;;  %s37_s8 = smov 32   ;;  %s38_s9 = smov 64   ;;  %vm13_vm1 = vcmask 1048320   ;;  %vm19_vm2 = vcmask 785920   ;;  %vm25_vm3 = vcmask 523520   ;;  %s55_s0 = inlined_call_operand.vmem [shape: f32[4,32], index: 0, kind: input, shape index: {}]   ;;  %s56_s1 = inlined_call_operand.vmem [shape: f32[1,128], index: 1, kind: output, shape index: {}]  }
   0x1   :  { %v4_v0 = vld [vmem:[%s55_s0] sm:$0xf]  ;;  %s36_s0 = smov 96  }
   0x2   :  { %5 = vst [vmem:[#allocation1] sm:$0xf] %v4_v0 }
   0x9   :  { %v10_v1 = vld [vmem:[#allocation1 + $0x3] sm:$0x1]   ;;  %v22_v2 = vld [vmem:[#allocation1 + $0x1] sm:$0x1]   ;;  %v6_v3 = vld [vmem:[#allocation1] sm:$0x1]  }
   0xa   :  { %11 = vrot.lane.b32.xlu0 %v10_v1, %s36_s0  ;;  %23 = vrot.lane.b32.xlu1 %v22_v2, %s37_s8  ;;  %v16_v4 = vld [vmem:[#allocation1 + $0x2] sm:$0x1]   ;;  %8 = vst.msk [vmem:[#allocation0] sm:$0x1] %vm7_vm0, %v6_v3  }
   0xe   :  { %17 = vrot.lane.b32.xlu0 %v16_v4, %s38_s9 }
  0x7c   :  { %v12_v5 = vpop.permute.xlu0 %11   ;;  %v24_v6 = vpop.permute.xlu1 %23  }
  0x7d   :  { %14 = vst.msk [vmem:[#allocation0] sm:$0x1] %vm13_vm1, %v12_v5  }
  0x80   :  { %v18_v7 = vpop.permute.xlu0 %17  }
  0x81   :  { %20 = vst.msk [vmem:[#allocation0] sm:$0x1] %vm19_vm2, %v18_v7  }
  0x82   :  { %26 = vst.msk [vmem:[#allocation0] sm:$0x1] %vm25_vm3, %v24_v6  }
  0x89   :  { %v30_v8 = vld [vmem:[#allocation0] sm:$0x1] }
  0x8a   :  { %32 = vst [vmem:[%s56_s1] sm:$0x1] %v30_v8 }

</bundles_post_ra>
